<compile_context>
chip_gen: v7x
topology: tpu7x:2x2x1
jax: 0.10.0
libtpu: 0.0.40
codegen_flags: <defaults>
</compile_context>

<pallas_src>
import functools
import jax
import jax.numpy as jnp
from jax.experimental import pallas as pl
from jax.experimental.pallas import tpu as pltpu

NUM_RELATION = 7
EDGE_INPUT_DIM = 59
NUM_ANGLE_BIN = 8
BN_EPS = 1e-5
PAD = 128                      # lane-dense feature width for every layer
PARAMS_PER_LAYER = 13


def _round_up(x, m):
  return ((x + m - 1) // m) * m


def _pad_to(a, shape):
  return jnp.pad(a, [(0, t - s) for s, t in zip(a.shape, shape)])


def _full_spec(shape):
  nd = len(shape)
  return pl.BlockSpec(shape, lambda i, _n=nd: (0,) * _n)


def _bn_train(x, gamma, beta):
  # torch BatchNorm1d training-mode statistics (biased variance, eps=1e-5).
  # gamma/beta are zero in the padded lanes, so padded columns stay exactly 0.
  mean = jnp.mean(x, axis=0, keepdims=True)
  var = jnp.mean(jnp.square(x - mean), axis=0, keepdims=True)
  return (x - mean) * jax.lax.rsqrt(var + BN_EPS) * gamma + beta


# --------------------------- fused forward kernel ---------------------------

def _gearnet_forward_kernel(*refs, short_cuts):
  f32, bf16 = jnp.float32, jnp.bfloat16
  R, B = NUM_RELATION, NUM_ANGLE_BIN
  n_layers = len(short_cuts)
  n_in = 6 + PARAMS_PER_LAYER * n_layers

  x_ref, ex_ref, a_node_ref, a_line_ref, b_cross_ref, onehot_ref = refs[:6]
  node_buf_ref, graph_buf_ref = refs[n_in], refs[n_in + 1]

  N = x_ref.shape[0]
  E = ex_ref.shape[0]
  P = x_ref.shape[1]                 # padded feature width (== PAD)
  kn = a_node_ref.shape[1]           # padded R*N
  kl = a_line_ref.shape[1]           # padded B*E
  kc = b_cross_ref.shape[1]          # padded R*E

  layer_input = x_ref[...]           # (N, P) f32, pad lanes are 0
  edge_in_b = ex_ref[...]            # (E, P) bf16 (pre-cast in driver)

  for li in range(n_layers):
    (w_lin, w_self, b_comb, b_lin, conv_g, conv_b, bn_g, bn_b,
     e_w_lin, e_w_self, e_b_comb, e_conv_g, e_conv_b) = refs[
         6 + li * PARAMS_PER_LAYER: 6 + (li + 1) * PARAMS_PER_LAYER]

    xb = layer_input.astype(bf16)

    # ---------------- node-level relational conv -------------------------
    # Fold relation axis into the contraction: pre = A_flat @ Y + x@W_self + b
    # with Y[r*N + k, :] = (x @ W_r)[k, :]; Y stays in registers.
    parts = [jnp.dot(xb, w_lin[r], preferred_element_type=f32).astype(bf16)
             for r in range(R)]
    if kn > R * N:
      parts.append(jnp.zeros((kn - R * N, P), bf16))
    y = jnp.concatenate(parts, axis=0)                         # (kn, P) bf16
    pre = jnp.dot(a_node_ref[...], y, preferred_element_type=f32)
    pre = pre + jnp.dot(xb, w_self[...], preferred_element_type=f32)
    pre = pre + b_comb[...]
    hidden = jnp.maximum(_bn_train(pre, conv_g[...], conv_b[...]), 0.0)
    if short_cuts[li]:               # real dims match -> residual add
      hidden = hidden + layer_input

    # ------------- edge-level relational conv (spatial line graph) -------
    parts_e = [jnp.dot(edge_in_b, e_w_lin[b],
                       preferred_element_type=f32).astype(bf16)
               for b in range(B)]
    if kl > B * E:
      parts_e.append(jnp.zeros((kl - B * E, P), bf16))
    ye = jnp.concatenate(parts_e, axis=0)                      # (kl, P) bf16
    e_pre = jnp.dot(a_line_ref[...], ye, preferred_element_type=f32)
    e_pre = e_pre + jnp.dot(edge_in_b, e_w_self[...],
                            preferred_element_type=f32)
    e_pre = e_pre + e_b_comb[...]
    edge_hidden = jnp.maximum(
        _bn_train(e_pre, e_conv_g[...], e_conv_b[...]), 0.0)
    ehb = edge_hidden.astype(bf16)

    # ------------- edge-message -> node update (reuses node conv linear) --
    parts_c = [jnp.dot(ehb, w_lin[r], preferred_element_type=f32).astype(bf16)
               for r in range(R)]
    if kc > R * E:
      parts_c.append(jnp.zeros((kc - R * E, P), bf16))
    yc = jnp.concatenate(parts_c, axis=0)                      # (kc, P) bf16
    upd = jnp.dot(b_cross_ref[...], yc, preferred_element_type=f32)
    upd = jnp.maximum(upd + b_lin[...], 0.0)
    hidden = hidden + upd

    # ------------- outer batch norm + lane-dense 128-aligned store --------
    hidden = _bn_train(hidden, bn_g[...], bn_b[...])
    node_buf_ref[:, li * P:(li + 1) * P] = hidden              # full-lane store

    layer_input = hidden
    edge_in_b = ehb

  # ---------------- concat_hidden + sum readout ---------------------------
  graph_buf_ref[...] = jnp.dot(onehot_ref[...], node_buf_ref[...],
                               preferred_element_type=f32)


# -------------------------- parameters & forward ----------------------------

def init_params(key, input_dim, hidden_dims):
  dims = [input_dim] + list(hidden_dims)
  edge_dims = [EDGE_INPUT_DIM] + dims[:-1]
  params = []
  for i in range(len(hidden_dims)):
    key, *ks = jax.random.split(key, 9)
    din, dout = dims[i], dims[i + 1]
    ein, eout = edge_dims[i], edge_dims[i + 1]   # eout == dims[i]
    params.append(dict(
        # node GeometricRelationalGraphConv i
        w_lin=0.1 * jax.random.normal(ks[0], (NUM_RELATION * din, dout), jnp.float32),
        b_lin=0.1 * jax.random.normal(ks[1], (dout,), jnp.float32),
        w_self=0.1 * jax.random.normal(ks[2], (din, dout), jnp.float32),
        b_self=0.1 * jax.random.normal(ks[3], (dout,), jnp.float32),
        conv_gamma=jnp.ones((dout,), jnp.float32),
        conv_beta=jnp.zeros((dout,), jnp.float32),
        # outer batch_norms[i]
        bn_gamma=jnp.ones((dout,), jnp.float32),
        bn_beta=jnp.zeros((dout,), jnp.float32),
        # edge GeometricRelationalGraphConv i (spatial line graph)
        e_w_lin=0.1 * jax.random.normal(ks[4], (NUM_ANGLE_BIN * ein, eout), jnp.float32),
        e_b_lin=0.1 * jax.random.normal(ks[5], (eout,), jnp.float32),
        e_w_self=0.1 * jax.random.normal(ks[6], (ein, eout), jnp.float32),
        e_b_self=0.1 * jax.random.normal(ks[7], (eout,), jnp.float32),
        e_conv_gamma=jnp.ones((eout,), jnp.float32),
        e_conv_beta=jnp.zeros((eout,), jnp.float32),
    ))
  return params


def _prep_layer(p):
  """Pad every feature dim to PAD lanes, pre-cast matmul weights to bf16."""
  R, B = NUM_RELATION, NUM_ANGLE_BIN
  bf16 = jnp.bfloat16
  din, dout = p["w_self"].shape
  ein, eout = p["e_w_self"].shape
  w_lin3 = _pad_to(p["w_lin"].reshape(R, din, dout), (R, PAD, PAD)).astype(bf16)
  w_self = _pad_to(p["w_self"], (PAD, PAD)).astype(bf16)
  e_w_lin3 = _pad_to(p["e_w_lin"].reshape(B, ein, eout), (B, PAD, PAD)).astype(bf16)
  e_w_self = _pad_to(p["e_w_self"], (PAD, PAD)).astype(bf16)
  # biases / gammas / betas padded with ZEROS so padded lanes stay exactly 0
  row = lambda v: _pad_to(v.reshape(1, -1).astype(jnp.float32), (1, PAD))
  return [
      w_lin3, w_self,
      row(p["b_lin"] + p["b_self"]),           # combined linear+self_loop bias
      row(p["b_lin"]),                         # bias of the cross update
      row(p["conv_gamma"]), row(p["conv_beta"]),
      row(p["bn_gamma"]), row(p["bn_beta"]),
      e_w_lin3, e_w_self,
      row(p["e_b_lin"] + p["e_b_self"]),
      row(p["e_conv_gamma"]), row(p["e_conv_beta"]),
  ]


def gearnet_forward(params, node_x, edge_feat, a_node, a_line, b_cross,
                    graph_onehot):
  """Whole GearNet forward in one fused Pallas kernel."""
  R, B = NUM_RELATION, NUM_ANGLE_BIN
  N, din0 = node_x.shape
  E = edge_feat.shape[0]
  G = graph_onehot.shape[0]
  hidden_dims = [int(p["w_self"].shape[1]) for p in params]
  n_layers = len(params)
  assert din0 <= PAD and all(d <= PAD for d in hidden_dims)

  # pad flattened aggregation K dims up to multiples of 256 (full MXU passes)
  kn = _round_up(R * N, 256)
  kl = _round_up(B * E, 256)
  kc = _round_up(R * E, 256)
  g_pad = _round_up(G, 8)

  x_p = _pad_to(node_x.astype(jnp.float32), (N, PAD))
  ex_p = _pad_to(edge_feat.astype(jnp.float32), (E, PAD)).astype(jnp.bfloat16)
  # adjacency cast to bf16 AFTER exact f32 scatter-add (small integer sums)
  a_node_p = _pad_to(a_node.astype(jnp.bfloat16), (N, kn))
  a_line_p = _pad_to(a_line.astype(jnp.bfloat16), (E, kl))
  b_cross_p = _pad_to(b_cross.astype(jnp.bfloat16), (N, kc))
  onehot_p = _pad_to(graph_onehot.astype(jnp.float32), (g_pad, N))

  short_cuts = []
  layer_params = []
  din = din0
  for p in params:
    dout = int(p["w_self"].shape[1])
    short_cuts.append(din == dout)             # torch: hidden.shape == input
    layer_params += _prep_layer(p)
    din = dout

  inputs = [x_p, ex_p, a_node_p, a_line_p, b_cross_p, onehot_p] + layer_params
  fbuf = n_layers * PAD

  kernel = functools.partial(_gearnet_forward_kernel,
                             short_cuts=tuple(short_cuts))
  node_buf, graph_buf = pl.pallas_call(
      kernel,
      out_shape=(jax.ShapeDtypeStruct((N, fbuf), jnp.float32),
                 jax.ShapeDtypeStruct((g_pad, fbuf), jnp.float32)),
      grid=(1,),
      in_specs=[_full_spec(a.shape) for a in inputs],
      out_specs=(_full_spec((N, fbuf)), _full_spec((g_pad, fbuf))),
      compiler_params=pltpu.CompilerParams(
          dimension_semantics=("arbitrary",),
          vmem_limit_bytes=32 * 1024 * 1024),
  )(*inputs)

  # strip the lane padding; concat_hidden over layers (tiny XLA slices)
  node_feature = jnp.concatenate(
      [node_buf[:, l * PAD:l * PAD + d] for l, d in enumerate(hidden_dims)],
      axis=-1)
  graph_feature = jnp.concatenate(
      [graph_buf[:G, l * PAD:l * PAD + d] for l, d in enumerate(hidden_dims)],
      axis=-1)
  return {"graph_feature": graph_feature, "node_feature": node_feature}


# --------------------------------- driver -----------------------------------

if __name__ == "__main__":
  key = jax.random.PRNGKey(0)
  N, E = 32, 64                      # nodes / edges (2 graphs of 16 nodes)
  input_dim = 16
  hidden_dims = [16, 32]             # layer 0 has short_cut (16==16), layer 1 not

  k1, k2, k3, k4, k5, kp = jax.random.split(key, 6)
  node_in = jax.random.randint(k1, (E,), 0, N)
  node_out = jax.random.randint(k2, (E,), 0, N)
  relation = jax.random.randint(k3, (E,), 0, NUM_RELATION)
  edge_weight = jnp.ones((E,), jnp.float32)
  node_x = jax.random.normal(k4, (N, input_dim), jnp.float32)
  edge_feat = jax.random.normal(k5, (E, EDGE_INPUT_DIM), jnp.float32)

  # relation-flattened dense adjacency: a_node[dst, rel*N + src]
  a_node = jnp.zeros((N, NUM_RELATION * N), jnp.float32).at[
      node_out, relation * N + node_in].add(edge_weight)

  # synthetic spatial line graph: edge a -> edge b whenever a.dst == b.src
  # (angle bin = deterministic hash of the edge pair; see TODO above)
  e_ids = jnp.arange(E)
  connect = (node_out[:, None] == node_in[None, :]) & (e_ids[:, None] != e_ids[None, :])
  bins = (e_ids[:, None] * 3 + e_ids[None, :] * 5) % NUM_ANGLE_BIN
  a_flat = jnp.repeat(e_ids, E)          # source edge a (rows of connect)
  b_flat = jnp.tile(e_ids, E)            # destination edge b (cols of connect)
  a_line = jnp.zeros((E, NUM_ANGLE_BIN * E), jnp.float32).at[
      b_flat, bins.reshape(-1) * E + a_flat].add(
          connect.reshape(-1).astype(jnp.float32))

  # cross aggregation: b_cross[dst_node, rel*E + edge] = edge_weight
  b_cross = jnp.zeros((N, NUM_RELATION * E), jnp.float32).at[
      node_out, relation * E + e_ids].add(edge_weight)

  # node2graph -> one-hot for the sum readout (2 graphs)
  node2graph = (jnp.arange(N) >= N // 2).astype(jnp.int32)
  graph_onehot = (node2graph[None, :] == jnp.arange(2)[:, None]).astype(jnp.float32)

  params = init_params(kp, input_dim, hidden_dims)

  fwd = jax.jit(gearnet_forward)
  out = fwd(params, node_x, edge_feat, a_node, a_line, b_cross, graph_onehot)
  jax.block_until_ready(out)
  assert out["node_feature"].shape == (N, sum(hidden_dims))
  assert out["graph_feature"].shape == (2, sum(hidden_dims))
  print("KERNEL_OK")
</pallas_src>

<mosaic_0001>
module attributes {stable_mosaic.version = 11 : i64} {
  func.func @_gearnet_forward_kernel(%arg0: i32, %arg1: memref<32x128xf32, #tpu.memory_space<vmem>>, %arg2: memref<64x128xbf16, #tpu.memory_space<vmem>>, %arg3: memref<32x256xbf16, #tpu.memory_space<vmem>>, %arg4: memref<64x512xbf16, #tpu.memory_space<vmem>>, %arg5: memref<32x512xbf16, #tpu.memory_space<vmem>>, %arg6: memref<8x32xf32, #tpu.memory_space<vmem>>, %arg7: memref<7x128x128xbf16, #tpu.memory_space<vmem>>, %arg8: memref<128x128xbf16, #tpu.memory_space<vmem>>, %arg9: memref<1x128xf32, #tpu.memory_space<vmem>>, %arg10: memref<1x128xf32, #tpu.memory_space<vmem>>, %arg11: memref<1x128xf32, #tpu.memory_space<vmem>>, %arg12: memref<1x128xf32, #tpu.memory_space<vmem>>, %arg13: memref<1x128xf32, #tpu.memory_space<vmem>>, %arg14: memref<1x128xf32, #tpu.memory_space<vmem>>, %arg15: memref<8x128x128xbf16, #tpu.memory_space<vmem>>, %arg16: memref<128x128xbf16, #tpu.memory_space<vmem>>, %arg17: memref<1x128xf32, #tpu.memory_space<vmem>>, %arg18: memref<1x128xf32, #tpu.memory_space<vmem>>, %arg19: memref<1x128xf32, #tpu.memory_space<vmem>>, %arg20: memref<7x128x128xbf16, #tpu.memory_space<vmem>>, %arg21: memref<128x128xbf16, #tpu.memory_space<vmem>>, %arg22: memref<1x128xf32, #tpu.memory_space<vmem>>, %arg23: memref<1x128xf32, #tpu.memory_space<vmem>>, %arg24: memref<1x128xf32, #tpu.memory_space<vmem>>, %arg25: memref<1x128xf32, #tpu.memory_space<vmem>>, %arg26: memref<1x128xf32, #tpu.memory_space<vmem>>, %arg27: memref<1x128xf32, #tpu.memory_space<vmem>>, %arg28: memref<8x128x128xbf16, #tpu.memory_space<vmem>>, %arg29: memref<128x128xbf16, #tpu.memory_space<vmem>>, %arg30: memref<1x128xf32, #tpu.memory_space<vmem>>, %arg31: memref<1x128xf32, #tpu.memory_space<vmem>>, %arg32: memref<1x128xf32, #tpu.memory_space<vmem>>, %arg33: memref<32x256xf32, #tpu.memory_space<vmem>>, %arg34: memref<8x256xf32, #tpu.memory_space<vmem>>) attributes {dimension_semantics = [#tpu.dimension_semantics<arbitrary>], iteration_bounds = array<i64: 1>, scalar_prefetch = 0 : i64, scratch_operands = 0 : i64, tpu.core_type = #tpu.core_type<tc>, window_params = [{pipeline_mode = #tpu.pipeline_mode<synchronous>, transform_indices = @transform_0, window_bounds = array<i64: 32, 128>}, {pipeline_mode = #tpu.pipeline_mode<synchronous>, transform_indices = @transform_1, window_bounds = array<i64: 64, 128>}, {pipeline_mode = #tpu.pipeline_mode<synchronous>, transform_indices = @transform_2, window_bounds = array<i64: 32, 256>}, {pipeline_mode = #tpu.pipeline_mode<synchronous>, transform_indices = @transform_3, window_bounds = array<i64: 64, 512>}, {pipeline_mode = #tpu.pipeline_mode<synchronous>, transform_indices = @transform_4, window_bounds = array<i64: 32, 512>}, {pipeline_mode = #tpu.pipeline_mode<synchronous>, transform_indices = @transform_5, window_bounds = array<i64: 8, 32>}, {pipeline_mode = #tpu.pipeline_mode<synchronous>, transform_indices = @transform_6, window_bounds = array<i64: 7, 128, 128>}, {pipeline_mode = #tpu.pipeline_mode<synchronous>, transform_indices = @transform_7, window_bounds = array<i64: 128, 128>}, {pipeline_mode = #tpu.pipeline_mode<synchronous>, transform_indices = @transform_8, window_bounds = array<i64: 1, 128>}, {pipeline_mode = #tpu.pipeline_mode<synchronous>, transform_indices = @transform_9, window_bounds = array<i64: 1, 128>}, {pipeline_mode = #tpu.pipeline_mode<synchronous>, transform_indices = @transform_10, window_bounds = array<i64: 1, 128>}, {pipeline_mode = #tpu.pipeline_mode<synchronous>, transform_indices = @transform_11, window_bounds = array<i64: 1, 128>}, {pipeline_mode = #tpu.pipeline_mode<synchronous>, transform_indices = @transform_12, window_bounds = array<i64: 1, 128>}, {pipeline_mode = #tpu.pipeline_mode<synchronous>, transform_indices = @transform_13, window_bounds = array<i64: 1, 128>}, {pipeline_mode = #tpu.pipeline_mode<synchronous>, transform_indices = @transform_14, window_bounds = array<i64: 8, 128, 128>}, {pipeline_mode = #tpu.pipeline_mode<synchronous>, transform_indices = @transform_15, window_bounds = array<i64: 128, 128>}, {pipeline_mode = #tpu.pipeline_mode<synchronous>, transform_indices = @transform_16, window_bounds = array<i64: 1, 128>}, {pipeline_mode = #tpu.pipeline_mode<synchronous>, transform_indices = @transform_17, window_bounds = array<i64: 1, 128>}, {pipeline_mode = #tpu.pipeline_mode<synchronous>, transform_indices = @transform_18, window_bounds = array<i64: 1, 128>}, {pipeline_mode = #tpu.pipeline_mode<synchronous>, transform_indices = @transform_19, window_bounds = array<i64: 7, 128, 128>}, {pipeline_mode = #tpu.pipeline_mode<synchronous>, transform_indices = @transform_20, window_bounds = array<i64: 128, 128>}, {pipeline_mode = #tpu.pipeline_mode<synchronous>, transform_indices = @transform_21, window_bounds = array<i64: 1, 128>}, {pipeline_mode = #tpu.pipeline_mode<synchronous>, transform_indices = @transform_22, window_bounds = array<i64: 1, 128>}, {pipeline_mode = #tpu.pipeline_mode<synchronous>, transform_indices = @transform_23, window_bounds = array<i64: 1, 128>}, {pipeline_mode = #tpu.pipeline_mode<synchronous>, transform_indices = @transform_24, window_bounds = array<i64: 1, 128>}, {pipeline_mode = #tpu.pipeline_mode<synchronous>, transform_indices = @transform_25, window_bounds = array<i64: 1, 128>}, {pipeline_mode = #tpu.pipeline_mode<synchronous>, transform_indices = @transform_26, window_bounds = array<i64: 1, 128>}, {pipeline_mode = #tpu.pipeline_mode<synchronous>, transform_indices = @transform_27, window_bounds = array<i64: 8, 128, 128>}, {pipeline_mode = #tpu.pipeline_mode<synchronous>, transform_indices = @transform_28, window_bounds = array<i64: 128, 128>}, {pipeline_mode = #tpu.pipeline_mode<synchronous>, transform_indices = @transform_29, window_bounds = array<i64: 1, 128>}, {pipeline_mode = #tpu.pipeline_mode<synchronous>, transform_indices = @transform_30, window_bounds = array<i64: 1, 128>}, {pipeline_mode = #tpu.pipeline_mode<synchronous>, transform_indices = @transform_31, window_bounds = array<i64: 1, 128>}, {pipeline_mode = #tpu.pipeline_mode<synchronous>, transform_indices = @transform_32, window_bounds = array<i64: 32, 256>}, {pipeline_mode = #tpu.pipeline_mode<synchronous>, transform_indices = @transform_33, window_bounds = array<i64: 8, 256>}]} {
    %c0 = arith.constant 0 : index
    %c0_0 = arith.constant 0 : index
    %0 = vector.load %arg1[%c0, %c0_0] : memref<32x128xf32, #tpu.memory_space<vmem>>, vector<32x128xf32>
    %c0_1 = arith.constant 0 : index
    %c0_2 = arith.constant 0 : index
    %1 = vector.load %arg2[%c0_1, %c0_2] : memref<64x128xbf16, #tpu.memory_space<vmem>>, vector<64x128xbf16>
    %2 = arith.truncf %0 : vector<32x128xf32> to vector<32x128xbf16>
    %c0_3 = arith.constant 0 : index
    %c0_4 = arith.constant 0 : index
    %c0_5 = arith.constant 0 : index
    %3 = vector.load %arg7[%c0_3, %c0_4, %c0_5] : memref<7x128x128xbf16, #tpu.memory_space<vmem>>, vector<1x128x128xbf16>
    %4 = vector.shape_cast %3 : vector<1x128x128xbf16> to vector<128x128xbf16>
    %cst = arith.constant dense<0.000000e+00> : vector<32x128xf32>
    %5 = tpu.matmul %2, %4, %cst {dimension_numbers = #tpu.dot_dimension_numbers<[1], [0], [0], [1], [0, 0, 1, 1], [], []>} : vector<32x128xbf16>, vector<128x128xbf16>, vector<32x128xf32> -> vector<32x128xf32>
    %6 = arith.truncf %5 : vector<32x128xf32> to vector<32x128xbf16>
    %c1 = arith.constant 1 : index
    %c0_6 = arith.constant 0 : index
    %c0_7 = arith.constant 0 : index
    %7 = vector.load %arg7[%c1, %c0_6, %c0_7] : memref<7x128x128xbf16, #tpu.memory_space<vmem>>, vector<1x128x128xbf16>
    %8 = vector.shape_cast %7 : vector<1x128x128xbf16> to vector<128x128xbf16>
    %cst_8 = arith.constant dense<0.000000e+00> : vector<32x128xf32>
    %9 = tpu.matmul %2, %8, %cst_8 {dimension_numbers = #tpu.dot_dimension_numbers<[1], [0], [0], [1], [0, 0, 1, 1], [], []>} : vector<32x128xbf16>, vector<128x128xbf16>, vector<32x128xf32> -> vector<32x128xf32>
    %10 = arith.truncf %9 : vector<32x128xf32> to vector<32x128xbf16>
    %c2 = arith.constant 2 : index
    %c0_9 = arith.constant 0 : index
    %c0_10 = arith.constant 0 : index
    %11 = vector.load %arg7[%c2, %c0_9, %c0_10] : memref<7x128x128xbf16, #tpu.memory_space<vmem>>, vector<1x128x128xbf16>
    %12 = vector.shape_cast %11 : vector<1x128x128xbf16> to vector<128x128xbf16>
    %cst_11 = arith.constant dense<0.000000e+00> : vector<32x128xf32>
    %13 = tpu.matmul %2, %12, %cst_11 {dimension_numbers = #tpu.dot_dimension_numbers<[1], [0], [0], [1], [0, 0, 1, 1], [], []>} : vector<32x128xbf16>, vector<128x128xbf16>, vector<32x128xf32> -> vector<32x128xf32>
    %14 = arith.truncf %13 : vector<32x128xf32> to vector<32x128xbf16>
    %c3 = arith.constant 3 : index
    %c0_12 = arith.constant 0 : index
    %c0_13 = arith.constant 0 : index
    %15 = vector.load %arg7[%c3, %c0_12, %c0_13] : memref<7x128x128xbf16, #tpu.memory_space<vmem>>, vector<1x128x128xbf16>
    %16 = vector.shape_cast %15 : vector<1x128x128xbf16> to vector<128x128xbf16>
    %cst_14 = arith.constant dense<0.000000e+00> : vector<32x128xf32>
    %17 = tpu.matmul %2, %16, %cst_14 {dimension_numbers = #tpu.dot_dimension_numbers<[1], [0], [0], [1], [0, 0, 1, 1], [], []>} : vector<32x128xbf16>, vector<128x128xbf16>, vector<32x128xf32> -> vector<32x128xf32>
    %18 = arith.truncf %17 : vector<32x128xf32> to vector<32x128xbf16>
    %c4 = arith.constant 4 : index
    %c0_15 = arith.constant 0 : index
    %c0_16 = arith.constant 0 : index
    %19 = vector.load %arg7[%c4, %c0_15, %c0_16] : memref<7x128x128xbf16, #tpu.memory_space<vmem>>, vector<1x128x128xbf16>
    %20 = vector.shape_cast %19 : vector<1x128x128xbf16> to vector<128x128xbf16>
    %cst_17 = arith.constant dense<0.000000e+00> : vector<32x128xf32>
    %21 = tpu.matmul %2, %20, %cst_17 {dimension_numbers = #tpu.dot_dimension_numbers<[1], [0], [0], [1], [0, 0, 1, 1], [], []>} : vector<32x128xbf16>, vector<128x128xbf16>, vector<32x128xf32> -> vector<32x128xf32>
    %22 = arith.truncf %21 : vector<32x128xf32> to vector<32x128xbf16>
    %c5 = arith.constant 5 : index
    %c0_18 = arith.constant 0 : index
    %c0_19 = arith.constant 0 : index
    %23 = vector.load %arg7[%c5, %c0_18, %c0_19] : memref<7x128x128xbf16, #tpu.memory_space<vmem>>, vector<1x128x128xbf16>
    %24 = vector.shape_cast %23 : vector<1x128x128xbf16> to vector<128x128xbf16>
    %cst_20 = arith.constant dense<0.000000e+00> : vector<32x128xf32>
    %25 = tpu.matmul %2, %24, %cst_20 {dimension_numbers = #tpu.dot_dimension_numbers<[1], [0], [0], [1], [0, 0, 1, 1], [], []>} : vector<32x128xbf16>, vector<128x128xbf16>, vector<32x128xf32> -> vector<32x128xf32>
    %26 = arith.truncf %25 : vector<32x128xf32> to vector<32x128xbf16>
    %c6 = arith.constant 6 : index
    %c0_21 = arith.constant 0 : index
    %c0_22 = arith.constant 0 : index
    %27 = vector.load %arg7[%c6, %c0_21, %c0_22] : memref<7x128x128xbf16, #tpu.memory_space<vmem>>, vector<1x128x128xbf16>
    %28 = vector.shape_cast %27 : vector<1x128x128xbf16> to vector<128x128xbf16>
    %cst_23 = arith.constant dense<0.000000e+00> : vector<32x128xf32>
    %29 = tpu.matmul %2, %28, %cst_23 {dimension_numbers = #tpu.dot_dimension_numbers<[1], [0], [0], [1], [0, 0, 1, 1], [], []>} : vector<32x128xbf16>, vector<128x128xbf16>, vector<32x128xf32> -> vector<32x128xf32>
    %30 = arith.truncf %29 : vector<32x128xf32> to vector<32x128xbf16>
    %cst_24 = arith.constant 0.000000e+00 : bf16
    %31 = vector.broadcast %cst_24 : bf16 to vector<32x128xbf16>
    %32 = tpu.concatenate %6, %10, %14, %18, %22, %26, %30, %31 in 0 : vector<32x128xbf16>, vector<32x128xbf16>, vector<32x128xbf16>, vector<32x128xbf16>, vector<32x128xbf16>, vector<32x128xbf16>, vector<32x128xbf16>, vector<32x128xbf16> -> vector<256x128xbf16>
    %c0_25 = arith.constant 0 : index
    %c0_26 = arith.constant 0 : index
    %33 = vector.load %arg3[%c0_25, %c0_26] : memref<32x256xbf16, #tpu.memory_space<vmem>>, vector<32x256xbf16>
    %cst_27 = arith.constant dense<0.000000e+00> : vector<32x128xf32>
    %34 = tpu.matmul %33, %32, %cst_27 {dimension_numbers = #tpu.dot_dimension_numbers<[1], [0], [0], [1], [0, 0, 1, 1], [], []>} : vector<32x256xbf16>, vector<256x128xbf16>, vector<32x128xf32> -> vector<32x128xf32>
    %c0_28 = arith.constant 0 : index
    %c0_29 = arith.constant 0 : index
    %35 = vector.load %arg8[%c0_28, %c0_29] : memref<128x128xbf16, #tpu.memory_space<vmem>>, vector<128x128xbf16>
    %cst_30 = arith.constant dense<0.000000e+00> : vector<32x128xf32>
    %36 = tpu.matmul %2, %35, %cst_30 {dimension_numbers = #tpu.dot_dimension_numbers<[1], [0], [0], [1], [0, 0, 1, 1], [], []>} : vector<32x128xbf16>, vector<128x128xbf16>, vector<32x128xf32> -> vector<32x128xf32>
    %37 = arith.addf %34, %36 : vector<32x128xf32>
    %c0_31 = arith.constant 0 : index
    %c0_32 = arith.constant 0 : index
    %38 = vector.load %arg9[%c0_31, %c0_32] : memref<1x128xf32, #tpu.memory_space<vmem>>, vector<1x128xf32>
    %39 = vector.broadcast %38 : vector<1x128xf32> to vector<32x128xf32>
    %40 = arith.addf %37, %39 : vector<32x128xf32>
    %c0_33 = arith.constant 0 : index
    %c0_34 = arith.constant 0 : index
    %41 = vector.load %arg11[%c0_33, %c0_34] : memref<1x128xf32, #tpu.memory_space<vmem>>, vector<1x128xf32>
    %c0_35 = arith.constant 0 : index
    %c0_36 = arith.constant 0 : index
    %42 = vector.load %arg12[%c0_35, %c0_36] : memref<1x128xf32, #tpu.memory_space<vmem>>, vector<1x128xf32>
    %cst_37 = arith.constant dense<0.000000e+00> : vector<128xf32>
    %43 = vector.multi_reduction <add>, %40, %cst_37 [0] : vector<32x128xf32> to vector<128xf32>
    %44 = vector.shape_cast %43 : vector<128xf32> to vector<1x128xf32>
    %cst_38 = arith.constant 3.200000e+01 : f32
    %45 = vector.broadcast %cst_38 : f32 to vector<1x128xf32>
    %46 = arith.divf %44, %45 : vector<1x128xf32>
    %47 = vector.broadcast %46 : vector<1x128xf32> to vector<32x128xf32>
    %48 = arith.subf %40, %47 : vector<32x128xf32>
    %49 = arith.mulf %48, %48 : vector<32x128xf32>
    %cst_39 = arith.constant dense<0.000000e+00> : vector<128xf32>
    %50 = vector.multi_reduction <add>, %49, %cst_39 [0] : vector<32x128xf32> to vector<128xf32>
    %51 = vector.shape_cast %50 : vector<128xf32> to vector<1x128xf32>
    %cst_40 = arith.constant 3.200000e+01 : f32
    %52 = vector.broadcast %cst_40 : f32 to vector<1x128xf32>
    %53 = arith.divf %51, %52 : vector<1x128xf32>
    %54 = vector.broadcast %46 : vector<1x128xf32> to vector<32x128xf32>
    %55 = arith.subf %40, %54 : vector<32x128xf32>
    %cst_41 = arith.constant 9.99999974E-6 : f32
    %56 = vector.broadcast %cst_41 : f32 to vector<1x128xf32>
    %57 = arith.addf %53, %56 : vector<1x128xf32>
    %58 = math.rsqrt %57 : vector<1x128xf32>
    %59 = vector.broadcast %58 : vector<1x128xf32> to vector<32x128xf32>
    %60 = arith.mulf %55, %59 : vector<32x128xf32>
    %61 = vector.broadcast %41 : vector<1x128xf32> to vector<32x128xf32>
    %62 = arith.mulf %60, %61 : vector<32x128xf32>
    %63 = vector.broadcast %42 : vector<1x128xf32> to vector<32x128xf32>
    %64 = arith.addf %62, %63 : vector<32x128xf32>
    %cst_42 = arith.constant 0.000000e+00 : f32
    %65 = vector.broadcast %cst_42 : f32 to vector<32x128xf32>
    %66 = arith.maximumf %64, %65 : vector<32x128xf32>
    %67 = arith.addf %66, %0 : vector<32x128xf32>
    %c0_43 = arith.constant 0 : index
    %c0_44 = arith.constant 0 : index
    %c0_45 = arith.constant 0 : index
    %68 = vector.load %arg15[%c0_43, %c0_44, %c0_45] : memref<8x128x128xbf16, #tpu.memory_space<vmem>>, vector<1x128x128xbf16>
    %69 = vector.shape_cast %68 : vector<1x128x128xbf16> to vector<128x128xbf16>
    %cst_46 = arith.constant dense<0.000000e+00> : vector<64x128xf32>
    %70 = tpu.matmul %1, %69, %cst_46 {dimension_numbers = #tpu.dot_dimension_numbers<[1], [0], [0], [1], [0, 0, 1, 1], [], []>} : vector<64x128xbf16>, vector<128x128xbf16>, vector<64x128xf32> -> vector<64x128xf32>
    %71 = arith.truncf %70 : vector<64x128xf32> to vector<64x128xbf16>
    %c1_47 = arith.constant 1 : index
    %c0_48 = arith.constant 0 : index
    %c0_49 = arith.constant 0 : index
    %72 = vector.load %arg15[%c1_47, %c0_48, %c0_49] : memref<8x128x128xbf16, #tpu.memory_space<vmem>>, vector<1x128x128xbf16>
    %73 = vector.shape_cast %72 : vector<1x128x128xbf16> to vector<128x128xbf16>
    %cst_50 = arith.constant dense<0.000000e+00> : vector<64x128xf32>
    %74 = tpu.matmul %1, %73, %cst_50 {dimension_numbers = #tpu.dot_dimension_numbers<[1], [0], [0], [1], [0, 0, 1, 1], [], []>} : vector<64x128xbf16>, vector<128x128xbf16>, vector<64x128xf32> -> vector<64x128xf32>
    %75 = arith.truncf %74 : vector<64x128xf32> to vector<64x128xbf16>
    %c2_51 = arith.constant 2 : index
    %c0_52 = arith.constant 0 : index
    %c0_53 = arith.constant 0 : index
    %76 = vector.load %arg15[%c2_51, %c0_52, %c0_53] : memref<8x128x128xbf16, #tpu.memory_space<vmem>>, vector<1x128x128xbf16>
    %77 = vector.shape_cast %76 : vector<1x128x128xbf16> to vector<128x128xbf16>
    %cst_54 = arith.constant dense<0.000000e+00> : vector<64x128xf32>
    %78 = tpu.matmul %1, %77, %cst_54 {dimension_numbers = #tpu.dot_dimension_numbers<[1], [0], [0], [1], [0, 0, 1, 1], [], []>} : vector<64x128xbf16>, vector<128x128xbf16>, vector<64x128xf32> -> vector<64x128xf32>
    %79 = arith.truncf %78 : vector<64x128xf32> to vector<64x128xbf16>
    %c3_55 = arith.constant 3 : index
    %c0_56 = arith.constant 0 : index
    %c0_57 = arith.constant 0 : index
    %80 = vector.load %arg15[%c3_55, %c0_56, %c0_57] : memref<8x128x128xbf16, #tpu.memory_space<vmem>>, vector<1x128x128xbf16>
    %81 = vector.shape_cast %80 : vector<1x128x128xbf16> to vector<128x128xbf16>
    %cst_58 = arith.constant dense<0.000000e+00> : vector<64x128xf32>
    %82 = tpu.matmul %1, %81, %cst_58 {dimension_numbers = #tpu.dot_dimension_numbers<[1], [0], [0], [1], [0, 0, 1, 1], [], []>} : vector<64x128xbf16>, vector<128x128xbf16>, vector<64x128xf32> -> vector<64x128xf32>
    %83 = arith.truncf %82 : vector<64x128xf32> to vector<64x128xbf16>
    %c4_59 = arith.constant 4 : index
    %c0_60 = arith.constant 0 : index
    %c0_61 = arith.constant 0 : index
    %84 = vector.load %arg15[%c4_59, %c0_60, %c0_61] : memref<8x128x128xbf16, #tpu.memory_space<vmem>>, vector<1x128x128xbf16>
    %85 = vector.shape_cast %84 : vector<1x128x128xbf16> to vector<128x128xbf16>
    %cst_62 = arith.constant dense<0.000000e+00> : vector<64x128xf32>
    %86 = tpu.matmul %1, %85, %cst_62 {dimension_numbers = #tpu.dot_dimension_numbers<[1], [0], [0], [1], [0, 0, 1, 1], [], []>} : vector<64x128xbf16>, vector<128x128xbf16>, vector<64x128xf32> -> vector<64x128xf32>
    %87 = arith.truncf %86 : vector<64x128xf32> to vector<64x128xbf16>
    %c5_63 = arith.constant 5 : index
    %c0_64 = arith.constant 0 : index
    %c0_65 = arith.constant 0 : index
    %88 = vector.load %arg15[%c5_63, %c0_64, %c0_65] : memref<8x128x128xbf16, #tpu.memory_space<vmem>>, vector<1x128x128xbf16>
    %89 = vector.shape_cast %88 : vector<1x128x128xbf16> to vector<128x128xbf16>
    %cst_66 = arith.constant dense<0.000000e+00> : vector<64x128xf32>
    %90 = tpu.matmul %1, %89, %cst_66 {dimension_numbers = #tpu.dot_dimension_numbers<[1], [0], [0], [1], [0, 0, 1, 1], [], []>} : vector<64x128xbf16>, vector<128x128xbf16>, vector<64x128xf32> -> vector<64x128xf32>
    %91 = arith.truncf %90 : vector<64x128xf32> to vector<64x128xbf16>
    %c6_67 = arith.constant 6 : index
    %c0_68 = arith.constant 0 : index
    %c0_69 = arith.constant 0 : index
    %92 = vector.load %arg15[%c6_67, %c0_68, %c0_69] : memref<8x128x128xbf16, #tpu.memory_space<vmem>>, vector<1x128x128xbf16>
    %93 = vector.shape_cast %92 : vector<1x128x128xbf16> to vector<128x128xbf16>
    %cst_70 = arith.constant dense<0.000000e+00> : vector<64x128xf32>
    %94 = tpu.matmul %1, %93, %cst_70 {dimension_numbers = #tpu.dot_dimension_numbers<[1], [0], [0], [1], [0, 0, 1, 1], [], []>} : vector<64x128xbf16>, vector<128x128xbf16>, vector<64x128xf32> -> vector<64x128xf32>
    %95 = arith.truncf %94 : vector<64x128xf32> to vector<64x128xbf16>
    %c7 = arith.constant 7 : index
    %c0_71 = arith.constant 0 : index
    %c0_72 = arith.constant 0 : index
    %96 = vector.load %arg15[%c7, %c0_71, %c0_72] : memref<8x128x128xbf16, #tpu.memory_space<vmem>>, vector<1x128x128xbf16>
    %97 = vector.shape_cast %96 : vector<1x128x128xbf16> to vector<128x128xbf16>
    %cst_73 = arith.constant dense<0.000000e+00> : vector<64x128xf32>
    %98 = tpu.matmul %1, %97, %cst_73 {dimension_numbers = #tpu.dot_dimension_numbers<[1], [0], [0], [1], [0, 0, 1, 1], [], []>} : vector<64x128xbf16>, vector<128x128xbf16>, vector<64x128xf32> -> vector<64x128xf32>
    %99 = arith.truncf %98 : vector<64x128xf32> to vector<64x128xbf16>
    %100 = tpu.concatenate %71, %75, %79, %83, %87, %91, %95, %99 in 0 : vector<64x128xbf16>, vector<64x128xbf16>, vector<64x128xbf16>, vector<64x128xbf16>, vector<64x128xbf16>, vector<64x128xbf16>, vector<64x128xbf16>, vector<64x128xbf16> -> vector<512x128xbf16>
    %c0_74 = arith.constant 0 : index
    %c0_75 = arith.constant 0 : index
    %101 = vector.load %arg4[%c0_74, %c0_75] : memref<64x512xbf16, #tpu.memory_space<vmem>>, vector<64x512xbf16>
    %cst_76 = arith.constant dense<0.000000e+00> : vector<64x128xf32>
    %102 = tpu.matmul %101, %100, %cst_76 {dimension_numbers = #tpu.dot_dimension_numbers<[1], [0], [0], [1], [0, 0, 1, 1], [], []>} : vector<64x512xbf16>, vector<512x128xbf16>, vector<64x128xf32> -> vector<64x128xf32>
    %c0_77 = arith.constant 0 : index
    %c0_78 = arith.constant 0 : index
    %103 = vector.load %arg16[%c0_77, %c0_78] : memref<128x128xbf16, #tpu.memory_space<vmem>>, vector<128x128xbf16>
    %cst_79 = arith.constant dense<0.000000e+00> : vector<64x128xf32>
    %104 = tpu.matmul %1, %103, %cst_79 {dimension_numbers = #tpu.dot_dimension_numbers<[1], [0], [0], [1], [0, 0, 1, 1], [], []>} : vector<64x128xbf16>, vector<128x128xbf16>, vector<64x128xf32> -> vector<64x128xf32>
    %105 = arith.addf %102, %104 : vector<64x128xf32>
    %c0_80 = arith.constant 0 : index
    %c0_81 = arith.constant 0 : index
    %106 = vector.load %arg17[%c0_80, %c0_81] : memref<1x128xf32, #tpu.memory_space<vmem>>, vector<1x128xf32>
    %107 = vector.broadcast %106 : vector<1x128xf32> to vector<64x128xf32>
    %108 = arith.addf %105, %107 : vector<64x128xf32>
    %c0_82 = arith.constant 0 : index
    %c0_83 = arith.constant 0 : index
    %109 = vector.load %arg18[%c0_82, %c0_83] : memref<1x128xf32, #tpu.memory_space<vmem>>, vector<1x128xf32>
    %c0_84 = arith.constant 0 : index
    %c0_85 = arith.constant 0 : index
    %110 = vector.load %arg19[%c0_84, %c0_85] : memref<1x128xf32, #tpu.memory_space<vmem>>, vector<1x128xf32>
    %cst_86 = arith.constant dense<0.000000e+00> : vector<128xf32>
    %111 = vector.multi_reduction <add>, %108, %cst_86 [0] : vector<64x128xf32> to vector<128xf32>
    %112 = vector.shape_cast %111 : vector<128xf32> to vector<1x128xf32>
    %cst_87 = arith.constant 6.400000e+01 : f32
    %113 = vector.broadcast %cst_87 : f32 to vector<1x128xf32>
    %114 = arith.divf %112, %113 : vector<1x128xf32>
    %115 = vector.broadcast %114 : vector<1x128xf32> to vector<64x128xf32>
    %116 = arith.subf %108, %115 : vector<64x128xf32>
    %117 = arith.mulf %116, %116 : vector<64x128xf32>
    %cst_88 = arith.constant dense<0.000000e+00> : vector<128xf32>
    %118 = vector.multi_reduction <add>, %117, %cst_88 [0] : vector<64x128xf32> to vector<128xf32>
    %119 = vector.shape_cast %118 : vector<128xf32> to vector<1x128xf32>
    %cst_89 = arith.constant 6.400000e+01 : f32
    %120 = vector.broadcast %cst_89 : f32 to vector<1x128xf32>
    %121 = arith.divf %119, %120 : vector<1x128xf32>
    %122 = vector.broadcast %114 : vector<1x128xf32> to vector<64x128xf32>
    %123 = arith.subf %108, %122 : vector<64x128xf32>
    %cst_90 = arith.constant 9.99999974E-6 : f32
    %124 = vector.broadcast %cst_90 : f32 to vector<1x128xf32>
    %125 = arith.addf %121, %124 : vector<1x128xf32>
    %126 = math.rsqrt %125 : vector<1x128xf32>
    %127 = vector.broadcast %126 : vector<1x128xf32> to vector<64x128xf32>
    %128 = arith.mulf %123, %127 : vector<64x128xf32>
    %129 = vector.broadcast %109 : vector<1x128xf32> to vector<64x128xf32>
    %130 = arith.mulf %128, %129 : vector<64x128xf32>
    %131 = vector.broadcast %110 : vector<1x128xf32> to vector<64x128xf32>
    %132 = arith.addf %130, %131 : vector<64x128xf32>
    %cst_91 = arith.constant 0.000000e+00 : f32
    %133 = vector.broadcast %cst_91 : f32 to vector<64x128xf32>
    %134 = arith.maximumf %132, %133 : vector<64x128xf32>
    %135 = arith.truncf %134 : vector<64x128xf32> to vector<64x128xbf16>
    %c0_92 = arith.constant 0 : index
    %c0_93 = arith.constant 0 : index
    %c0_94 = arith.constant 0 : index
    %136 = vector.load %arg7[%c0_92, %c0_93, %c0_94] : memref<7x128x128xbf16, #tpu.memory_space<vmem>>, vector<1x128x128xbf16>
    %137 = vector.shape_cast %136 : vector<1x128x128xbf16> to vector<128x128xbf16>
    %cst_95 = arith.constant dense<0.000000e+00> : vector<64x128xf32>
    %138 = tpu.matmul %135, %137, %cst_95 {dimension_numbers = #tpu.dot_dimension_numbers<[1], [0], [0], [1], [0, 0, 1, 1], [], []>} : vector<64x128xbf16>, vector<128x128xbf16>, vector<64x128xf32> -> vector<64x128xf32>
    %139 = arith.truncf %138 : vector<64x128xf32> to vector<64x128xbf16>
    %c1_96 = arith.constant 1 : index
    %c0_97 = arith.constant 0 : index
    %c0_98 = arith.constant 0 : index
    %140 = vector.load %arg7[%c1_96, %c0_97, %c0_98] : memref<7x128x128xbf16, #tpu.memory_space<vmem>>, vector<1x128x128xbf16>
    %141 = vector.shape_cast %140 : vector<1x128x128xbf16> to vector<128x128xbf16>
    %cst_99 = arith.constant dense<0.000000e+00> : vector<64x128xf32>
    %142 = tpu.matmul %135, %141, %cst_99 {dimension_numbers = #tpu.dot_dimension_numbers<[1], [0], [0], [1], [0, 0, 1, 1], [], []>} : vector<64x128xbf16>, vector<128x128xbf16>, vector<64x128xf32> -> vector<64x128xf32>
    %143 = arith.truncf %142 : vector<64x128xf32> to vector<64x128xbf16>
    %c2_100 = arith.constant 2 : index
    %c0_101 = arith.constant 0 : index
    %c0_102 = arith.constant 0 : index
    %144 = vector.load %arg7[%c2_100, %c0_101, %c0_102] : memref<7x128x128xbf16, #tpu.memory_space<vmem>>, vector<1x128x128xbf16>
    %145 = vector.shape_cast %144 : vector<1x128x128xbf16> to vector<128x128xbf16>
    %cst_103 = arith.constant dense<0.000000e+00> : vector<64x128xf32>
    %146 = tpu.matmul %135, %145, %cst_103 {dimension_numbers = #tpu.dot_dimension_numbers<[1], [0], [0], [1], [0, 0, 1, 1], [], []>} : vector<64x128xbf16>, vector<128x128xbf16>, vector<64x128xf32> -> vector<64x128xf32>
    %147 = arith.truncf %146 : vector<64x128xf32> to vector<64x128xbf16>
    %c3_104 = arith.constant 3 : index
    %c0_105 = arith.constant 0 : index
    %c0_106 = arith.constant 0 : index
    %148 = vector.load %arg7[%c3_104, %c0_105, %c0_106] : memref<7x128x128xbf16, #tpu.memory_space<vmem>>, vector<1x128x128xbf16>
    %149 = vector.shape_cast %148 : vector<1x128x128xbf16> to vector<128x128xbf16>
    %cst_107 = arith.constant dense<0.000000e+00> : vector<64x128xf32>
    %150 = tpu.matmul %135, %149, %cst_107 {dimension_numbers = #tpu.dot_dimension_numbers<[1], [0], [0], [1], [0, 0, 1, 1], [], []>} : vector<64x128xbf16>, vector<128x128xbf16>, vector<64x128xf32> -> vector<64x128xf32>
    %151 = arith.truncf %150 : vector<64x128xf32> to vector<64x128xbf16>
    %c4_108 = arith.constant 4 : index
    %c0_109 = arith.constant 0 : index
    %c0_110 = arith.constant 0 : index
    %152 = vector.load %arg7[%c4_108, %c0_109, %c0_110] : memref<7x128x128xbf16, #tpu.memory_space<vmem>>, vector<1x128x128xbf16>
    %153 = vector.shape_cast %152 : vector<1x128x128xbf16> to vector<128x128xbf16>
    %cst_111 = arith.constant dense<0.000000e+00> : vector<64x128xf32>
    %154 = tpu.matmul %135, %153, %cst_111 {dimension_numbers = #tpu.dot_dimension_numbers<[1], [0], [0], [1], [0, 0, 1, 1], [], []>} : vector<64x128xbf16>, vector<128x128xbf16>, vector<64x128xf32> -> vector<64x128xf32>
    %155 = arith.truncf %154 : vector<64x128xf32> to vector<64x128xbf16>
    %c5_112 = arith.constant 5 : index
    %c0_113 = arith.constant 0 : index
    %c0_114 = arith.constant 0 : index
    %156 = vector.load %arg7[%c5_112, %c0_113, %c0_114] : memref<7x128x128xbf16, #tpu.memory_space<vmem>>, vector<1x128x128xbf16>
    %157 = vector.shape_cast %156 : vector<1x128x128xbf16> to vector<128x128xbf16>
    %cst_115 = arith.constant dense<0.000000e+00> : vector<64x128xf32>
    %158 = tpu.matmul %135, %157, %cst_115 {dimension_numbers = #tpu.dot_dimension_numbers<[1], [0], [0], [1], [0, 0, 1, 1], [], []>} : vector<64x128xbf16>, vector<128x128xbf16>, vector<64x128xf32> -> vector<64x128xf32>
    %159 = arith.truncf %158 : vector<64x128xf32> to vector<64x128xbf16>
    %c6_116 = arith.constant 6 : index
    %c0_117 = arith.constant 0 : index
    %c0_118 = arith.constant 0 : index
    %160 = vector.load %arg7[%c6_116, %c0_117, %c0_118] : memref<7x128x128xbf16, #tpu.memory_space<vmem>>, vector<1x128x128xbf16>
    %161 = vector.shape_cast %160 : vector<1x128x128xbf16> to vector<128x128xbf16>
    %cst_119 = arith.constant dense<0.000000e+00> : vector<64x128xf32>
    %162 = tpu.matmul %135, %161, %cst_119 {dimension_numbers = #tpu.dot_dimension_numbers<[1], [0], [0], [1], [0, 0, 1, 1], [], []>} : vector<64x128xbf16>, vector<128x128xbf16>, vector<64x128xf32> -> vector<64x128xf32>
    %163 = arith.truncf %162 : vector<64x128xf32> to vector<64x128xbf16>
    %cst_120 = arith.constant 0.000000e+00 : bf16
    %164 = vector.broadcast %cst_120 : bf16 to vector<64x128xbf16>
    %165 = tpu.concatenate %139, %143, %147, %151, %155, %159, %163, %164 in 0 : vector<64x128xbf16>, vector<64x128xbf16>, vector<64x128xbf16>, vector<64x128xbf16>, vector<64x128xbf16>, vector<64x128xbf16>, vector<64x128xbf16>, vector<64x128xbf16> -> vector<512x128xbf16>
    %c0_121 = arith.constant 0 : index
    %c0_122 = arith.constant 0 : index
    %166 = vector.load %arg5[%c0_121, %c0_122] : memref<32x512xbf16, #tpu.memory_space<vmem>>, vector<32x512xbf16>
    %cst_123 = arith.constant dense<0.000000e+00> : vector<32x128xf32>
    %167 = tpu.matmul %166, %165, %cst_123 {dimension_numbers = #tpu.dot_dimension_numbers<[1], [0], [0], [1], [0, 0, 1, 1], [], []>} : vector<32x512xbf16>, vector<512x128xbf16>, vector<32x128xf32> -> vector<32x128xf32>
    %c0_124 = arith.constant 0 : index
    %c0_125 = arith.constant 0 : index
    %168 = vector.load %arg10[%c0_124, %c0_125] : memref<1x128xf32, #tpu.memory_space<vmem>>, vector<1x128xf32>
    %169 = vector.broadcast %168 : vector<1x128xf32> to vector<32x128xf32>
    %170 = arith.addf %167, %169 : vector<32x128xf32>
    %cst_126 = arith.constant 0.000000e+00 : f32
    %171 = vector.broadcast %cst_126 : f32 to vector<32x128xf32>
    %172 = arith.maximumf %170, %171 : vector<32x128xf32>
    %173 = arith.addf %67, %172 : vector<32x128xf32>
    %c0_127 = arith.constant 0 : index
    %c0_128 = arith.constant 0 : index
    %174 = vector.load %arg13[%c0_127, %c0_128] : memref<1x128xf32, #tpu.memory_space<vmem>>, vector<1x128xf32>
    %c0_129 = arith.constant 0 : index
    %c0_130 = arith.constant 0 : index
    %175 = vector.load %arg14[%c0_129, %c0_130] : memref<1x128xf32, #tpu.memory_space<vmem>>, vector<1x128xf32>
    %cst_131 = arith.constant dense<0.000000e+00> : vector<128xf32>
    %176 = vector.multi_reduction <add>, %173, %cst_131 [0] : vector<32x128xf32> to vector<128xf32>
    %177 = vector.shape_cast %176 : vector<128xf32> to vector<1x128xf32>
    %cst_132 = arith.constant 3.200000e+01 : f32
    %178 = vector.broadcast %cst_132 : f32 to vector<1x128xf32>
    %179 = arith.divf %177, %178 : vector<1x128xf32>
    %180 = vector.broadcast %179 : vector<1x128xf32> to vector<32x128xf32>
    %181 = arith.subf %173, %180 : vector<32x128xf32>
    %182 = arith.mulf %181, %181 : vector<32x128xf32>
    %cst_133 = arith.constant dense<0.000000e+00> : vector<128xf32>
    %183 = vector.multi_reduction <add>, %182, %cst_133 [0] : vector<32x128xf32> to vector<128xf32>
    %184 = vector.shape_cast %183 : vector<128xf32> to vector<1x128xf32>
    %cst_134 = arith.constant 3.200000e+01 : f32
    %185 = vector.broadcast %cst_134 : f32 to vector<1x128xf32>
    %186 = arith.divf %184, %185 : vector<1x128xf32>
    %187 = vector.broadcast %179 : vector<1x128xf32> to vector<32x128xf32>
    %188 = arith.subf %173, %187 : vector<32x128xf32>
    %cst_135 = arith.constant 9.99999974E-6 : f32
    %189 = vector.broadcast %cst_135 : f32 to vector<1x128xf32>
    %190 = arith.addf %186, %189 : vector<1x128xf32>
    %191 = math.rsqrt %190 : vector<1x128xf32>
    %192 = vector.broadcast %191 : vector<1x128xf32> to vector<32x128xf32>
    %193 = arith.mulf %188, %192 : vector<32x128xf32>
    %194 = vector.broadcast %174 : vector<1x128xf32> to vector<32x128xf32>
    %195 = arith.mulf %193, %194 : vector<32x128xf32>
    %196 = vector.broadcast %175 : vector<1x128xf32> to vector<32x128xf32>
    %197 = arith.addf %195, %196 : vector<32x128xf32>
    %c0_136 = arith.constant 0 : index
    %c0_137 = arith.constant 0 : index
    %198 = vector.load %arg33[%c0_136, %c0_137] : memref<32x256xf32, #tpu.memory_space<vmem>>, vector<32x128xf32>
    tpu.vector_store %arg33[%c0_136, %c0_137], %197 {strides = array<i32>} : memref<32x256xf32, #tpu.memory_space<vmem>>, vector<32x128xf32>,
    %199 = arith.truncf %197 : vector<32x128xf32> to vector<32x128xbf16>
    %c0_138 = arith.constant 0 : index
    %c0_139 = arith.constant 0 : index
    %c0_140 = arith.constant 0 : index
    %200 = vector.load %arg20[%c0_138, %c0_139, %c0_140] : memref<7x128x128xbf16, #tpu.memory_space<vmem>>, vector<1x128x128xbf16>
    %201 = vector.shape_cast %200 : vector<1x128x128xbf16> to vector<128x128xbf16>
    %cst_141 = arith.constant dense<0.000000e+00> : vector<32x128xf32>
    %202 = tpu.matmul %199, %201, %cst_141 {dimension_numbers = #tpu.dot_dimension_numbers<[1], [0], [0], [1], [0, 0, 1, 1], [], []>} : vector<32x128xbf16>, vector<128x128xbf16>, vector<32x128xf32> -> vector<32x128xf32>
    %203 = arith.truncf %202 : vector<32x128xf32> to vector<32x128xbf16>
    %c1_142 = arith.constant 1 : index
    %c0_143 = arith.constant 0 : index
    %c0_144 = arith.constant 0 : index
    %204 = vector.load %arg20[%c1_142, %c0_143, %c0_144] : memref<7x128x128xbf16, #tpu.memory_space<vmem>>, vector<1x128x128xbf16>
    %205 = vector.shape_cast %204 : vector<1x128x128xbf16> to vector<128x128xbf16>
    %cst_145 = arith.constant dense<0.000000e+00> : vector<32x128xf32>
    %206 = tpu.matmul %199, %205, %cst_145 {dimension_numbers = #tpu.dot_dimension_numbers<[1], [0], [0], [1], [0, 0, 1, 1], [], []>} : vector<32x128xbf16>, vector<128x128xbf16>, vector<32x128xf32> -> vector<32x128xf32>
    %207 = arith.truncf %206 : vector<32x128xf32> to vector<32x128xbf16>
    %c2_146 = arith.constant 2 : index
    %c0_147 = arith.constant 0 : index
    %c0_148 = arith.constant 0 : index
    %208 = vector.load %arg20[%c2_146, %c0_147, %c0_148] : memref<7x128x128xbf16, #tpu.memory_space<vmem>>, vector<1x128x128xbf16>
    %209 = vector.shape_cast %208 : vector<1x128x128xbf16> to vector<128x128xbf16>
    %cst_149 = arith.constant dense<0.000000e+00> : vector<32x128xf32>
    %210 = tpu.matmul %199, %209, %cst_149 {dimension_numbers = #tpu.dot_dimension_numbers<[1], [0], [0], [1], [0, 0, 1, 1], [], []>} : vector<32x128xbf16>, vector<128x128xbf16>, vector<32x128xf32> -> vector<32x128xf32>
    %211 = arith.truncf %210 : vector<32x128xf32> to vector<32x128xbf16>
    %c3_150 = arith.constant 3 : index
    %c0_151 = arith.constant 0 : index
    %c0_152 = arith.constant 0 : index
    %212 = vector.load %arg20[%c3_150, %c0_151, %c0_152] : memref<7x128x128xbf16, #tpu.memory_space<vmem>>, vector<1x128x128xbf16>
    %213 = vector.shape_cast %212 : vector<1x128x128xbf16> to vector<128x128xbf16>
    %cst_153 = arith.constant dense<0.000000e+00> : vector<32x128xf32>
    %214 = tpu.matmul %199, %213, %cst_153 {dimension_numbers = #tpu.dot_dimension_numbers<[1], [0], [0], [1], [0, 0, 1, 1], [], []>} : vector<32x128xbf16>, vector<128x128xbf16>, vector<32x128xf32> -> vector<32x128xf32>
    %215 = arith.truncf %214 : vector<32x128xf32> to vector<32x128xbf16>
    %c4_154 = arith.constant 4 : index
    %c0_155 = arith.constant 0 : index
    %c0_156 = arith.constant 0 : index
    %216 = vector.load %arg20[%c4_154, %c0_155, %c0_156] : memref<7x128x128xbf16, #tpu.memory_space<vmem>>, vector<1x128x128xbf16>
    %217 = vector.shape_cast %216 : vector<1x128x128xbf16> to vector<128x128xbf16>
    %cst_157 = arith.constant dense<0.000000e+00> : vector<32x128xf32>
    %218 = tpu.matmul %199, %217, %cst_157 {dimension_numbers = #tpu.dot_dimension_numbers<[1], [0], [0], [1], [0, 0, 1, 1], [], []>} : vector<32x128xbf16>, vector<128x128xbf16>, vector<32x128xf32> -> vector<32x128xf32>
    %219 = arith.truncf %218 : vector<32x128xf32> to vector<32x128xbf16>
    %c5_158 = arith.constant 5 : index
    %c0_159 = arith.constant 0 : index
    %c0_160 = arith.constant 0 : index
    %220 = vector.load %arg20[%c5_158, %c0_159, %c0_160] : memref<7x128x128xbf16, #tpu.memory_space<vmem>>, vector<1x128x128xbf16>
    %221 = vector.shape_cast %220 : vector<1x128x128xbf16> to vector<128x128xbf16>
    %cst_161 = arith.constant dense<0.000000e+00> : vector<32x128xf32>
    %222 = tpu.matmul %199, %221, %cst_161 {dimension_numbers = #tpu.dot_dimension_numbers<[1], [0], [0], [1], [0, 0, 1, 1], [], []>} : vector<32x128xbf16>, vector<128x128xbf16>, vector<32x128xf32> -> vector<32x128xf32>
    %223 = arith.truncf %222 : vector<32x128xf32> to vector<32x128xbf16>
    %c6_162 = arith.constant 6 : index
    %c0_163 = arith.constant 0 : index
    %c0_164 = arith.constant 0 : index
    %224 = vector.load %arg20[%c6_162, %c0_163, %c0_164] : memref<7x128x128xbf16, #tpu.memory_space<vmem>>, vector<1x128x128xbf16>
    %225 = vector.shape_cast %224 : vector<1x128x128xbf16> to vector<128x128xbf16>
    %cst_165 = arith.constant dense<0.000000e+00> : vector<32x128xf32>
    %226 = tpu.matmul %199, %225, %cst_165 {dimension_numbers = #tpu.dot_dimension_numbers<[1], [0], [0], [1], [0, 0, 1, 1], [], []>} : vector<32x128xbf16>, vector<128x128xbf16>, vector<32x128xf32> -> vector<32x128xf32>
    %227 = arith.truncf %226 : vector<32x128xf32> to vector<32x128xbf16>
    %cst_166 = arith.constant 0.000000e+00 : bf16
    %228 = vector.broadcast %cst_166 : bf16 to vector<32x128xbf16>
    %229 = tpu.concatenate %203, %207, %211, %215, %219, %223, %227, %228 in 0 : vector<32x128xbf16>, vector<32x128xbf16>, vector<32x128xbf16>, vector<32x128xbf16>, vector<32x128xbf16>, vector<32x128xbf16>, vector<32x128xbf16>, vector<32x128xbf16> -> vector<256x128xbf16>
    %c0_167 = arith.constant 0 : index
    %c0_168 = arith.constant 0 : index
    %230 = vector.load %arg3[%c0_167, %c0_168] : memref<32x256xbf16, #tpu.memory_space<vmem>>, vector<32x256xbf16>
    %cst_169 = arith.constant dense<0.000000e+00> : vector<32x128xf32>
    %231 = tpu.matmul %230, %229, %cst_169 {dimension_numbers = #tpu.dot_dimension_numbers<[1], [0], [0], [1], [0, 0, 1, 1], [], []>} : vector<32x256xbf16>, vector<256x128xbf16>, vector<32x128xf32> -> vector<32x128xf32>
    %c0_170 = arith.constant 0 : index
    %c0_171 = arith.constant 0 : index
    %232 = vector.load %arg21[%c0_170, %c0_171] : memref<128x128xbf16, #tpu.memory_space<vmem>>, vector<128x128xbf16>
    %cst_172 = arith.constant dense<0.000000e+00> : vector<32x128xf32>
    %233 = tpu.matmul %199, %232, %cst_172 {dimension_numbers = #tpu.dot_dimension_numbers<[1], [0], [0], [1], [0, 0, 1, 1], [], []>} : vector<32x128xbf16>, vector<128x128xbf16>, vector<32x128xf32> -> vector<32x128xf32>
    %234 = arith.addf %231, %233 : vector<32x128xf32>
    %c0_173 = arith.constant 0 : index
    %c0_174 = arith.constant 0 : index
    %235 = vector.load %arg22[%c0_173, %c0_174] : memref<1x128xf32, #tpu.memory_space<vmem>>, vector<1x128xf32>
    %236 = vector.broadcast %235 : vector<1x128xf32> to vector<32x128xf32>
    %237 = arith.addf %234, %236 : vector<32x128xf32>
    %c0_175 = arith.constant 0 : index
    %c0_176 = arith.constant 0 : index
    %238 = vector.load %arg24[%c0_175, %c0_176] : memref<1x128xf32, #tpu.memory_space<vmem>>, vector<1x128xf32>
    %c0_177 = arith.constant 0 : index
    %c0_178 = arith.constant 0 : index
    %239 = vector.load %arg25[%c0_177, %c0_178] : memref<1x128xf32, #tpu.memory_space<vmem>>, vector<1x128xf32>
    %cst_179 = arith.constant dense<0.000000e+00> : vector<128xf32>
    %240 = vector.multi_reduction <add>, %237, %cst_179 [0] : vector<32x128xf32> to vector<128xf32>
    %241 = vector.shape_cast %240 : vector<128xf32> to vector<1x128xf32>
    %cst_180 = arith.constant 3.200000e+01 : f32
    %242 = vector.broadcast %cst_180 : f32 to vector<1x128xf32>
    %243 = arith.divf %241, %242 : vector<1x128xf32>
    %244 = vector.broadcast %243 : vector<1x128xf32> to vector<32x128xf32>
    %245 = arith.subf %237, %244 : vector<32x128xf32>
    %246 = arith.mulf %245, %245 : vector<32x128xf32>
    %cst_181 = arith.constant dense<0.000000e+00> : vector<128xf32>
    %247 = vector.multi_reduction <add>, %246, %cst_181 [0] : vector<32x128xf32> to vector<128xf32>
    %248 = vector.shape_cast %247 : vector<128xf32> to vector<1x128xf32>
    %cst_182 = arith.constant 3.200000e+01 : f32
    %249 = vector.broadcast %cst_182 : f32 to vector<1x128xf32>
    %250 = arith.divf %248, %249 : vector<1x128xf32>
    %251 = vector.broadcast %243 : vector<1x128xf32> to vector<32x128xf32>
    %252 = arith.subf %237, %251 : vector<32x128xf32>
    %cst_183 = arith.constant 9.99999974E-6 : f32
    %253 = vector.broadcast %cst_183 : f32 to vector<1x128xf32>
    %254 = arith.addf %250, %253 : vector<1x128xf32>
    %255 = math.rsqrt %254 : vector<1x128xf32>
    %256 = vector.broadcast %255 : vector<1x128xf32> to vector<32x128xf32>
    %257 = arith.mulf %252, %256 : vector<32x128xf32>
    %258 = vector.broadcast %238 : vector<1x128xf32> to vector<32x128xf32>
    %259 = arith.mulf %257, %258 : vector<32x128xf32>
    %260 = vector.broadcast %239 : vector<1x128xf32> to vector<32x128xf32>
    %261 = arith.addf %259, %260 : vector<32x128xf32>
    %cst_184 = arith.constant 0.000000e+00 : f32
    %262 = vector.broadcast %cst_184 : f32 to vector<32x128xf32>
    %263 = arith.maximumf %261, %262 : vector<32x128xf32>
    %c0_185 = arith.constant 0 : index
    %c0_186 = arith.constant 0 : index
    %c0_187 = arith.constant 0 : index
    %264 = vector.load %arg28[%c0_185, %c0_186, %c0_187] : memref<8x128x128xbf16, #tpu.memory_space<vmem>>, vector<1x128x128xbf16>
    %265 = vector.shape_cast %264 : vector<1x128x128xbf16> to vector<128x128xbf16>
    %cst_188 = arith.constant dense<0.000000e+00> : vector<64x128xf32>
    %266 = tpu.matmul %135, %265, %cst_188 {dimension_numbers = #tpu.dot_dimension_numbers<[1], [0], [0], [1], [0, 0, 1, 1], [], []>} : vector<64x128xbf16>, vector<128x128xbf16>, vector<64x128xf32> -> vector<64x128xf32>
    %267 = arith.truncf %266 : vector<64x128xf32> to vector<64x128xbf16>
    %c1_189 = arith.constant 1 : index
    %c0_190 = arith.constant 0 : index
    %c0_191 = arith.constant 0 : index
    %268 = vector.load %arg28[%c1_189, %c0_190, %c0_191] : memref<8x128x128xbf16, #tpu.memory_space<vmem>>, vector<1x128x128xbf16>
    %269 = vector.shape_cast %268 : vector<1x128x128xbf16> to vector<128x128xbf16>
    %cst_192 = arith.constant dense<0.000000e+00> : vector<64x128xf32>
    %270 = tpu.matmul %135, %269, %cst_192 {dimension_numbers = #tpu.dot_dimension_numbers<[1], [0], [0], [1], [0, 0, 1, 1], [], []>} : vector<64x128xbf16>, vector<128x128xbf16>, vector<64x128xf32> -> vector<64x128xf32>
    %271 = arith.truncf %270 : vector<64x128xf32> to vector<64x128xbf16>
    %c2_193 = arith.constant 2 : index
    %c0_194 = arith.constant 0 : index
    %c0_195 = arith.constant 0 : index
    %272 = vector.load %arg28[%c2_193, %c0_194, %c0_195] : memref<8x128x128xbf16, #tpu.memory_space<vmem>>, vector<1x128x128xbf16>
    %273 = vector.shape_cast %272 : vector<1x128x128xbf16> to vector<128x128xbf16>
    %cst_196 = arith.constant dense<0.000000e+00> : vector<64x128xf32>
    %274 = tpu.matmul %135, %273, %cst_196 {dimension_numbers = #tpu.dot_dimension_numbers<[1], [0], [0], [1], [0, 0, 1, 1], [], []>} : vector<64x128xbf16>, vector<128x128xbf16>, vector<64x128xf32> -> vector<64x128xf32>
    %275 = arith.truncf %274 : vector<64x128xf32> to vector<64x128xbf16>
    %c3_197 = arith.constant 3 : index
    %c0_198 = arith.constant 0 : index
    %c0_199 = arith.constant 0 : index
    %276 = vector.load %arg28[%c3_197, %c0_198, %c0_199] : memref<8x128x128xbf16, #tpu.memory_space<vmem>>, vector<1x128x128xbf16>
    %277 = vector.shape_cast %276 : vector<1x128x128xbf16> to vector<128x128xbf16>
    %cst_200 = arith.constant dense<0.000000e+00> : vector<64x128xf32>
    %278 = tpu.matmul %135, %277, %cst_200 {dimension_numbers = #tpu.dot_dimension_numbers<[1], [0], [0], [1], [0, 0, 1, 1], [], []>} : vector<64x128xbf16>, vector<128x128xbf16>, vector<64x128xf32> -> vector<64x128xf32>
    %279 = arith.truncf %278 : vector<64x128xf32> to vector<64x128xbf16>
    %c4_201 = arith.constant 4 : index
    %c0_202 = arith.constant 0 : index
    %c0_203 = arith.constant 0 : index
    %280 = vector.load %arg28[%c4_201, %c0_202, %c0_203] : memref<8x128x128xbf16, #tpu.memory_space<vmem>>, vector<1x128x128xbf16>
    %281 = vector.shape_cast %280 : vector<1x128x128xbf16> to vector<128x128xbf16>
    %cst_204 = arith.constant dense<0.000000e+00> : vector<64x128xf32>
    %282 = tpu.matmul %135, %281, %cst_204 {dimension_numbers = #tpu.dot_dimension_numbers<[1], [0], [0], [1], [0, 0, 1, 1], [], []>} : vector<64x128xbf16>, vector<128x128xbf16>, vector<64x128xf32> -> vector<64x128xf32>
    %283 = arith.truncf %282 : vector<64x128xf32> to vector<64x128xbf16>
    %c5_205 = arith.constant 5 : index
    %c0_206 = arith.constant 0 : index
    %c0_207 = arith.constant 0 : index
    %284 = vector.load %arg28[%c5_205, %c0_206, %c0_207] : memref<8x128x128xbf16, #tpu.memory_space<vmem>>, vector<1x128x128xbf16>
    %285 = vector.shape_cast %284 : vector<1x128x128xbf16> to vector<128x128xbf16>
    %cst_208 = arith.constant dense<0.000000e+00> : vector<64x128xf32>
    %286 = tpu.matmul %135, %285, %cst_208 {dimension_numbers = #tpu.dot_dimension_numbers<[1], [0], [0], [1], [0, 0, 1, 1], [], []>} : vector<64x128xbf16>, vector<128x128xbf16>, vector<64x128xf32> -> vector<64x128xf32>
    %287 = arith.truncf %286 : vector<64x128xf32> to vector<64x128xbf16>
    %c6_209 = arith.constant 6 : index
    %c0_210 = arith.constant 0 : index
    %c0_211 = arith.constant 0 : index
    %288 = vector.load %arg28[%c6_209, %c0_210, %c0_211] : memref<8x128x128xbf16, #tpu.memory_space<vmem>>, vector<1x128x128xbf16>
    %289 = vector.shape_cast %288 : vector<1x128x128xbf16> to vector<128x128xbf16>
    %cst_212 = arith.constant dense<0.000000e+00> : vector<64x128xf32>
    %290 = tpu.matmul %135, %289, %cst_212 {dimension_numbers = #tpu.dot_dimension_numbers<[1], [0], [0], [1], [0, 0, 1, 1], [], []>} : vector<64x128xbf16>, vector<128x128xbf16>, vector<64x128xf32> -> vector<64x128xf32>
    %291 = arith.truncf %290 : vector<64x128xf32> to vector<64x128xbf16>
    %c7_213 = arith.constant 7 : index
    %c0_214 = arith.constant 0 : index
    %c0_215 = arith.constant 0 : index
    %292 = vector.load %arg28[%c7_213, %c0_214, %c0_215] : memref<8x128x128xbf16, #tpu.memory_space<vmem>>, vector<1x128x128xbf16>
    %293 = vector.shape_cast %292 : vector<1x128x128xbf16> to vector<128x128xbf16>
    %cst_216 = arith.constant dense<0.000000e+00> : vector<64x128xf32>
    %294 = tpu.matmul %135, %293, %cst_216 {dimension_numbers = #tpu.dot_dimension_numbers<[1], [0], [0], [1], [0, 0, 1, 1], [], []>} : vector<64x128xbf16>, vector<128x128xbf16>, vector<64x128xf32> -> vector<64x128xf32>
    %295 = arith.truncf %294 : vector<64x128xf32> to vector<64x128xbf16>
    %296 = tpu.concatenate %267, %271, %275, %279, %283, %287, %291, %295 in 0 : vector<64x128xbf16>, vector<64x128xbf16>, vector<64x128xbf16>, vector<64x128xbf16>, vector<64x128xbf16>, vector<64x128xbf16>, vector<64x128xbf16>, vector<64x128xbf16> -> vector<512x128xbf16>
    %c0_217 = arith.constant 0 : index
    %c0_218 = arith.constant 0 : index
    %297 = vector.load %arg4[%c0_217, %c0_218] : memref<64x512xbf16, #tpu.memory_space<vmem>>, vector<64x512xbf16>
    %cst_219 = arith.constant dense<0.000000e+00> : vector<64x128xf32>
    %298 = tpu.matmul %297, %296, %cst_219 {dimension_numbers = #tpu.dot_dimension_numbers<[1], [0], [0], [1], [0, 0, 1, 1], [], []>} : vector<64x512xbf16>, vector<512x128xbf16>, vector<64x128xf32> -> vector<64x128xf32>
    %c0_220 = arith.constant 0 : index
    %c0_221 = arith.constant 0 : index
    %299 = vector.load %arg29[%c0_220, %c0_221] : memref<128x128xbf16, #tpu.memory_space<vmem>>, vector<128x128xbf16>
    %cst_222 = arith.constant dense<0.000000e+00> : vector<64x128xf32>
    %300 = tpu.matmul %135, %299, %cst_222 {dimension_numbers = #tpu.dot_dimension_numbers<[1], [0], [0], [1], [0, 0, 1, 1], [], []>} : vector<64x128xbf16>, vector<128x128xbf16>, vector<64x128xf32> -> vector<64x128xf32>
    %301 = arith.addf %298, %300 : vector<64x128xf32>
    %c0_223 = arith.constant 0 : index
    %c0_224 = arith.constant 0 : index
    %302 = vector.load %arg30[%c0_223, %c0_224] : memref<1x128xf32, #tpu.memory_space<vmem>>, vector<1x128xf32>
    %303 = vector.broadcast %302 : vector<1x128xf32> to vector<64x128xf32>
    %304 = arith.addf %301, %303 : vector<64x128xf32>
    %c0_225 = arith.constant 0 : index
    %c0_226 = arith.constant 0 : index
    %305 = vector.load %arg31[%c0_225, %c0_226] : memref<1x128xf32, #tpu.memory_space<vmem>>, vector<1x128xf32>
    %c0_227 = arith.constant 0 : index
    %c0_228 = arith.constant 0 : index
    %306 = vector.load %arg32[%c0_227, %c0_228] : memref<1x128xf32, #tpu.memory_space<vmem>>, vector<1x128xf32>
    %cst_229 = arith.constant dense<0.000000e+00> : vector<128xf32>
    %307 = vector.multi_reduction <add>, %304, %cst_229 [0] : vector<64x128xf32> to vector<128xf32>
    %308 = vector.shape_cast %307 : vector<128xf32> to vector<1x128xf32>
    %cst_230 = arith.constant 6.400000e+01 : f32
    %309 = vector.broadcast %cst_230 : f32 to vector<1x128xf32>
    %310 = arith.divf %308, %309 : vector<1x128xf32>
    %311 = vector.broadcast %310 : vector<1x128xf32> to vector<64x128xf32>
    %312 = arith.subf %304, %311 : vector<64x128xf32>
    %313 = arith.mulf %312, %312 : vector<64x128xf32>
    %cst_231 = arith.constant dense<0.000000e+00> : vector<128xf32>
    %314 = vector.multi_reduction <add>, %313, %cst_231 [0] : vector<64x128xf32> to vector<128xf32>
    %315 = vector.shape_cast %314 : vector<128xf32> to vector<1x128xf32>
    %cst_232 = arith.constant 6.400000e+01 : f32
    %316 = vector.broadcast %cst_232 : f32 to vector<1x128xf32>
    %317 = arith.divf %315, %316 : vector<1x128xf32>
    %318 = vector.broadcast %310 : vector<1x128xf32> to vector<64x128xf32>
    %319 = arith.subf %304, %318 : vector<64x128xf32>
    %cst_233 = arith.constant 9.99999974E-6 : f32
    %320 = vector.broadcast %cst_233 : f32 to vector<1x128xf32>
    %321 = arith.addf %317, %320 : vector<1x128xf32>
    %322 = math.rsqrt %321 : vector<1x128xf32>
    %323 = vector.broadcast %322 : vector<1x128xf32> to vector<64x128xf32>
    %324 = arith.mulf %319, %323 : vector<64x128xf32>
    %325 = vector.broadcast %305 : vector<1x128xf32> to vector<64x128xf32>
    %326 = arith.mulf %324, %325 : vector<64x128xf32>
    %327 = vector.broadcast %306 : vector<1x128xf32> to vector<64x128xf32>
    %328 = arith.addf %326, %327 : vector<64x128xf32>
    %cst_234 = arith.constant 0.000000e+00 : f32
    %329 = vector.broadcast %cst_234 : f32 to vector<64x128xf32>
    %330 = arith.maximumf %328, %329 : vector<64x128xf32>
    %331 = arith.truncf %330 : vector<64x128xf32> to vector<64x128xbf16>
    %c0_235 = arith.constant 0 : index
    %c0_236 = arith.constant 0 : index
    %c0_237 = arith.constant 0 : index
    %332 = vector.load %arg20[%c0_235, %c0_236, %c0_237] : memref<7x128x128xbf16, #tpu.memory_space<vmem>>, vector<1x128x128xbf16>
    %333 = vector.shape_cast %332 : vector<1x128x128xbf16> to vector<128x128xbf16>
    %cst_238 = arith.constant dense<0.000000e+00> : vector<64x128xf32>
    %334 = tpu.matmul %331, %333, %cst_238 {dimension_numbers = #tpu.dot_dimension_numbers<[1], [0], [0], [1], [0, 0, 1, 1], [], []>} : vector<64x128xbf16>, vector<128x128xbf16>, vector<64x128xf32> -> vector<64x128xf32>
    %335 = arith.truncf %334 : vector<64x128xf32> to vector<64x128xbf16>
    %c1_239 = arith.constant 1 : index
    %c0_240 = arith.constant 0 : index
    %c0_241 = arith.constant 0 : index
    %336 = vector.load %arg20[%c1_239, %c0_240, %c0_241] : memref<7x128x128xbf16, #tpu.memory_space<vmem>>, vector<1x128x128xbf16>
    %337 = vector.shape_cast %336 : vector<1x128x128xbf16> to vector<128x128xbf16>
    %cst_242 = arith.constant dense<0.000000e+00> : vector<64x128xf32>
    %338 = tpu.matmul %331, %337, %cst_242 {dimension_numbers = #tpu.dot_dimension_numbers<[1], [0], [0], [1], [0, 0, 1, 1], [], []>} : vector<64x128xbf16>, vector<128x128xbf16>, vector<64x128xf32> -> vector<64x128xf32>
    %339 = arith.truncf %338 : vector<64x128xf32> to vector<64x128xbf16>
    %c2_243 = arith.constant 2 : index
    %c0_244 = arith.constant 0 : index
    %c0_245 = arith.constant 0 : index
    %340 = vector.load %arg20[%c2_243, %c0_244, %c0_245] : memref<7x128x128xbf16, #tpu.memory_space<vmem>>, vector<1x128x128xbf16>
    %341 = vector.shape_cast %340 : vector<1x128x128xbf16> to vector<128x128xbf16>
    %cst_246 = arith.constant dense<0.000000e+00> : vector<64x128xf32>
    %342 = tpu.matmul %331, %341, %cst_246 {dimension_numbers = #tpu.dot_dimension_numbers<[1], [0], [0], [1], [0, 0, 1, 1], [], []>} : vector<64x128xbf16>, vector<128x128xbf16>, vector<64x128xf32> -> vector<64x128xf32>
    %343 = arith.truncf %342 : vector<64x128xf32> to vector<64x128xbf16>
    %c3_247 = arith.constant 3 : index
    %c0_248 = arith.constant 0 : index
    %c0_249 = arith.constant 0 : index
    %344 = vector.load %arg20[%c3_247, %c0_248, %c0_249] : memref<7x128x128xbf16, #tpu.memory_space<vmem>>, vector<1x128x128xbf16>
    %345 = vector.shape_cast %344 : vector<1x128x128xbf16> to vector<128x128xbf16>
    %cst_250 = arith.constant dense<0.000000e+00> : vector<64x128xf32>
    %346 = tpu.matmul %331, %345, %cst_250 {dimension_numbers = #tpu.dot_dimension_numbers<[1], [0], [0], [1], [0, 0, 1, 1], [], []>} : vector<64x128xbf16>, vector<128x128xbf16>, vector<64x128xf32> -> vector<64x128xf32>
    %347 = arith.truncf %346 : vector<64x128xf32> to vector<64x128xbf16>
    %c4_251 = arith.constant 4 : index
    %c0_252 = arith.constant 0 : index
    %c0_253 = arith.constant 0 : index
    %348 = vector.load %arg20[%c4_251, %c0_252, %c0_253] : memref<7x128x128xbf16, #tpu.memory_space<vmem>>, vector<1x128x128xbf16>
    %349 = vector.shape_cast %348 : vector<1x128x128xbf16> to vector<128x128xbf16>
    %cst_254 = arith.constant dense<0.000000e+00> : vector<64x128xf32>
    %350 = tpu.matmul %331, %349, %cst_254 {dimension_numbers = #tpu.dot_dimension_numbers<[1], [0], [0], [1], [0, 0, 1, 1], [], []>} : vector<64x128xbf16>, vector<128x128xbf16>, vector<64x128xf32> -> vector<64x128xf32>
    %351 = arith.truncf %350 : vector<64x128xf32> to vector<64x128xbf16>
    %c5_255 = arith.constant 5 : index
    %c0_256 = arith.constant 0 : index
    %c0_257 = arith.constant 0 : index
    %352 = vector.load %arg20[%c5_255, %c0_256, %c0_257] : memref<7x128x128xbf16, #tpu.memory_space<vmem>>, vector<1x128x128xbf16>
    %353 = vector.shape_cast %352 : vector<1x128x128xbf16> to vector<128x128xbf16>
    %cst_258 = arith.constant dense<0.000000e+00> : vector<64x128xf32>
    %354 = tpu.matmul %331, %353, %cst_258 {dimension_numbers = #tpu.dot_dimension_numbers<[1], [0], [0], [1], [0, 0, 1, 1], [], []>} : vector<64x128xbf16>, vector<128x128xbf16>, vector<64x128xf32> -> vector<64x128xf32>
    %355 = arith.truncf %354 : vector<64x128xf32> to vector<64x128xbf16>
    %c6_259 = arith.constant 6 : index
    %c0_260 = arith.constant 0 : index
    %c0_261 = arith.constant 0 : index
    %356 = vector.load %arg20[%c6_259, %c0_260, %c0_261] : memref<7x128x128xbf16, #tpu.memory_space<vmem>>, vector<1x128x128xbf16>
    %357 = vector.shape_cast %356 : vector<1x128x128xbf16> to vector<128x128xbf16>
    %cst_262 = arith.constant dense<0.000000e+00> : vector<64x128xf32>
    %358 = tpu.matmul %331, %357, %cst_262 {dimension_numbers = #tpu.dot_dimension_numbers<[1], [0], [0], [1], [0, 0, 1, 1], [], []>} : vector<64x128xbf16>, vector<128x128xbf16>, vector<64x128xf32> -> vector<64x128xf32>
    %359 = arith.truncf %358 : vector<64x128xf32> to vector<64x128xbf16>
    %cst_263 = arith.constant 0.000000e+00 : bf16
    %360 = vector.broadcast %cst_263 : bf16 to vector<64x128xbf16>
    %361 = tpu.concatenate %335, %339, %343, %347, %351, %355, %359, %360 in 0 : vector<64x128xbf16>, vector<64x128xbf16>, vector<64x128xbf16>, vector<64x128xbf16>, vector<64x128xbf16>, vector<64x128xbf16>, vector<64x128xbf16>, vector<64x128xbf16> -> vector<512x128xbf16>
    %c0_264 = arith.constant 0 : index
    %c0_265 = arith.constant 0 : index
    %362 = vector.load %arg5[%c0_264, %c0_265] : memref<32x512xbf16, #tpu.memory_space<vmem>>, vector<32x512xbf16>
    %cst_266 = arith.constant dense<0.000000e+00> : vector<32x128xf32>
    %363 = tpu.matmul %362, %361, %cst_266 {dimension_numbers = #tpu.dot_dimension_numbers<[1], [0], [0], [1], [0, 0, 1, 1], [], []>} : vector<32x512xbf16>, vector<512x128xbf16>, vector<32x128xf32> -> vector<32x128xf32>
    %c0_267 = arith.constant 0 : index
    %c0_268 = arith.constant 0 : index
    %364 = vector.load %arg23[%c0_267, %c0_268] : memref<1x128xf32, #tpu.memory_space<vmem>>, vector<1x128xf32>
    %365 = vector.broadcast %364 : vector<1x128xf32> to vector<32x128xf32>
    %366 = arith.addf %363, %365 : vector<32x128xf32>
    %cst_269 = arith.constant 0.000000e+00 : f32
    %367 = vector.broadcast %cst_269 : f32 to vector<32x128xf32>
    %368 = arith.maximumf %366, %367 : vector<32x128xf32>
    %369 = arith.addf %263, %368 : vector<32x128xf32>
    %c0_270 = arith.constant 0 : index
    %c0_271 = arith.constant 0 : index
    %370 = vector.load %arg26[%c0_270, %c0_271] : memref<1x128xf32, #tpu.memory_space<vmem>>, vector<1x128xf32>
    %c0_272 = arith.constant 0 : index
    %c0_273 = arith.constant 0 : index
    %371 = vector.load %arg27[%c0_272, %c0_273] : memref<1x128xf32, #tpu.memory_space<vmem>>, vector<1x128xf32>
    %cst_274 = arith.constant dense<0.000000e+00> : vector<128xf32>
    %372 = vector.multi_reduction <add>, %369, %cst_274 [0] : vector<32x128xf32> to vector<128xf32>
    %373 = vector.shape_cast %372 : vector<128xf32> to vector<1x128xf32>
    %cst_275 = arith.constant 3.200000e+01 : f32
    %374 = vector.broadcast %cst_275 : f32 to vector<1x128xf32>
    %375 = arith.divf %373, %374 : vector<1x128xf32>
    %376 = vector.broadcast %375 : vector<1x128xf32> to vector<32x128xf32>
    %377 = arith.subf %369, %376 : vector<32x128xf32>
    %378 = arith.mulf %377, %377 : vector<32x128xf32>
    %cst_276 = arith.constant dense<0.000000e+00> : vector<128xf32>
    %379 = vector.multi_reduction <add>, %378, %cst_276 [0] : vector<32x128xf32> to vector<128xf32>
    %380 = vector.shape_cast %379 : vector<128xf32> to vector<1x128xf32>
    %cst_277 = arith.constant 3.200000e+01 : f32
    %381 = vector.broadcast %cst_277 : f32 to vector<1x128xf32>
    %382 = arith.divf %380, %381 : vector<1x128xf32>
    %383 = vector.broadcast %375 : vector<1x128xf32> to vector<32x128xf32>
    %384 = arith.subf %369, %383 : vector<32x128xf32>
    %cst_278 = arith.constant 9.99999974E-6 : f32
    %385 = vector.broadcast %cst_278 : f32 to vector<1x128xf32>
    %386 = arith.addf %382, %385 : vector<1x128xf32>
    %387 = math.rsqrt %386 : vector<1x128xf32>
    %388 = vector.broadcast %387 : vector<1x128xf32> to vector<32x128xf32>
    %389 = arith.mulf %384, %388 : vector<32x128xf32>
    %390 = vector.broadcast %370 : vector<1x128xf32> to vector<32x128xf32>
    %391 = arith.mulf %389, %390 : vector<32x128xf32>
    %392 = vector.broadcast %371 : vector<1x128xf32> to vector<32x128xf32>
    %393 = arith.addf %391, %392 : vector<32x128xf32>
    %c0_279 = arith.constant 0 : index
    %c128 = arith.constant 128 : index
    %394 = vector.load %arg33[%c0_279, %c128] : memref<32x256xf32, #tpu.memory_space<vmem>>, vector<32x128xf32>
    tpu.vector_store %arg33[%c0_279, %c128], %393 {strides = array<i32>} : memref<32x256xf32, #tpu.memory_space<vmem>>, vector<32x128xf32>,
    %c0_280 = arith.constant 0 : index
    %c0_281 = arith.constant 0 : index
    %395 = vector.load %arg6[%c0_280, %c0_281] : memref<8x32xf32, #tpu.memory_space<vmem>>, vector<8x32xf32>
    %c0_282 = arith.constant 0 : index
    %c0_283 = arith.constant 0 : index
    %396 = vector.load %arg33[%c0_282, %c0_283] : memref<32x256xf32, #tpu.memory_space<vmem>>, vector<32x256xf32>
    %cst_284 = arith.constant dense<0.000000e+00> : vector<8x256xf32>
    %397 = tpu.matmul %395, %396, %cst_284 {dimension_numbers = #tpu.dot_dimension_numbers<[1], [0], [0], [1], [0, 0, 1, 1], [], []>} : vector<8x32xf32>, vector<32x256xf32>, vector<8x256xf32> -> vector<8x256xf32>
    %c0_285 = arith.constant 0 : index
    %c0_286 = arith.constant 0 : index
    %398 = vector.load %arg34[%c0_285, %c0_286] : memref<8x256xf32, #tpu.memory_space<vmem>>, vector<8x256xf32>
    tpu.vector_store %arg34[%c0_285, %c0_286], %397 {strides = array<i32>} : memref<8x256xf32, #tpu.memory_space<vmem>>, vector<8x256xf32>,
    return
  }
  func.func @transform_0(%arg0: i32) -> (i32, i32) {
    %c0_i32 = arith.constant 0 : i32
    %c0_i32_0 = arith.constant 0 : i32
    %c0_i32_1 = arith.constant 0 : i32
    return %c0_i32, %c0_i32_0 : i32, i32
  }
  func.func @transform_1(%arg0: i32) -> (i32, i32) {
    %c0_i32 = arith.constant 0 : i32
    %c0_i32_0 = arith.constant 0 : i32
    %c0_i32_1 = arith.constant 0 : i32
    return %c0_i32, %c0_i32_0 : i32, i32
  }
  func.func @transform_2(%arg0: i32) -> (i32, i32) {
    %c0_i32 = arith.constant 0 : i32
    %c0_i32_0 = arith.constant 0 : i32
    %c0_i32_1 = arith.constant 0 : i32
    return %c0_i32, %c0_i32_0 : i32, i32
  }
  func.func @transform_3(%arg0: i32) -> (i32, i32) {
    %c0_i32 = arith.constant 0 : i32
    %c0_i32_0 = arith.constant 0 : i32
    %c0_i32_1 = arith.constant 0 : i32
    return %c0_i32, %c0_i32_0 : i32, i32
  }
  func.func @transform_4(%arg0: i32) -> (i32, i32) {
    %c0_i32 = arith.constant 0 : i32
    %c0_i32_0 = arith.constant 0 : i32
    %c0_i32_1 = arith.constant 0 : i32
    return %c0_i32, %c0_i32_0 : i32, i32
  }
  func.func @transform_5(%arg0: i32) -> (i32, i32) {
    %c0_i32 = arith.constant 0 : i32
    %c0_i32_0 = arith.constant 0 : i32
    %c0_i32_1 = arith.constant 0 : i32
    return %c0_i32, %c0_i32_0 : i32, i32
  }
  func.func @transform_6(%arg0: i32) -> (i32, i32, i32) {
    %c0_i32 = arith.constant 0 : i32
    %c0_i32_0 = arith.constant 0 : i32
    %c0_i32_1 = arith.constant 0 : i32
    %c0_i32_2 = arith.constant 0 : i32
    return %c0_i32, %c0_i32_0, %c0_i32_1 : i32, i32, i32
  }
  func.func @transform_7(%arg0: i32) -> (i32, i32) {
    %c0_i32 = arith.constant 0 : i32
    %c0_i32_0 = arith.constant 0 : i32
    %c0_i32_1 = arith.constant 0 : i32
    return %c0_i32, %c0_i32_0 : i32, i32
  }
  func.func @transform_8(%arg0: i32) -> (i32, i32) {
    %c0_i32 = arith.constant 0 : i32
    %c0_i32_0 = arith.constant 0 : i32
    %c0_i32_1 = arith.constant 0 : i32
    return %c0_i32, %c0_i32_0 : i32, i32
  }
  func.func @transform_9(%arg0: i32) -> (i32, i32) {
    %c0_i32 = arith.constant 0 : i32
    %c0_i32_0 = arith.constant 0 : i32
    %c0_i32_1 = arith.constant 0 : i32
    return %c0_i32, %c0_i32_0 : i32, i32
  }
  func.func @transform_10(%arg0: i32) -> (i32, i32) {
    %c0_i32 = arith.constant 0 : i32
    %c0_i32_0 = arith.constant 0 : i32
    %c0_i32_1 = arith.constant 0 : i32
    return %c0_i32, %c0_i32_0 : i32, i32
  }
  func.func @transform_11(%arg0: i32) -> (i32, i32) {
    %c0_i32 = arith.constant 0 : i32
    %c0_i32_0 = arith.constant 0 : i32
    %c0_i32_1 = arith.constant 0 : i32
    return %c0_i32, %c0_i32_0 : i32, i32
  }
  func.func @transform_12(%arg0: i32) -> (i32, i32) {
    %c0_i32 = arith.constant 0 : i32
    %c0_i32_0 = arith.constant 0 : i32
    %c0_i32_1 = arith.constant 0 : i32
    return %c0_i32, %c0_i32_0 : i32, i32
  }
  func.func @transform_13(%arg0: i32) -> (i32, i32) {
    %c0_i32 = arith.constant 0 : i32
    %c0_i32_0 = arith.constant 0 : i32
    %c0_i32_1 = arith.constant 0 : i32
    return %c0_i32, %c0_i32_0 : i32, i32
  }
  func.func @transform_14(%arg0: i32) -> (i32, i32, i32) {
    %c0_i32 = arith.constant 0 : i32
    %c0_i32_0 = arith.constant 0 : i32
    %c0_i32_1 = arith.constant 0 : i32
    %c0_i32_2 = arith.constant 0 : i32
    return %c0_i32, %c0_i32_0, %c0_i32_1 : i32, i32, i32
  }
  func.func @transform_15(%arg0: i32) -> (i32, i32) {
    %c0_i32 = arith.constant 0 : i32
    %c0_i32_0 = arith.constant 0 : i32
    %c0_i32_1 = arith.constant 0 : i32
    return %c0_i32, %c0_i32_0 : i32, i32
  }
  func.func @transform_16(%arg0: i32) -> (i32, i32) {
    %c0_i32 = arith.constant 0 : i32
    %c0_i32_0 = arith.constant 0 : i32
    %c0_i32_1 = arith.constant 0 : i32
    return %c0_i32, %c0_i32_0 : i32, i32
  }
  func.func @transform_17(%arg0: i32) -> (i32, i32) {
    %c0_i32 = arith.constant 0 : i32
    %c0_i32_0 = arith.constant 0 : i32
    %c0_i32_1 = arith.constant 0 : i32
    return %c0_i32, %c0_i32_0 : i32, i32
  }
  func.func @transform_18(%arg0: i32) -> (i32, i32) {
    %c0_i32 = arith.constant 0 : i32
    %c0_i32_0 = arith.constant 0 : i32
    %c0_i32_1 = arith.constant 0 : i32
    return %c0_i32, %c0_i32_0 : i32, i32
  }
  func.func @transform_19(%arg0: i32) -> (i32, i32, i32) {
    %c0_i32 = arith.constant 0 : i32
    %c0_i32_0 = arith.constant 0 : i32
    %c0_i32_1 = arith.constant 0 : i32
    %c0_i32_2 = arith.constant 0 : i32
    return %c0_i32, %c0_i32_0, %c0_i32_1 : i32, i32, i32
  }
  func.func @transform_20(%arg0: i32) -> (i32, i32) {
    %c0_i32 = arith.constant 0 : i32
    %c0_i32_0 = arith.constant 0 : i32
    %c0_i32_1 = arith.constant 0 : i32
    return %c0_i32, %c0_i32_0 : i32, i32
  }
  func.func @transform_21(%arg0: i32) -> (i32, i32) {
    %c0_i32 = arith.constant 0 : i32
    %c0_i32_0 = arith.constant 0 : i32
    %c0_i32_1 = arith.constant 0 : i32
    return %c0_i32, %c0_i32_0 : i32, i32
  }
  func.func @transform_22(%arg0: i32) -> (i32, i32) {
    %c0_i32 = arith.constant 0 : i32
    %c0_i32_0 = arith.constant 0 : i32
    %c0_i32_1 = arith.constant 0 : i32
    return %c0_i32, %c0_i32_0 : i32, i32
  }
  func.func @transform_23(%arg0: i32) -> (i32, i32) {
    %c0_i32 = arith.constant 0 : i32
    %c0_i32_0 = arith.constant 0 : i32
    %c0_i32_1 = arith.constant 0 : i32
    return %c0_i32, %c0_i32_0 : i32, i32
  }
  func.func @transform_24(%arg0: i32) -> (i32, i32) {
    %c0_i32 = arith.constant 0 : i32
    %c0_i32_0 = arith.constant 0 : i32
    %c0_i32_1 = arith.constant 0 : i32
    return %c0_i32, %c0_i32_0 : i32, i32
  }
  func.func @transform_25(%arg0: i32) -> (i32, i32) {
    %c0_i32 = arith.constant 0 : i32
    %c0_i32_0 = arith.constant 0 : i32
    %c0_i32_1 = arith.constant 0 : i32
    return %c0_i32, %c0_i32_0 : i32, i32
  }
  func.func @transform_26(%arg0: i32) -> (i32, i32) {
    %c0_i32 = arith.constant 0 : i32
    %c0_i32_0 = arith.constant 0 : i32
    %c0_i32_1 = arith.constant 0 : i32
    return %c0_i32, %c0_i32_0 : i32, i32
  }
  func.func @transform_27(%arg0: i32) -> (i32, i32, i32) {
    %c0_i32 = arith.constant 0 : i32
    %c0_i32_0 = arith.constant 0 : i32
    %c0_i32_1 = arith.constant 0 : i32
    %c0_i32_2 = arith.constant 0 : i32
    return %c0_i32, %c0_i32_0, %c0_i32_1 : i32, i32, i32
  }
  func.func @transform_28(%arg0: i32) -> (i32, i32) {
    %c0_i32 = arith.constant 0 : i32
    %c0_i32_0 = arith.constant 0 : i32
    %c0_i32_1 = arith.constant 0 : i32
    return %c0_i32, %c0_i32_0 : i32, i32
  }
  func.func @transform_29(%arg0: i32) -> (i32, i32) {
    %c0_i32 = arith.constant 0 : i32
    %c0_i32_0 = arith.constant 0 : i32
    %c0_i32_1 = arith.constant 0 : i32
    return %c0_i32, %c0_i32_0 : i32, i32
  }
  func.func @transform_30(%arg0: i32) -> (i32, i32) {
    %c0_i32 = arith.constant 0 : i32
    %c0_i32_0 = arith.constant 0 : i32
    %c0_i32_1 = arith.constant 0 : i32
    return %c0_i32, %c0_i32_0 : i32, i32
  }
  func.func @transform_31(%arg0: i32) -> (i32, i32) {
    %c0_i32 = arith.constant 0 : i32
    %c0_i32_0 = arith.constant 0 : i32
    %c0_i32_1 = arith.constant 0 : i32
    return %c0_i32, %c0_i32_0 : i32, i32
  }
  func.func @transform_32(%arg0: i32) -> (i32, i32) {
    %c0_i32 = arith.constant 0 : i32
    %c0_i32_0 = arith.constant 0 : i32
    %c0_i32_1 = arith.constant 0 : i32
    return %c0_i32, %c0_i32_0 : i32, i32
  }
  func.func @transform_33(%arg0: i32) -> (i32, i32) {
    %c0_i32 = arith.constant 0 : i32
    %c0_i32_0 = arith.constant 0 : i32
    %c0_i32_1 = arith.constant 0 : i32
    return %c0_i32, %c0_i32_0 : i32, i32
  }
}

</mosaic_0001>

<bundles_post_ra>
// kernel: gearnet_forward.1
= control target key start
LH: loop header
LB: loop body
LE: loop exit
PB: predicated region body
PF: predicated region fallthrough
CT: control target
= control target key end

     0   :  { %s10075_s3 = smov 6   ;;  %v11307_v62 = vmov 0   ;;  %s10077_s10 = smov 7   ;;  %vm6811_vm0 = vcmask 261120   ;;  %s11306_s0 = inlined_call_operand.smem [shape: u32[34], index: -1, kind: input, shape index: {}] }
   0x1   :  { %s10118_s6 = sld [smem:[%s11306_s0 + %s10075_s3]]   ;;  %s10078_s14 = smov 14  }
   0x2   :  { %s10124_s9 = sld [smem:[%s11306_s0]]   ;;  %s10079_s18 = smov 1  }
   0x3   :  { %s6902_s13 = sld [smem:[%s11306_s0 + %s10077_s10]]   ;;  %s10080_s22 = smov 2  }
   0x4   :  { %s10211_s17 = sld [smem:[%s11306_s0 + %s10078_s14]]   ;;  %s10081_s26 = smov 15  }
   0x5   :  { %s10225_s21 = sld [smem:[%s11306_s0 + %s10079_s18]]   ;;  %s10082_s30 = smov 3  }
   0x6   :  { %s10242_s25 = sld [smem:[%s11306_s0 + %s10080_s22]]   ;;  %s10083_s4 = smov 8  }
   0x7   :  { %v9587_v0 = vld [vmem:[%s10118_s6] sm:$0xff]   ;;  %v9588_v1 = vld [vmem:[%s10118_s6 + $0x8] sm:$0xff]   ;;  %v9589_v2 = vld [vmem:[%s10118_s6 + $0x10] sm:$0xff]   ;;  %s10434_s29 = sld [smem:[%s11306_s0 + %s10081_s26]]   ;;  %s10084_s10 = smov 16  }
   0x8   :  { %8456 = vmatprep.subr.bf16.mxu1 %v9587_v0  ;;  %v9590_v3 = vld [vmem:[%s10118_s6 + $0x18] sm:$0xff]   ;;  %v138_v4 = vld [vmem:[%s10124_s9] sm:$0xff]  ;;  %v139_v5 = vld [vmem:[%s10124_s9 + $0x8] sm:$0xff]  ;;  %s10445_s3 = sld [smem:[%s11306_s0 + %s10082_s30]]   ;;  %s10085_s14 = smov 17  }
   0x9   :  { %8457 = vmatpush3.bf16.msra.mxu1 %v9587_v0  ;;  %v10131_v6 = vpack.c.bf16 %v139_v5, %v138_v4  ;;  %v9591_v7 = vld [vmem:[%s10118_s6 + $0x20] sm:$0xff]   ;;  %v9599_v9 = vld [vmem:[%s10118_s6 + $0x88] sm:$0xff]   ;;  %v9601_v11 = vld [vmem:[%s10118_s6 + $0x90] sm:$0xff]   ;;  %s6903_s8 = sld [smem:[%s11306_s0 + %s10083_s4]]   ;;  %s10086_s18 = smov 18  }
   0xa   :  { %8458 = vmatprep.subr.bf16.mxu1 %v9588_v1  ;;  %v9597_v8 = vld [vmem:[%s10118_s6 + $0x80] sm:$0xff]   ;;  %v9592_v10 = vld [vmem:[%s10118_s6 + $0x28] sm:$0xff]   ;;  %v9593_v12 = vld [vmem:[%s10118_s6 + $0x30] sm:$0xff]   ;;  %s10087_s22 = smov 4   ;;  %s10089_s30 = smov 10  }
   0xb   :  { %8472 = vmatprep.mubr.bf16.mxu1 %v10131_v6  ;;  %8512 = vmatprep.mubr.bf16.mxu0 %v10131_v6  ;;  %v9603_v13 = vld [vmem:[%s10118_s6 + $0x98] sm:$0xff]   ;;  %v9605_v15 = vld [vmem:[%s10118_s6 + $0xa0] sm:$0xff]   ;;  %v140_v16 = vld [vmem:[%s10124_s9 + $0x10] sm:$0xff]  ;;  %s10718_s26 = sld [smem:[%s11306_s0 + %s10087_s22]]   ;;  %s10090_s5 = smov 11  }
   0xc   :  { %8496 = vmatprep.subr.bf16.mxu0 %v9597_v8  ;;  %v9594_v14 = vld [vmem:[%s10118_s6 + $0x38] sm:$0xff]   ;;  %v9595_v18 = vld [vmem:[%s10118_s6 + $0x40] sm:$0xff]   ;;  %v9607_v19 = vld [vmem:[%s10118_s6 + $0xa8] sm:$0xff]   ;;  %s6905_s4 = sld [smem:[%s11306_s0 + %s10089_s30]]   ;;  %s10091_s11 = smov 9  }
   0xd   :  { %8459 = vmatpush3.bf16.msra.mxu1 %v9588_v1  ;;  %8497 = vmatpush3.bf16.msra.mxu0 %v9597_v8  ;;  %v141_v17 = vld [vmem:[%s10124_s9 + $0x18] sm:$0xff]  ;;  %v9596_v21 = vld [vmem:[%s10118_s6 + $0x48] sm:$0xff]   ;;  %v9609_v22 = vld [vmem:[%s10118_s6 + $0xb0] sm:$0xff]   ;;  %s10092_s15 = smov 20   ;;  %s10094_s22 = smov 12  }
   0xe   :  { %8460 = vmatprep.subr.bf16.mxu1 %v9589_v2  ;;  %8498 = vmatprep.subr.bf16.mxu0 %v9599_v9  ;;  %v10148_v20 = vpack.c.bf16 %v141_v17, %v140_v16  ;;  %v9598_v23 = vld [vmem:[%s10118_s6 + $0x50] sm:$0xff]   ;;  %v9611_v24 = vld [vmem:[%s10118_s6 + $0xb8] sm:$0xff]   ;;  %v9613_v26 = vld [vmem:[%s10118_s6 + $0x100] sm:$0xff]   ;;  %s10095_s27 = smov 13   ;;  %s10096_s2 = smov 32  }
   0xf   :  { %v9600_v25 = vld [vmem:[%s10118_s6 + $0x58] sm:$0xff]   ;;  %v9602_v27 = vld [vmem:[%s10118_s6 + $0x60] sm:$0xff]   ;;  %v9615_v28 = vld [vmem:[%s10118_s6 + $0x108] sm:$0xff]   ;;  %s6908_s1 = sld [smem:[%s11306_s0 + %s10095_s27]]   ;;  %s10104_s30 = smov 22  }
  0x10   :  { %v9604_v29 = vld [vmem:[%s10118_s6 + $0x68] sm:$0xff]   ;;  %v9617_v30 = vld [vmem:[%s10118_s6 + $0x110] sm:$0xff]   ;;  %v9619_v32 = vld [vmem:[%s10118_s6 + $0x118] sm:$0xff]   ;;  %s10804_s7 = sld [smem:[%s11306_s0 + %s10096_s2]]  }
  0x11   :  { %8461 = vmatpush3.bf16.msra.mxu1 %v9589_v2  ;;  %8499 = vmatpush3.bf16.msra.mxu0 %v9599_v9  ;;  %v9606_v31 = vld [vmem:[%s10118_s6 + $0x70] sm:$0xff]   ;;  %v9608_v33 = vld [vmem:[%s10118_s6 + $0x78] sm:$0xff]   ;;  %v9621_v34 = vld [vmem:[%s10118_s6 + $0x120] sm:$0xff]  }
  0x12   :  { %8462 = vmatprep.subr.bf16.mxu1 %v9590_v3  ;;  %8500 = vmatprep.subr.bf16.mxu0 %v9601_v11  ;;  %v9610_v35 = vld [vmem:[%s10118_s6 + $0xc0] sm:$0xff]   ;;  %v9623_v36 = vld [vmem:[%s10118_s6 + $0x128] sm:$0xff]   ;;  %v9625_v38 = vld [vmem:[%s10118_s6 + $0x130] sm:$0xff]  }
  0x13   :  { %v9612_v37 = vld [vmem:[%s10118_s6 + $0xc8] sm:$0xff]   ;;  %v9614_v39 = vld [vmem:[%s10118_s6 + $0xd0] sm:$0xff]   ;;  %v9627_v40 = vld [vmem:[%s10118_s6 + $0x138] sm:$0xff]  }
  0x14   :  { %v9616_v41 = vld [vmem:[%s10118_s6 + $0xd8] sm:$0xff]   ;;  %v9629_v42 = vld [vmem:[%s10118_s6 + $0x180] sm:$0xff]   ;;  %v9631_v44 = vld [vmem:[%s10118_s6 + $0x188] sm:$0xff]  }
  0x15   :  { %8463 = vmatpush3.bf16.msra.mxu1 %v9590_v3  ;;  %8501 = vmatpush3.bf16.msra.mxu0 %v9601_v11  ;;  %v9618_v43 = vld [vmem:[%s10118_s6 + $0xe0] sm:$0xff]   ;;  %v9620_v45 = vld [vmem:[%s10118_s6 + $0xe8] sm:$0xff]   ;;  %v9633_v46 = vld [vmem:[%s10118_s6 + $0x190] sm:$0xff]  }
  0x16   :  { %8464 = vmatprep.subr.bf16.mxu1 %v9591_v7  ;;  %8502 = vmatprep.subr.bf16.mxu0 %v9603_v13  ;;  %v9622_v47 = vld [vmem:[%s10118_s6 + $0xf0] sm:$0xff]   ;;  %v9635_v48 = vld [vmem:[%s10118_s6 + $0x198] sm:$0xff]   ;;  %v9637_v50 = vld [vmem:[%s10118_s6 + $0x1a0] sm:$0xff]  }
  0x17   :  { %v9624_v49 = vld [vmem:[%s10118_s6 + $0xf8] sm:$0xff]   ;;  %v9626_v51 = vld [vmem:[%s10118_s6 + $0x140] sm:$0xff]   ;;  %v9639_v52 = vld [vmem:[%s10118_s6 + $0x1a8] sm:$0xff]  }
  0x18   :  { %v9628_v53 = vld [vmem:[%s10118_s6 + $0x148] sm:$0xff]   ;;  %v9641_v54 = vld [vmem:[%s10118_s6 + $0x1b0] sm:$0xff]   ;;  %v9642_v56 = vld [vmem:[%s10118_s6 + $0x1b8] sm:$0xff]  }
  0x19   :  { %8465 = vmatpush3.bf16.msra.mxu1 %v9591_v7  ;;  %8503 = vmatpush3.bf16.msra.mxu0 %v9603_v13  ;;  %v9630_v55 = vld [vmem:[%s10118_s6 + $0x150] sm:$0xff]   ;;  %v9632_v57 = vld [vmem:[%s10118_s6 + $0x158] sm:$0xff]   ;;  %v9634_v58 = vld [vmem:[%s10118_s6 + $0x160] sm:$0xff]  }
  0x1a   :  { %8466 = vmatprep.subr.bf16.mxu1 %v9592_v10  ;;  %8504 = vmatprep.subr.bf16.mxu0 %v9605_v15  ;;  %v9636_v59 = vld [vmem:[%s10118_s6 + $0x168] sm:$0xff]   ;;  %v9638_v60 = vld [vmem:[%s10118_s6 + $0x170] sm:$0xff]   ;;  %v9640_v61 = vld [vmem:[%s10118_s6 + $0x178] sm:$0xff]  }
  0x1b   :  { %v9643_v63 = vld [vmem:[%s6902_s13] sm:$0xff]   ;;  %v9644_v0 = vld [vmem:[%s6902_s13 + $0x8] sm:$0xff]   ;;  %v9645_v1 = vld [vmem:[%s6902_s13 + $0x10] sm:$0xff]  }
  0x1c   :  { %v9646_v2 = vld [vmem:[%s6902_s13 + $0x18] sm:$0xff]   ;;  %v9647_v3 = vld [vmem:[%s6902_s13 + $0x20] sm:$0xff]   ;;  %v9648_v4 = vld [vmem:[%s6902_s13 + $0x28] sm:$0xff]  }
  0x1d   :  { %8467 = vmatpush3.bf16.msra.mxu1 %v9592_v10  ;;  %8505 = vmatpush3.bf16.msra.mxu0 %v9605_v15  ;;  %v9649_v5 = vld [vmem:[%s6902_s13 + $0x30] sm:$0xff]   ;;  %v9651_v7 = vld [vmem:[%s10211_s17] sm:$0xff]   ;;  %v9652_v8 = vld [vmem:[%s10211_s17 + $0x8] sm:$0xff]  }
  0x1e   :  { %8468 = vmatprep.subr.bf16.mxu1 %v9593_v12  ;;  %8506 = vmatprep.subr.bf16.mxu0 %v9607_v19  ;;  %v9653_v9 = vld [vmem:[%s10211_s17 + $0x10] sm:$0xff]   ;;  %v9654_v10 = vld [vmem:[%s10211_s17 + $0x18] sm:$0xff]   ;;  %v9655_v11 = vld [vmem:[%s10211_s17 + $0x20] sm:$0xff]  }
  0x1f   :  { %v9657_v13 = vld [vmem:[%s10211_s17 + $0x30] sm:$0xff]   ;;  %v10228_v15 = vld [vmem:[%s10225_s21] sm:$0xff]   ;;  %v10233_v17 = vld [vmem:[%s10225_s21 + $0x8] sm:$0xff]  }
  0x20   :  { %v9660_v16 = vld [vmem:[%s10211_s17 + $0x40] sm:$0xff]  }
  0x21   :  { %8469 = vmatpush3.bf16.msra.mxu1 %v9593_v12  ;;  %8507 = vmatpush3.bf16.msra.mxu0 %v9607_v19  ;;  %v9656_v12 = vld [vmem:[%s10211_s17 + $0x28] sm:$0xff]   ;;  %v9663_v19 = vld [vmem:[%s10211_s17 + $0x50] sm:$0xff]  }
  0x22   :  { %8470 = vmatprep.subr.bf16.mxu1 %v9594_v14  ;;  %8508 = vmatprep.subr.bf16.mxu0 %v9609_v22 }
  0x25   :  { %8471 = vmatpush3.bf16.msra.mxu1 %v9594_v14  ;;  %8509 = vmatpush3.bf16.msra.mxu0 %v9609_v22  ;;  %v9658_v14 = vld [vmem:[%s10211_s17 + $0x38] sm:$0xff]   ;;  %v9668_v22 = vld [vmem:[%s10242_s25 + $0x4] ss:$8 sps:$4 sm:$0xff]  }
  0x26   :  { %8476 = vmatprep.subr.bf16.mxu1 %v9595_v18  ;;  %8510 = vmatprep.subr.bf16.mxu0 %v9611_v24 }
  0x28   :  { %8473 = vmatmul.mubr.bf16.vlgmr.msra.gmra.mrb[0].mxu1 %v10148_v20 }
  0x29   :  { %8477 = vmatpush3.bf16.msra.mxu1 %v9595_v18  ;;  %8492 = vmatprep.mubr.bf16.mxu1 %v10131_v6  ;;  %v9662_v18 = vld [vmem:[%s10211_s17 + $0x48] sm:$0xff]  }
  0x2a   :  { %8478 = vmatprep.subr.bf16.mxu1 %v9596_v21  ;;  %8511 = vmatpush3.bf16.msra.mxu0 %v9611_v24  ;;  %v10248_v24 = vld [vmem:[%s10225_s21 + $0x10] sm:$0xff]  }
  0x2b   :  { %8536 = vmatprep.subr.bf16.mxu0 %v9613_v26 }
  0x2d   :  { %8479 = vmatpush3.bf16.msra.mxu1 %v9596_v21  ;;  %8513 = vmatmul.mubr.bf16.vlgmr.msra.gmra.mrb[0].mxu0 %v10148_v20  ;;  %v9665_v21 = vld [vmem:[%s10211_s17 + $0x60] sm:$0xff]  }
  0x2e   :  { %8480 = vmatprep.subr.bf16.mxu1 %v9598_v23  ;;  %8537 = vmatpush3.bf16.msra.mxu0 %v9613_v26  ;;  %v10253_v26 = vld [vmem:[%s10225_s21 + $0x18] sm:$0xff]   ;;  %s6913_s21 = sld [smem:[%s11306_s0 + %s10086_s18]]  }
  0x2f   :  { %8538 = vmatprep.subr.bf16.mxu0 %v9615_v28  ;;  %8552 = vmatprep.mubr.bf16.mxu0 %v10131_v6  ;;  %s10786_s18 = sld [smem:[%s11306_s0 + %s10092_s15]]  }
  0x31   :  { %8481 = vmatpush3.bf16.msra.mxu1 %v9598_v23  ;;  %v9670_v23 = vld [vmem:[%s10211_s17 + $0x68] sm:$0xff]  }
  0x32   :  { %8482 = vmatprep.subr.bf16.mxu1 %v9600_v25  ;;  %8539 = vmatpush3.bf16.msra.mxu0 %v9615_v28 }
  0x33   :  { %8540 = vmatprep.subr.bf16.mxu0 %v9617_v30 }
  0x35   :  { %8483 = vmatpush3.bf16.msra.mxu1 %v9600_v25  ;;  %v9673_v25 = vld [vmem:[%s10211_s17 + $0x70] sm:$0xff]  }
  0x36   :  { %8484 = vmatprep.subr.bf16.mxu1 %v9602_v27  ;;  %8541 = vmatpush3.bf16.msra.mxu0 %v9617_v30 }
  0x37   :  { %8542 = vmatprep.subr.bf16.mxu0 %v9619_v32 }
  0x39   :  { %8485 = vmatpush3.bf16.msra.mxu1 %v9602_v27  ;;  %v9679_v27 = vld [vmem:[%s10211_s17 + $0x78] sm:$0xff]  }
  0x3a   :  { %8486 = vmatprep.subr.bf16.mxu1 %v9604_v29  ;;  %8543 = vmatpush3.bf16.msra.mxu0 %v9619_v32 }
  0x3b   :  { %8544 = vmatprep.subr.bf16.mxu0 %v9621_v34 }
  0x3d   :  { %8487 = vmatpush3.bf16.msra.mxu1 %v9604_v29  ;;  %v9681_v29 = vld [vmem:[%s10211_s17 + $0xc0] sm:$0xff]  }
  0x3e   :  { %8488 = vmatprep.subr.bf16.mxu1 %v9606_v31  ;;  %8545 = vmatpush3.bf16.msra.mxu0 %v9621_v34 }
  0x3f   :  { %8546 = vmatprep.subr.bf16.mxu0 %v9623_v36 }
  0x41   :  { %8489 = vmatpush3.bf16.msra.mxu1 %v9606_v31 }
  0x42   :  { %8490 = vmatprep.subr.bf16.mxu1 %v9608_v33  ;;  %8547 = vmatpush3.bf16.msra.mxu0 %v9623_v36  ;;  %v9685_v36 = vld [vmem:[%s10211_s17 + $0xd0] sm:$0xff]  }
  0x43   :  { %8548 = vmatprep.subr.bf16.mxu0 %v9625_v38 }
  0x45   :  { %8491 = vmatpush3.bf16.msra.mxu1 %v9608_v33 }
  0x46   :  { %8516 = vmatprep.subr.bf16.mxu1 %v9610_v35  ;;  %8549 = vmatpush3.bf16.msra.mxu0 %v9625_v38  ;;  %v9687_v38 = vld [vmem:[%s10211_s17 + $0xd8] sm:$0xff]  }
  0x47   :  { %8550 = vmatprep.subr.bf16.mxu0 %v9627_v40 }
  0x48   :  { %8493 = vmatmul.mubr.bf16.vlgmr.msra.gmra.mrb[4].mxu1 %v10148_v20 }
  0x49   :  { %8517 = vmatpush3.bf16.msra.mxu1 %v9610_v35  ;;  %8532 = vmatprep.mubr.bf16.mxu1 %v10131_v6  ;;  %v9683_v35 = vld [vmem:[%s10211_s17 + $0xc8] sm:$0xff]  }
  0x4a   :  { %8518 = vmatprep.subr.bf16.mxu1 %v9612_v37  ;;  %8551 = vmatpush3.bf16.msra.mxu0 %v9627_v40 }
  0x4b   :  { %8576 = vmatprep.subr.bf16.mxu0 %v9629_v42 }
  0x4d   :  { %8519 = vmatpush3.bf16.msra.mxu1 %v9612_v37  ;;  %8553 = vmatmul.mubr.bf16.vlgmr.msra.gmra.mrb[4].mxu0 %v10148_v20 }
  0x4e   :  { %8520 = vmatprep.subr.bf16.mxu1 %v9614_v39  ;;  %8577 = vmatpush3.bf16.msra.mxu0 %v9629_v42 }
  0x4f   :  { %8578 = vmatprep.subr.bf16.mxu0 %v9631_v44  ;;  %8592 = vmatprep.mubr.bf16.mxu0 %v10131_v6 }
  0x51   :  { %8521 = vmatpush3.bf16.msra.mxu1 %v9614_v39 }
  0x52   :  { %8522 = vmatprep.subr.bf16.mxu1 %v9616_v41  ;;  %8579 = vmatpush3.bf16.msra.mxu0 %v9631_v44  ;;  %v9689_v44 = vld [vmem:[%s10211_s17 + $0xe0] sm:$0xff]  }
  0x53   :  { %8580 = vmatprep.subr.bf16.mxu0 %v9633_v46 }
  0x55   :  { %8523 = vmatpush3.bf16.msra.mxu1 %v9616_v41 }
  0x56   :  { %8524 = vmatprep.subr.bf16.mxu1 %v9618_v43  ;;  %8581 = vmatpush3.bf16.msra.mxu0 %v9633_v46  ;;  %v9693_v46 = vld [vmem:[%s10211_s17 + $0xf0] sm:$0xff]  }
  0x57   :  { %8582 = vmatprep.subr.bf16.mxu0 %v9635_v48 }
  0x59   :  { %8525 = vmatpush3.bf16.msra.mxu1 %v9618_v43 }
  0x5a   :  { %8526 = vmatprep.subr.bf16.mxu1 %v9620_v45  ;;  %8583 = vmatpush3.bf16.msra.mxu0 %v9635_v48 }
  0x5b   :  { %8584 = vmatprep.subr.bf16.mxu0 %v9637_v50 }
  0x5d   :  { %8527 = vmatpush3.bf16.msra.mxu1 %v9620_v45  ;;  %v9691_v45 = vld [vmem:[%s10211_s17 + $0xe8] sm:$0xff]  }
  0x5e   :  { %8528 = vmatprep.subr.bf16.mxu1 %v9622_v47  ;;  %8585 = vmatpush3.bf16.msra.mxu0 %v9637_v50 }
  0x5f   :  { %8586 = vmatprep.subr.bf16.mxu0 %v9639_v52 }
  0x61   :  { %8529 = vmatpush3.bf16.msra.mxu1 %v9622_v47  ;;  %v9695_v47 = vld [vmem:[%s10211_s17 + $0xf8] sm:$0xff]  }
  0x62   :  { %8530 = vmatprep.subr.bf16.mxu1 %v9624_v49  ;;  %8587 = vmatpush3.bf16.msra.mxu0 %v9639_v52 }
  0x63   :  { %8588 = vmatprep.subr.bf16.mxu0 %v9641_v54 }
  0x65   :  { %8531 = vmatpush3.bf16.msra.mxu1 %v9624_v49  ;;  %v9697_v49 = vld [vmem:[%s10211_s17 + $0x140] sm:$0xff]  }
  0x66   :  { %8556 = vmatprep.subr.bf16.mxu1 %v9626_v51  ;;  %8589 = vmatpush3.bf16.msra.mxu0 %v9641_v54 }
  0x67   :  { %8590 = vmatprep.subr.bf16.mxu0 %v9642_v56 }
  0x68   :  { %8533 = vmatmul.mubr.bf16.vlgmr.msra.gmra.mrb[8].mxu1 %v10148_v20 }
  0x69   :  { %8557 = vmatpush3.bf16.msra.mxu1 %v9626_v51  ;;  %8572 = vmatprep.mubr.bf16.mxu1 %v10131_v6 }
  0x6a   :  { %8558 = vmatprep.subr.bf16.mxu1 %v9628_v53  ;;  %8591 = vmatpush3.bf16.msra.mxu0 %v9642_v56  ;;  %v9701_v56 = vld [vmem:[%s10211_s17 + $0x150] sm:$0xff]  }
  0x6b   :  { %1100 = vmatprep.subr.bf16.mxu0 %v11307_v62 }
  0x6d   :  { %8559 = vmatpush3.bf16.msra.mxu1 %v9628_v53  ;;  %8593 = vmatmul.mubr.bf16.vlgmr.msra.gmra.mrb[8].mxu0 %v10148_v20 }
  0x6e   :  { %8560 = vmatprep.subr.bf16.mxu1 %v9630_v55  ;;  %1132 = vmatprep.mubr.bf16.mxu0 %v9668_v22 }
  0x71   :  { %8561 = vmatpush3.bf16.msra.mxu1 %v9630_v55  ;;  %v9699_v55 = vld [vmem:[%s10211_s17 + $0x148] sm:$0xff]  }
  0x72   :  { %8562 = vmatprep.subr.bf16.mxu1 %v9632_v57 }
  0x75   :  { %8563 = vmatpush3.bf16.msra.mxu1 %v9632_v57 }
  0x76   :  { %8564 = vmatprep.subr.bf16.mxu1 %v9634_v58 }
  0x79   :  { %8565 = vmatpush3.bf16.msra.mxu1 %v9634_v58  ;;  %v9703_v58 = vld [vmem:[%s10211_s17 + $0x158] sm:$0xff]  }
  0x7a   :  { %8566 = vmatprep.subr.bf16.mxu1 %v9636_v59 }
  0x7d   :  { %8567 = vmatpush3.bf16.msra.mxu1 %v9636_v59 }
  0x7e   :  { %8568 = vmatprep.subr.bf16.mxu1 %v9638_v60 }
  0x81   :  { %8569 = vmatpush3.bf16.msra.mxu1 %v9638_v60 }
  0x82   :  { %8570 = vmatprep.subr.bf16.mxu1 %v9640_v61 }
  0x85   :  { %8571 = vmatpush3.bf16.msra.mxu1 %v9640_v61 }
  0x86   :  { %8596 = vmatprep.subr.bf16.mxu1 %v9643_v63 }
  0x88   :  { %8573 = vmatmul.mubr.bf16.vlgmr.msra.gmra.mrb[12].mxu1 %v10148_v20 }
  0x89   :  { %8612 = vmatprep.mubr.bf16.mxu1 %v10131_v6  ;;  %8597 = vmatpush3.bf16.msra.mxu1 %v9643_v63  ;;  %v9650_v6 = vld [vmem:[%s6902_s13 + $0x38] sm:$0xff]   ;;  %s6911_s13 = sld [smem:[%s11306_s0 + %s10084_s10]]  }
  0x8a   :  { %8598 = vmatprep.subr.bf16.mxu1 %v9644_v0  ;;  %s6906_s10 = sld [smem:[%s11306_s0 + %s10090_s5]]   ;;  %s10105_s5 = smov 24  }
  0x8d   :  { %8599 = vmatpush3.bf16.msra.mxu1 %v9644_v0 }
  0x8e   :  { %8600 = vmatprep.subr.bf16.mxu1 %v9645_v1 }
  0x91   :  { %8601 = vmatpush3.bf16.msra.mxu1 %v9645_v1  ;;  %v9705_v1 = vld [vmem:[%s10211_s17 + $0x160] sm:$0xff]  }
  0x92   :  { %8602 = vmatprep.subr.bf16.mxu1 %v9646_v2 }
  0x95   :  { %8603 = vmatpush3.bf16.msra.mxu1 %v9646_v2  ;;  %v9707_v2 = vld [vmem:[%s10211_s17 + $0x168] sm:$0xff]  }
  0x96   :  { %8604 = vmatprep.subr.bf16.mxu1 %v9647_v3 }
  0x99   :  { %8605 = vmatpush3.bf16.msra.mxu1 %v9647_v3  ;;  %v9709_v3 = vld [vmem:[%s10211_s17 + $0x170] sm:$0xff]  }
  0x9a   :  { %8606 = vmatprep.subr.bf16.mxu1 %v9648_v4 }
  0x9d   :  { %8607 = vmatpush3.bf16.msra.mxu1 %v9648_v4  ;;  %v9711_v4 = vld [vmem:[%s10211_s17 + $0x178] sm:$0xff]  }
  0x9e   :  { %8608 = vmatprep.subr.bf16.mxu1 %v9649_v5 }
  0xa1   :  { %8609 = vmatpush3.bf16.msra.mxu1 %v9649_v5 }
  0xa2   :  { %8610 = vmatprep.subr.bf16.mxu1 %v9650_v6 }
  0xa5   :  { %8611 = vmatpush3.bf16.msra.mxu1 %v9650_v6  ;;  %v9713_v6 = vld [vmem:[%s10211_s17 + $0x1c0] sm:$0xff]  }
  0xa6   :  { %8616 = vmatprep.subr.bf16.mxu1 %v9651_v7 }
  0xa8   :  { %8613 = vmatmul.mubr.bf16.vlgmr.msra.gmra.mrb[16].mxu1 %v10148_v20  ;;  %v9664_v20 = vld [vmem:[%s10211_s17 + $0x58] sm:$0xff]  }
  0xa9   :  { %8617 = vmatpush3.bf16.msra.mxu1 %v9651_v7  ;;  %8632 = vmatprep.mubr.bf16.mxu1 %v10228_v15 }
  0xaa   :  { %8618 = vmatprep.subr.bf16.mxu1 %v9652_v8 }
  0xad   :  { %8619 = vmatpush3.bf16.msra.mxu1 %v9652_v8 }
  0xae   :  { %8620 = vmatprep.subr.bf16.mxu1 %v9653_v9 }
  0xb1   :  { %8621 = vmatpush3.bf16.msra.mxu1 %v9653_v9 }
  0xb2   :  { %8622 = vmatprep.subr.bf16.mxu1 %v9654_v10 }
  0xb5   :  { %8623 = vmatpush3.bf16.msra.mxu1 %v9654_v10 }
  0xb6   :  { %8624 = vmatprep.subr.bf16.mxu1 %v9655_v11 }
  0xb9   :  { %8625 = vmatpush3.bf16.msra.mxu1 %v9655_v11 }
  0xba   :  { %8626 = vmatprep.subr.bf16.mxu1 %v9656_v12 }
  0xbd   :  { %8627 = vmatpush3.bf16.msra.mxu1 %v9656_v12  ;;  %v9715_v12 = vld [vmem:[%s10211_s17 + $0x1c8] sm:$0xff]  }
  0xbe   :  { %8628 = vmatprep.subr.bf16.mxu1 %v9657_v13 }
  0xc1   :  { %8629 = vmatpush3.bf16.msra.mxu1 %v9657_v13  ;;  %v9717_v13 = vld [vmem:[%s10211_s17 + $0x1d0] sm:$0xff]  }
  0xc2   :  { %8630 = vmatprep.subr.bf16.mxu1 %v9658_v14 }
  0xc5   :  { %8631 = vmatpush3.bf16.msra.mxu1 %v9658_v14 }
  0xc6   :  { %8640 = vmatprep.subr.bf16.mxu1 %v9660_v16 }
  0xc8   :  { %8633 = vmatmul.mubr.bf16.vlgmr.msra.gmra.mrb[20].mxu1 %v10233_v17 }
  0xc9   :  { %8641 = vmatpush3.bf16.msra.mxu1 %v9660_v16  ;;  %8636 = vmatprep.mubr.bf16.mxu1 %v10248_v24  ;;  %v9719_v16 = vld [vmem:[%s10211_s17 + $0x1d8] sm:$0xff]  }
  0xca   :  { %8642 = vmatprep.subr.bf16.mxu1 %v9662_v18 }
  0xcd   :  { %8643 = vmatpush3.bf16.msra.mxu1 %v9662_v18 }
  0xce   :  { %8644 = vmatprep.subr.bf16.mxu1 %v9663_v19 }
  0xd0   :  { %8637 = vmatmul.mubr.bf16.gmra.mrb[24].mxu1 %v10253_v26 }
  0xd1   :  { %8645 = vmatpush3.bf16.msra.mxu1 %v9663_v19  ;;  %8656 = vmatprep.mubr.bf16.mxu1 %v10228_v15 }
  0xd2   :  { %8646 = vmatprep.subr.bf16.mxu1 %v9664_v20 }
  0xd5   :  { %8647 = vmatpush3.bf16.msra.mxu1 %v9664_v20 }
  0xd6   :  { %8648 = vmatprep.subr.bf16.mxu1 %v9665_v21 }
  0xd9   :  { %8649 = vmatpush3.bf16.msra.mxu1 %v9665_v21 }
  0xda   :  { %8650 = vmatprep.subr.bf16.mxu1 %v9670_v23 }
  0xdd   :  { %8651 = vmatpush3.bf16.msra.mxu1 %v9670_v23  ;;  %v9721_v23 = vld [vmem:[%s10211_s17 + $0x1e0] sm:$0xff]  }
  0xde   :  { %8652 = vmatprep.subr.bf16.mxu1 %v9673_v25 }
  0xe1   :  { %8653 = vmatpush3.bf16.msra.mxu1 %v9673_v25  ;;  %v9722_v25 = vld [vmem:[%s10211_s17 + $0x1e8] sm:$0xff]  }
  0xe2   :  { %8654 = vmatprep.subr.bf16.mxu1 %v9679_v27 }
  0xe5   :  { %8655 = vmatpush3.bf16.msra.mxu1 %v9679_v27  ;;  %v9723_v27 = vld [vmem:[%s10211_s17 + $0x1f0] sm:$0xff]  }
  0xe6   :  { %8688 = vmatprep.subr.bf16.mxu1 %v9681_v29 }
  0xe8   :  { %8657 = vmatmul.mubr.bf16.vlgmr.msra.gmra.mrb[28].mxu1 %v10233_v17 }
  0xe9   :  { %8689 = vmatpush3.bf16.msra.mxu1 %v9681_v29  ;;  %8660 = vmatprep.mubr.bf16.mxu1 %v10248_v24 }
  0xea   :  { %8690 = vmatprep.subr.bf16.mxu1 %v9683_v35 }
  0xed   :  { %8691 = vmatpush3.bf16.msra.mxu1 %v9683_v35  ;;  %v9669_v35 = vld [vmem:[%s10211_s17 + $0x80] sm:$0xff]  }
  0xee   :  { %8692 = vmatprep.subr.bf16.mxu1 %v9685_v36 }
  0xf0   :  { %8661 = vmatmul.mubr.bf16.gmra.mrb[32].mxu1 %v10253_v26 }
  0xf1   :  { %8693 = vmatpush3.bf16.msra.mxu1 %v9685_v36  ;;  %8704 = vmatprep.mubr.bf16.mxu1 %v10228_v15  ;;  %v9666_v36 = vld [vmem:[%s10242_s25] ss:$8 sps:$4 sm:$0xff]  }
  0xf2   :  { %8694 = vmatprep.subr.bf16.mxu1 %v9687_v38 }
  0xf5   :  { %8695 = vmatpush3.bf16.msra.mxu1 %v9687_v38  ;;  %v9671_v38 = vld [vmem:[%s10211_s17 + $0x88] sm:$0xff]  }
  0xf6   :  { %8696 = vmatprep.subr.bf16.mxu1 %v9689_v44 }
  0xf9   :  { %8697 = vmatpush3.bf16.msra.mxu1 %v9689_v44  ;;  %v9686_v44 = vld [vmem:[%s10211_s17 + $0xb0] sm:$0xff]  }
  0xfa   :  { %8698 = vmatprep.subr.bf16.mxu1 %v9691_v45 }
  0xfb   :  { %v8474_v28 = vpop.f32.mrb[0].mxu1 }
  0xfc   :  { %v250_v30 = vpop.f32.mrb[1].mxu1 }
  0xfd   :  { %v8475_v31 = vpop.f32.mrb[2].mxu1  ;;  %8699 = vmatpush3.bf16.msra.mxu1 %v9691_v45  ;;  %v9688_v45 = vld [vmem:[%s10211_s17 + $0xb8] sm:$0xff]  }
  0xfe   :  { %v266_v32 = vpack.c.bf16 %v8475_v31, %v8474_v28  ;;  %v253_v33 = vpop.f32.mrb[3].mxu1  ;;  %8700 = vmatprep.subr.bf16.mxu1 %v9693_v46  ;;  %v9724_v28 = vld [vmem:[%s10211_s17 + $0x1f8] sm:$0xff]  }
  0xff   :  { %v265_v34 = vpack.c.bf16 %v253_v33, %v250_v30 }
 0x100   :  { %v8514_v37 = vpop.f32.mrb[0].mxu0 }
 0x101   :  { %1101 = vmatpush1.bf16.msra.mxu0 %v265_v34  ;;  %v482_v39 = vpop.f32.mrb[1].mxu0  ;;  %8701 = vmatpush3.bf16.msra.mxu1 %v9693_v46  ;;  %v9690_v46 = vld [vmem:[%s10211_s17 + $0x100] sm:$0xff]  }
 0x102   :  { %1102 = vmatprep.subr.bf16.mxu0 %v11307_v62  ;;  %v8515_v40 = vpop.f32.mrb[2].mxu0  ;;  %8702 = vmatprep.subr.bf16.mxu1 %v9695_v47 }
 0x103   :  { %v498_v41 = vpack.c.bf16 %v8515_v40, %v8514_v37  ;;  %v485_v42 = vpop.f32.mrb[3].mxu0  ;;  %v9675_v37 = vld [vmem:[%s10242_s25 + $0x14] ss:$8 sps:$4 sm:$0xff]   ;;  %v9677_v40 = vld [vmem:[%s10242_s25 + $0x10] ss:$8 sps:$4 sm:$0xff]  }
 0x104   :  { %v497_v43 = vpack.c.bf16 %v485_v42, %v482_v39  ;;  %v9678_v39 = vld [vmem:[%s10211_s17 + $0x90] sm:$0xff]   ;;  %v9682_v42 = vld [vmem:[%s10211_s17 + $0xa0] sm:$0xff]  }
 0x105   :  { %1103 = vmatpush1.bf16.msra.mxu0 %v266_v32  ;;  %8703 = vmatpush3.bf16.msra.mxu1 %v9695_v47  ;;  %v9692_v47 = vld [vmem:[%s10211_s17 + $0x108] sm:$0xff]  }
 0x106   :  { %1104 = vmatprep.subr.bf16.mxu0 %v11307_v62  ;;  %8736 = vmatprep.subr.bf16.mxu1 %v9697_v49 }
 0x108   :  { %8705 = vmatmul.mubr.bf16.vlgmr.msra.gmra.mrb[36].mxu1 %v10233_v17 }
 0x109   :  { %8737 = vmatpush3.bf16.msra.mxu1 %v9697_v49  ;;  %8708 = vmatprep.mubr.bf16.mxu1 %v10248_v24 }
 0x10a   :  { %8738 = vmatprep.subr.bf16.mxu1 %v9699_v55 }
 0x10d   :  { %8739 = vmatpush3.bf16.msra.mxu1 %v9699_v55  ;;  %v9700_v55 = vld [vmem:[%s10211_s17 + $0x128] sm:$0xff]  }
 0x10e   :  { %8740 = vmatprep.subr.bf16.mxu1 %v9701_v56 }
 0x110   :  { %8709 = vmatmul.mubr.bf16.gmra.mrb[40].mxu1 %v10253_v26 }
 0x111   :  { %8741 = vmatpush3.bf16.msra.mxu1 %v9701_v56  ;;  %8752 = vmatprep.mubr.bf16.mxu1 %v10228_v15  ;;  %v9702_v56 = vld [vmem:[%s10211_s17 + $0x130] sm:$0xff]  }
 0x112   :  { %8742 = vmatprep.subr.bf16.mxu1 %v9703_v58 }
 0x115   :  { %8743 = vmatpush3.bf16.msra.mxu1 %v9703_v58  ;;  %v9706_v58 = vld [vmem:[%s10211_s17 + $0x180] sm:$0xff]  }
 0x116   :  { %8744 = vmatprep.subr.bf16.mxu1 %v9705_v1 }
 0x119   :  { %8745 = vmatpush3.bf16.msra.mxu1 %v9705_v1 }
 0x11a   :  { %8746 = vmatprep.subr.bf16.mxu1 %v9707_v2 }
 0x11b   :  { %v8494_v48 = vpop.f32.mrb[4].mxu1 }
 0x11c   :  { %v366_v50 = vpop.f32.mrb[5].mxu1 }
 0x11d   :  { %v8495_v51 = vpop.f32.mrb[6].mxu1  ;;  %8747 = vmatpush3.bf16.msra.mxu1 %v9707_v2 }
 0x11e   :  { %v382_v52 = vpack.c.bf16 %v8495_v51, %v8494_v48  ;;  %v369_v53 = vpop.f32.mrb[7].mxu1  ;;  %8748 = vmatprep.subr.bf16.mxu1 %v9709_v3 }
 0x11f   :  { %v381_v54 = vpack.c.bf16 %v369_v53, %v366_v50  ;;  %v9694_v50 = vld [vmem:[%s10211_s17 + $0x110] sm:$0xff]   ;;  %v9696_v53 = vld [vmem:[%s10211_s17 + $0x118] sm:$0xff]  }
 0x120   :  { %v10279_v57 = vpop.f32.mrb[4].mxu0 }
 0x121   :  { %1105 = vmatpush1.bf16.msra.mxu0 %v381_v54  ;;  %v714_v59 = vpop.f32.mrb[5].mxu0  ;;  %8749 = vmatpush3.bf16.msra.mxu1 %v9709_v3  ;;  %v9698_v54 = vld [vmem:[%s10211_s17 + $0x120] sm:$0xff]   ;;  %v9712_v3 = vld [vmem:[%s10211_s17 + $0x198] sm:$0xff]  }
 0x122   :  { %1106 = vmatprep.subr.bf16.mxu0 %v11307_v62  ;;  %v8555_v60 = vpop.f32.mrb[6].mxu0  ;;  %8750 = vmatprep.subr.bf16.mxu1 %v9711_v4 }
 0x123   :  { %v730_v61 = vpack.c.bf16 %v8555_v60, %v10279_v57  ;;  %v717_v63 = vpop.f32.mrb[7].mxu0  ;;  %v9704_v57 = vld [vmem:[%s10211_s17 + $0x138] sm:$0xff]   ;;  %v9710_v60 = vld [vmem:[%s10211_s17 + $0x190] sm:$0xff]  }
 0x124   :  { %v729_v0 = vpack.c.bf16 %v717_v63, %v714_v59  ;;  %v9708_v59 = vld [vmem:[%s10211_s17 + $0x188] sm:$0xff]  }
 0x125   :  { %1107 = vmatpush1.bf16.msra.mxu0 %v382_v52  ;;  %8751 = vmatpush3.bf16.msra.mxu1 %v9711_v4 }
 0x126   :  { %1108 = vmatprep.subr.bf16.mxu0 %v11307_v62  ;;  %8784 = vmatprep.subr.bf16.mxu1 %v9713_v6 }
 0x128   :  { %8753 = vmatmul.mubr.bf16.vlgmr.msra.gmra.mrb[44].mxu1 %v10233_v17 }
 0x129   :  { %1109 = vmatpush1.bf16.msra.mxu0 %v497_v43  ;;  %8785 = vmatpush3.bf16.msra.mxu1 %v9713_v6  ;;  %v9684_v43 = vld [vmem:[%s10211_s17 + $0xa8] sm:$0xff]  }
 0x12a   :  { %1110 = vmatprep.subr.bf16.mxu0 %v11307_v62  ;;  %8756 = vmatprep.mubr.bf16.mxu1 %v10248_v24  ;;  %v9716_v6 = vld [vmem:[%s10211_s17 + $0x1a8] sm:$0xff]  }
 0x12b   :  { %8786 = vmatprep.subr.bf16.mxu1 %v9715_v12 }
 0x12d   :  { %1111 = vmatpush1.bf16.msra.mxu0 %v498_v41  ;;  %8787 = vmatpush3.bf16.msra.mxu1 %v9715_v12  ;;  %v9680_v41 = vld [vmem:[%s10211_s17 + $0x98] sm:$0xff]  }
 0x12e   :  { %1112 = vmatprep.subr.bf16.mxu0 %v11307_v62  ;;  %8788 = vmatprep.subr.bf16.mxu1 %v9717_v13 }
 0x130   :  { %8757 = vmatmul.mubr.bf16.gmra.mrb[48].mxu1 %v10253_v26 }
 0x131   :  { %8789 = vmatpush3.bf16.msra.mxu1 %v9717_v13  ;;  %8800 = vmatprep.mubr.bf16.mxu1 %v10228_v15 }
 0x132   :  { %8790 = vmatprep.subr.bf16.mxu1 %v9719_v16 }
 0x135   :  { %8791 = vmatpush3.bf16.msra.mxu1 %v9719_v16 }
 0x136   :  { %8792 = vmatprep.subr.bf16.mxu1 %v9721_v23 }
 0x139   :  { %8793 = vmatpush3.bf16.msra.mxu1 %v9721_v23 }
 0x13a   :  { %8794 = vmatprep.subr.bf16.mxu1 %v9722_v25 }
 0x13b   :  { %v8534_v5 = vpop.f32.mrb[8].mxu1 }
 0x13c   :  { %v598_v7 = vpop.f32.mrb[9].mxu1 }
 0x13d   :  { %v8535_v8 = vpop.f32.mrb[10].mxu1  ;;  %8795 = vmatpush3.bf16.msra.mxu1 %v9722_v25 }
 0x13e   :  { %v614_v9 = vpack.c.bf16 %v8535_v8, %v8534_v5  ;;  %v601_v10 = vpop.f32.mrb[11].mxu1  ;;  %8796 = vmatprep.subr.bf16.mxu1 %v9723_v27  ;;  %v9714_v5 = vld [vmem:[%s10211_s17 + $0x1a0] sm:$0xff]   ;;  %v9720_v8 = vld [vmem:[%s10211_s17 + $0x1b8] sm:$0xff]  }
 0x13f   :  { %v613_v11 = vpack.c.bf16 %v601_v10, %v598_v7  ;;  %v9718_v7 = vld [vmem:[%s10211_s17 + $0x1b0] sm:$0xff]   ;;  %s6912_s17 = sld [smem:[%s11306_s0 + %s10085_s14]]  }
 0x140   :  { %v8594_v14 = vpop.f32.mrb[8].mxu0  ;;  %s6904_s14 = sld [smem:[%s11306_s0 + %s10091_s11]]  }
 0x141   :  { %1113 = vmatpush1.bf16.msra.mxu0 %v613_v11  ;;  %v946_v18 = vpop.f32.mrb[9].mxu0  ;;  %8797 = vmatpush3.bf16.msra.mxu1 %v9723_v27  ;;  %s6919_s11 = sld [smem:[%s11306_s0 + %s10105_s5]]  }
 0x142   :  { %1114 = vmatprep.subr.bf16.mxu0 %v11307_v62  ;;  %v8595_v19 = vpop.f32.mrb[10].mxu0  ;;  %8798 = vmatprep.subr.bf16.mxu1 %v9724_v28 }
 0x143   :  { %v962_v20 = vpack.c.bf16 %v8595_v19, %v8594_v14  ;;  %v949_v21 = vpop.f32.mrb[11].mxu0 }
 0x144   :  { %v961_v22 = vpack.c.bf16 %v949_v21, %v946_v18 }
 0x145   :  { %1115 = vmatpush1.bf16.msra.mxu0 %v614_v9  ;;  %8799 = vmatpush3.bf16.msra.mxu1 %v9724_v28 }
 0x146   :  { %1116 = vmatprep.subr.bf16.mxu0 %v11307_v62 }
 0x148   :  { %8801 = vmatmul.mubr.bf16.vlgmr.msra.gmra.mrb[52].mxu1 %v10233_v17 }
 0x149   :  { %1117 = vmatpush1.bf16.msra.mxu0 %v729_v0  ;;  %8804 = vmatprep.mubr.bf16.mxu1 %v10248_v24 }
 0x14a   :  { %1118 = vmatprep.subr.bf16.mxu0 %v11307_v62 }
 0x14d   :  { %1119 = vmatpush1.bf16.msra.mxu0 %v730_v61 }
 0x14e   :  { %1120 = vmatprep.subr.bf16.mxu0 %v11307_v62 }
 0x150   :  { %8805 = vmatmul.mubr.bf16.gmra.mrb[56].mxu1 %v10253_v26 }
 0x15b   :  { %v8574_v29 = vpop.f32.mrb[12].mxu1 }
 0x15c   :  { %v830_v30 = vpop.f32.mrb[13].mxu1 }
 0x15d   :  { %v8575_v31 = vpop.f32.mrb[14].mxu1 }
 0x15e   :  { %v846_v32 = vpack.c.bf16 %v8575_v31, %v8574_v29  ;;  %v833_v33 = vpop.f32.mrb[15].mxu1 }
 0x15f   :  { %v845_v34 = vpack.c.bf16 %v833_v33, %v830_v30 }
 0x161   :  { %1121 = vmatpush1.bf16.msra.mxu0 %v845_v34 }
 0x162   :  { %1122 = vmatprep.subr.bf16.mxu0 %v11307_v62 }
 0x165   :  { %1123 = vmatpush1.bf16.msra.mxu0 %v846_v32 }
 0x166   :  { %1124 = vmatprep.subr.bf16.mxu0 %v11307_v62 }
 0x169   :  { %1125 = vmatpush1.bf16.msra.mxu0 %v961_v22 }
 0x16a   :  { %1126 = vmatprep.subr.bf16.mxu0 %v11307_v62 }
 0x16d   :  { %1127 = vmatpush1.bf16.msra.mxu0 %v962_v20 }
 0x16e   :  { %8664 = vmatprep.subr.bf16.mxu0 %v9669_v35 }
 0x170   :  { %1133 = vmatmul.mubr.bf16.vlgmr.msra.gmra.mrb[12].mxu0 %v9666_v36 }
 0x171   :  { %8665 = vmatpush3.bf16.msra.mxu0 %v9669_v35  ;;  %1140 = vmatprep.mubr.bf16.mxu0 %v9675_v37 }
 0x172   :  { %8666 = vmatprep.subr.bf16.mxu0 %v9671_v38 }
 0x175   :  { %8667 = vmatpush3.bf16.msra.mxu0 %v9671_v38 }
 0x176   :  { %8668 = vmatprep.subr.bf16.mxu0 %v9678_v39 }
 0x178   :  { %1141 = vmatmul.mubr.bf16.gmra.mrb[16].mxu0 %v9677_v40 }
 0x179   :  { %8669 = vmatpush3.bf16.msra.mxu0 %v9678_v39  ;;  %8680 = vmatprep.mubr.bf16.mxu0 %v10228_v15 }
 0x17a   :  { %8670 = vmatprep.subr.bf16.mxu0 %v9680_v41 }
 0x17b   :  { %v10328_v48 = vpop.f32.mrb[16].mxu1 }
 0x17c   :  { %v10331_v49 = vpop.f32.mrb[17].mxu1 }
 0x17d   :  { %8671 = vmatpush3.bf16.msra.mxu0 %v9680_v41  ;;  %v10334_v51 = vpop.f32.mrb[18].mxu1  ;;  %v9747_v41 = vld [vmem:[%s10445_s3 + $0xc] ss:$16 sps:$4 sm:$0xff]  }
 0x17e   :  { %8672 = vmatprep.subr.bf16.mxu0 %v9682_v42  ;;  %v10336_v52 = vpop.f32.mrb[19].mxu1 }
 0x181   :  { %8673 = vmatpush3.bf16.msra.mxu0 %v9682_v42  ;;  %v9725_v42 = vld [vmem:[%s10434_s29] sm:$0xff]  }
 0x182   :  { %8674 = vmatprep.subr.bf16.mxu0 %v9684_v43 }
 0x185   :  { %8675 = vmatpush3.bf16.msra.mxu0 %v9684_v43  ;;  %v9726_v43 = vld [vmem:[%s10434_s29 + $0x8] sm:$0xff]  }
 0x186   :  { %8676 = vmatprep.subr.bf16.mxu0 %v9686_v44 }
 0x189   :  { %8677 = vmatpush3.bf16.msra.mxu0 %v9686_v44  ;;  %v9727_v44 = vld [vmem:[%s10434_s29 + $0x10] sm:$0xff]  }
 0x18a   :  { %8678 = vmatprep.subr.bf16.mxu0 %v9688_v45 }
 0x18d   :  { %8679 = vmatpush3.bf16.msra.mxu0 %v9688_v45  ;;  %v9728_v45 = vld [vmem:[%s10434_s29 + $0x18] sm:$0xff]  }
 0x18e   :  { %8712 = vmatprep.subr.bf16.mxu0 %v9690_v46 }
 0x190   :  { %8681 = vmatmul.mubr.bf16.vlgmr.msra.gmra.mrb[20].mxu0 %v10233_v17 }
 0x191   :  { %8713 = vmatpush3.bf16.msra.mxu0 %v9690_v46  ;;  %8684 = vmatprep.mubr.bf16.mxu0 %v10248_v24  ;;  %v9729_v46 = vld [vmem:[%s10434_s29 + $0x20] sm:$0xff]  }
 0x192   :  { %8714 = vmatprep.subr.bf16.mxu0 %v9692_v47 }
 0x195   :  { %8715 = vmatpush3.bf16.msra.mxu0 %v9692_v47 }
 0x196   :  { %8716 = vmatprep.subr.bf16.mxu0 %v9694_v50 }
 0x198   :  { %8685 = vmatmul.mubr.bf16.gmra.mrb[24].mxu0 %v10253_v26 }
 0x199   :  { %8717 = vmatpush3.bf16.msra.mxu0 %v9694_v50  ;;  %8728 = vmatprep.mubr.bf16.mxu0 %v10228_v15 }
 0x19a   :  { %8718 = vmatprep.subr.bf16.mxu0 %v9696_v53 }
 0x19b   :  { %v10350_v61 = vpop.f32.mrb[20].mxu1 }
 0x19c   :  { %v10352_v63 = vpop.f32.mrb[21].mxu1 }
 0x19d   :  { %8719 = vmatpush3.bf16.msra.mxu0 %v9696_v53  ;;  %v10354_v0 = vpop.f32.mrb[22].mxu1 }
 0x19e   :  { %8720 = vmatprep.subr.bf16.mxu0 %v9698_v54  ;;  %v10358_v2 = vpop.f32.mrb[23].mxu1 }
 0x1a1   :  { %8721 = vmatpush3.bf16.msra.mxu0 %v9698_v54 }
 0x1a2   :  { %8722 = vmatprep.subr.bf16.mxu0 %v9700_v55 }
 0x1a3   :  { %v10369_v9 = vpop.f32.mrb[24].mxu1 }
 0x1a4   :  { %v10371_v10 = vpop.f32.mrb[25].mxu1 }
 0x1a5   :  { %8723 = vmatpush3.bf16.msra.mxu0 %v9700_v55  ;;  %v10373_v11 = vpop.f32.mrb[26].mxu1 }
 0x1a6   :  { %8724 = vmatprep.subr.bf16.mxu0 %v9702_v56  ;;  %v10375_v12 = vpop.f32.mrb[27].mxu1 }
 0x1a9   :  { %8725 = vmatpush3.bf16.msra.mxu0 %v9702_v56  ;;  %v9730_v56 = vld [vmem:[%s10434_s29 + $0x28] sm:$0xff]  }
 0x1aa   :  { %8726 = vmatprep.subr.bf16.mxu0 %v9704_v57 }
 0x1ad   :  { %8727 = vmatpush3.bf16.msra.mxu0 %v9704_v57 }
 0x1ae   :  { %8760 = vmatprep.subr.bf16.mxu0 %v9706_v58 }
 0x1b0   :  { %8729 = vmatmul.mubr.bf16.vlgmr.msra.gmra.mrb[28].mxu0 %v10233_v17 }
 0x1b1   :  { %8761 = vmatpush3.bf16.msra.mxu0 %v9706_v58  ;;  %8732 = vmatprep.mubr.bf16.mxu0 %v10248_v24  ;;  %v9733_v58 = vld [vmem:[%s10445_s3 + $0x4] ss:$16 sps:$4 sm:$0xff]  }
 0x1b2   :  { %8762 = vmatprep.subr.bf16.mxu0 %v9708_v59  ;;  %2577 = vmatprep.mubr.bf16.mxu1 %v9733_v58 }
 0x1b5   :  { %8763 = vmatpush3.bf16.msra.mxu0 %v9708_v59  ;;  %v9734_v59 = vld [vmem:[%s10434_s29 + $0x30] sm:$0xff]  }
 0x1b6   :  { %8764 = vmatprep.subr.bf16.mxu0 %v9710_v60 }
 0x1b8   :  { %8733 = vmatmul.mubr.bf16.gmra.mrb[32].mxu0 %v10253_v26 }
 0x1b9   :  { %8765 = vmatpush3.bf16.msra.mxu0 %v9710_v60  ;;  %8776 = vmatprep.mubr.bf16.mxu0 %v10228_v15  ;;  %v9735_v60 = vld [vmem:[%s10434_s29 + $0x38] sm:$0xff]  }
 0x1ba   :  { %8766 = vmatprep.subr.bf16.mxu0 %v9712_v3 }
 0x1bb   :  { %v10383_v16 = vpop.f32.mrb[28].mxu1 }
 0x1bc   :  { %v10385_v18 = vpop.f32.mrb[29].mxu1 }
 0x1bd   :  { %8767 = vmatpush3.bf16.msra.mxu0 %v9712_v3  ;;  %v10387_v19 = vpop.f32.mrb[30].mxu1 }
 0x1be   :  { %8768 = vmatprep.subr.bf16.mxu0 %v9714_v5  ;;  %v10391_v21 = vpop.f32.mrb[31].mxu1 }
 0x1c1   :  { %8769 = vmatpush3.bf16.msra.mxu0 %v9714_v5 }
 0x1c2   :  { %8770 = vmatprep.subr.bf16.mxu0 %v9716_v6 }
 0x1c3   :  { %v10397_v23 = vpop.f32.mrb[32].mxu1 }
 0x1c4   :  { %v10399_v25 = vpop.f32.mrb[33].mxu1 }
 0x1c5   :  { %8771 = vmatpush3.bf16.msra.mxu0 %v9716_v6  ;;  %v10401_v27 = vpop.f32.mrb[34].mxu1 }
 0x1c6   :  { %8772 = vmatprep.subr.bf16.mxu0 %v9718_v7  ;;  %v10403_v28 = vpop.f32.mrb[35].mxu1 }
 0x1c9   :  { %8773 = vmatpush3.bf16.msra.mxu0 %v9718_v7 }
 0x1ca   :  { %8774 = vmatprep.subr.bf16.mxu0 %v9720_v8 }
 0x1cd   :  { %8775 = vmatpush3.bf16.msra.mxu0 %v9720_v8 }
 0x1ce   :  { %8808 = vmatprep.subr.bf16.mxu0 %v9725_v42 }
 0x1d0   :  { %8777 = vmatmul.mubr.bf16.vlgmr.msra.gmra.mrb[36].mxu0 %v10233_v17 }
 0x1d1   :  { %8780 = vmatprep.mubr.bf16.mxu0 %v10248_v24  ;;  %8809 = vmatpush3.bf16.msra.mxu0 %v9725_v42 }
 0x1d2   :  { %8810 = vmatprep.subr.bf16.mxu0 %v9726_v43 }
 0x1d5   :  { %8811 = vmatpush3.bf16.msra.mxu0 %v9726_v43 }
 0x1d6   :  { %8812 = vmatprep.subr.bf16.mxu0 %v9727_v44 }
 0x1d8   :  { %8781 = vmatmul.mubr.bf16.gmra.mrb[40].mxu0 %v10253_v26 }
 0x1d9   :  { %8824 = vmatprep.mubr.bf16.mxu0 %v10228_v15  ;;  %8813 = vmatpush3.bf16.msra.mxu0 %v9727_v44 }
 0x1da   :  { %8814 = vmatprep.subr.bf16.mxu0 %v9728_v45 }
 0x1db   :  { %v10409_v31 = vpop.f32.mrb[36].mxu1 }
 0x1dc   :  { %v10411_v32 = vpop.f32.mrb[37].mxu1 }
 0x1dd   :  { %v10413_v33 = vpop.f32.mrb[38].mxu1  ;;  %8815 = vmatpush3.bf16.msra.mxu0 %v9728_v45 }
 0x1de   :  { %v10417_v34 = vpop.f32.mrb[39].mxu1  ;;  %8816 = vmatprep.subr.bf16.mxu0 %v9729_v46 }
 0x1e1   :  { %8817 = vmatpush3.bf16.msra.mxu0 %v9729_v46 }
 0x1e2   :  { %8818 = vmatprep.subr.bf16.mxu0 %v9730_v56 }
 0x1e3   :  { %v10421_v36 = vpop.f32.mrb[40].mxu1 }
 0x1e4   :  { %v10423_v37 = vpop.f32.mrb[41].mxu1 }
 0x1e5   :  { %v10425_v38 = vpop.f32.mrb[42].mxu1  ;;  %8819 = vmatpush3.bf16.msra.mxu0 %v9730_v56 }
 0x1e6   :  { %v10427_v39 = vpop.f32.mrb[43].mxu1  ;;  %8820 = vmatprep.subr.bf16.mxu0 %v9734_v59 }
 0x1e9   :  { %8821 = vmatpush3.bf16.msra.mxu0 %v9734_v59 }
 0x1ea   :  { %8822 = vmatprep.subr.bf16.mxu0 %v9735_v60 }
 0x1ed   :  { %8823 = vmatpush3.bf16.msra.mxu0 %v9735_v60 }
 0x1f0   :  { %8825 = vmatmul.mubr.bf16.vlgmr.msra.gmra.mrb[44].mxu0 %v10233_v17 }
 0x1f1   :  { %8828 = vmatprep.mubr.bf16.mxu0 %v10248_v24  ;;  %v7093_v24 = vld [vmem:[%s6903_s8] ss:$0 sm:$0xff]  ;;  %s10097_s8 = smov 28  }
 0x1f2   :  { %s10879_s12 = sld [smem:[%s11306_s0 + %s10097_s8]]  }
 0x1f8   :  { %8829 = vmatmul.mubr.bf16.gmra.mrb[48].mxu0 %v10253_v26 }
 0x1f9   :  { %2642 = vmatprep.mubr.bf16.mxu0 %v9747_v41 }
 0x1fb   :  { %v10448_v47 = vpop.f32.mrb[44].mxu1 }
 0x1fc   :  { %v10450_v50 = vpop.f32.mrb[45].mxu1 }
 0x1fd   :  { %v10452_v53 = vpop.f32.mrb[46].mxu1 }
 0x1fe   :  { %v10456_v55 = vpop.f32.mrb[47].mxu1 }
 0x203   :  { %v10465_v3 = vpop.f32.mrb[48].mxu1 }
 0x204   :  { %11312 = vst [vmem:[#allocation2_spill] sm:$0xff] %v10465_v3  ;;  %v10467_v5 = vpop.f32.mrb[49].mxu1 }
 0x205   :  { %v10470_v6 = vpop.f32.mrb[50].mxu1 }
 0x206   :  { %11313 = vst [vmem:[#allocation3_spill] sm:$0xff] %v10470_v6  ;;  %v10474_v8 = vpop.f32.mrb[51].mxu1 }
 0x21b   :  { %v10479_v43 = vpop.f32.mrb[52].mxu1 }
 0x21c   :  { %v10481_v17 = vpop.f32.mrb[53].mxu1 }
 0x21d   :  { %v10483_v44 = vpop.f32.mrb[54].mxu1 }
 0x21e   :  { %v10487_v45 = vpop.f32.mrb[55].mxu1 }
 0x223   :  { %v10491_v56 = vpop.f32.mrb[56].mxu1 }
 0x224   :  { %11314 = vst [vmem:[#allocation4_spill] sm:$0xff] %v10491_v56  ;;  %v10493_v58 = vpop.f32.mrb[57].mxu1 }
 0x225   :  { %v10495_v26 = vpop.f32.mrb[58].mxu1 }
 0x226   :  { %v10502_v60 = vpop.f32.mrb[59].mxu1 }
 0x243   :  { %v1134_v7 = vpop.f32.mrb[12].mxu0 }
 0x244   :  { %v1135_v42 = vadd.f32 %v1134_v7, %v10331_v49  ;;  %v1136_v54 = vpop.f32.mrb[13].mxu0 }
 0x245   :  { %v1137_v57 = vpop.f32.mrb[14].mxu0 }
 0x246   :  { %v1138_v46 = vadd.f32 %v1137_v57, %v10336_v52  ;;  %v1139_v29 = vpop.f32.mrb[15].mxu0  ;;  %v1156_v30 = vadd.f32 %v7093_v24, %v1135_v42 }
 0x248   :  { %v1157_v40 = vadd.f32 %v7093_v24, %v1138_v46 }
 0x24a   :  { %v1162_v20 = vadd.f32 %v1157_v40, %v1156_v30 }
 0x24b   :  { %v1142_v59 = vpop.f32.mrb[16].mxu0 }
 0x24c   :  { %v1143_v15 = vadd.f32 %v10328_v48, %v1142_v59  ;;  %v1144_v22 = vpop.f32.mrb[17].mxu0 }
 0x24d   :  { %v1145_v35 = vpop.f32.mrb[18].mxu0 }
 0x24e   :  { %v1158_v62 = vadd.f32 %v7093_v24, %v1143_v15  ;;  %v1146_v13 = vadd.f32 %v10334_v51, %v1145_v35  ;;  %v1147_v49 = vpop.f32.mrb[19].mxu0 }
 0x250   :  { %v1163_v54 = vadd.f32 %v1162_v20, %v1158_v62  ;;  %v1159_v7 = vadd.f32 %v7093_v24, %v1146_v13 }
 0x252   :  { %v1164_v14 = vadd.f32 %v1163_v54, %v1159_v7 }
 0x254   :  { %v1165_v1 = vrot.slane %v1164_v14, 4 }
 0x256   :  { %v1166_v52 = vadd.f32 %v1165_v1, %v1164_v14 }
 0x258   :  { %v1167_v29 = vrot.slane %v1166_v52, 2 }
 0x25a   :  { %v1168_v57 = vadd.f32 %v1167_v29, %v1166_v52 }
 0x25c   :  { %v1169_v42 = vrot.slane %v1168_v57, 1 }
 0x25e   :  { %v1170_v46 = vadd.f32 %v1169_v42, %v1168_v57 }
 0x260   :  { %v1172_v41 = vmul.f32 0.03125, %v1170_v46  ;;  %v11316_v46 = vpack.c.bf16 %v10354_v0, %v10350_v61  ;;  %v11319_v61 = vpack.c.bf16 %v10417_v34, %v10411_v32 }
 0x262   :  { %v1173_v4 = vsub.f32 %v1156_v30, %v1172_v41  ;;  %v1174_v3 = vsub.f32 %v1157_v40, %v1172_v41  ;;  %v1175_v6 = vsub.f32 %v1158_v62, %v1172_v41  ;;  %v1176_v48 = vsub.f32 %v1159_v7, %v1172_v41 }
 0x263   :  { %v8682_v22 = vpop.f32.mrb[20].mxu0  ;;  %v11315_v30 = vpack.c.bf16 %v10358_v2, %v10352_v63  ;;  %v11317_v63 = vpack.c.bf16 %v10375_v12, %v10371_v10  ;;  %v11321_v10 = vpack.c.bf16 %v10413_v33, %v10409_v31  ;;  %v11324_v12 = vpack.c.bf16 %v10403_v28, %v10399_v25  ;;  %v9736_v28 = vld [vmem:[%s10445_s3 + $0x24] ss:$16 sps:$4 sm:$0xff]  }
 0x264   :  { %v1177_v59 = vmul.f32 %v1173_v4, %v1173_v4  ;;  %v1178_v15 = vmul.f32 %v1174_v3, %v1174_v3  ;;  %v1615_v56 = vpop.f32.mrb[21].mxu0  ;;  %v1179_v35 = vmul.f32 %v1175_v6, %v1175_v6  ;;  %v1180_v1 = vmul.f32 %v1176_v48, %v1176_v48 }
 0x265   :  { %v8683_v51 = vpop.f32.mrb[22].mxu0  ;;  %v11326_v25 = vpack.c.bf16 %v10401_v27, %v10397_v23  ;;  %v9960_v27 = vld [vmem:[%s10118_s6 + $0x8] sm:$0xff]  }
 0x266   :  { %v1181_v20 = vadd.f32 %v1178_v15, %v1177_v59  ;;  %v1647_v13 = vpack.c.bf16 %v8683_v51, %v8682_v22  ;;  %v1618_v24 = vpop.f32.mrb[23].mxu0  ;;  %v11318_v15 = vpack.c.bf16 %v10373_v11, %v10369_v9  ;;  %v11322_v9 = vpack.c.bf16 %v10387_v19, %v10383_v16  ;;  %v9731_v16 = vld [vmem:[%s10445_s3] ss:$16 sps:$4 sm:$0xff]  }
 0x267   :  { %v1646_v49 = vpack.c.bf16 %v1618_v24, %v1615_v56  ;;  %v11323_v11 = vpack.c.bf16 %v10427_v39, %v10423_v37 }
 0x268   :  { %v1182_v14 = vadd.f32 %v1181_v20, %v1179_v35  ;;  %v11320_v35 = vpack.c.bf16 %v10391_v21, %v10385_v18  ;;  %v11325_v21 = vpack.c.bf16 %v10425_v38, %v10421_v36  ;;  %v9959_v38 = vld [vmem:[%s10118_s6] sm:$0xff]  }
 0x269   :  { %7884 = vmatprep.subr.bf16.mxu1 %v1646_v49  ;;  %v9738_v49 = vld [vmem:[%s10445_s3 + $0x20] ss:$16 sps:$4 sm:$0xff]  }
 0x26a   :  { %v1183_v54 = vadd.f32 %v1182_v14, %v1180_v1  ;;  %7885 = vmatpush3.bf16.msra.mxu1 %v11315_v30  ;;  %v9741_v30 = vld [vmem:[%s10445_s3 + $0x40] ss:$16 sps:$4 sm:$0xff]  }
 0x26b   :  { %v8686_v62 = vpop.f32.mrb[24].mxu0  ;;  %7886 = vmatprep.subr.bf16.mxu1 %v1647_v13 }
 0x26c   :  { %v1184_v40 = vrot.slane %v1183_v54, 4  ;;  %v1631_v7 = vpop.f32.mrb[25].mxu0 }
 0x26d   :  { %v8687_v52 = vpop.f32.mrb[26].mxu0 }
 0x26e   :  { %v1185_v29 = vadd.f32 %v1184_v40, %v1183_v54  ;;  %v1649_v57 = vpack.c.bf16 %v8687_v52, %v8686_v62  ;;  %v1634_v42 = vpop.f32.mrb[27].mxu0  ;;  %7887 = vmatpush3.bf16.msra.mxu1 %v11316_v46  ;;  %v9962_v54 = vld [vmem:[%s10118_s6 + $0x18] sm:$0xff]   ;;  %v9742_v62 = vld [vmem:[%s10445_s3 + $0x64] ss:$16 sps:$4 sm:$0xff]   ;;  %v9744_v52 = vld [vmem:[%s10445_s3 + $0x60] ss:$16 sps:$4 sm:$0xff]  }
 0x26f   :  { %v1648_v56 = vpack.c.bf16 %v1634_v42, %v1631_v7  ;;  %v9963_v40 = vld [vmem:[%s10118_s6 + $0x20] sm:$0xff]   ;;  %v9964_v7 = vld [vmem:[%s10118_s6 + $0x28] sm:$0xff]   ;;  %v9966_v42 = vld [vmem:[%s10118_s6 + $0x38] sm:$0xff]  }
 0x270   :  { %v1186_v41 = vrot.slane %v1185_v29, 2 }
 0x271   :  { %7888 = vmatprep.subr.bf16.mxu1 %v1648_v56 }
 0x272   :  { %v1187_v22 = vadd.f32 %v1186_v41, %v1185_v29  ;;  %7889 = vmatpush3.bf16.msra.mxu1 %v11317_v63  ;;  %v9965_v29 = vld [vmem:[%s10118_s6 + $0x30] sm:$0xff]  }
 0x273   :  { %7890 = vmatprep.subr.bf16.mxu1 %v1649_v57 }
 0x274   :  { %v1188_v2 = vrot.slane %v1187_v22, 1 }
 0x276   :  { %v1189_v59 = vadd.f32 %v1188_v2, %v1187_v22  ;;  %7891 = vmatpush3.bf16.msra.mxu1 %v11318_v15  ;;  %v10580_v2 = vld [vmem:[%s10118_s6 + $0x80] sm:$0xff]  }
 0x277   :  { %7892 = vmatprep.subr.bf16.mxu1 %v11319_v61 }
 0x278   :  { %v1190_v0 = vmul.f32 0.03125, %v1189_v59 }
 0x27a   :  { %v1191_v51 = vadd.f32 1e-05, %v1190_v0  ;;  %7893 = vmatpush3.bf16.msra.mxu1 %v11320_v35 }
 0x27b   :  { %7894 = vmatprep.subr.bf16.mxu1 %v11321_v10  ;;  %v11327_v10 = vpack.c.bf16 %v10487_v45, %v10481_v17  ;;  %v11332_v17 = vpack.c.bf16 %v10474_v8, %v10467_v5  ;;  %v11336_v45 = vld [vmem:[#allocation2_spill] sm:$0xff]  ;;  %v9969_v5 = vld [vmem:[%s10118_s6 + $0x48] sm:$0xff]  }
 0x27c   :  { %9947 = vrsqrt.f32 %v1191_v51  ;;  %v9750_v8 = vld [vmem:[%s10445_s3 + $0x28] ss:$16 sps:$4 sm:$0xff]  }
 0x27e   :  { %7895 = vmatpush3.bf16.msra.mxu1 %v11322_v9  ;;  %v11328_v9 = vpack.c.bf16 %v10456_v55, %v10450_v50  ;;  %v11333_v50 = vld [vmem:[#allocation4_spill] sm:$0xff] }
 0x27f   :  { %7896 = vmatprep.subr.bf16.mxu1 %v11323_v11  ;;  %v11329_v11 = vpack.c.bf16 %v10483_v44, %v10479_v43  ;;  %v11334_v55 = vpack.c.bf16 %v10495_v26, %v11333_v50  ;;  %v9745_v43 = vld [vmem:[%s10445_s3 + $0x8] ss:$16 sps:$4 sm:$0xff]   ;;  %v9970_v26 = vld [vmem:[%s10118_s6 + $0x50] sm:$0xff]  }
 0x280   :  { %v11335_v44 = vld [vmem:[#allocation3_spill] sm:$0xff] }
 0x282   :  { %7897 = vmatpush3.bf16.msra.mxu1 %v11324_v12  ;;  %v11330_v12 = vpack.c.bf16 %v10452_v53, %v10448_v47  ;;  %v9748_v47 = vld [vmem:[%s10445_s3 + $0x2c] ss:$16 sps:$4 sm:$0xff]   ;;  %v9968_v53 = vld [vmem:[%s10118_s6 + $0x40] sm:$0xff]  }
 0x283   :  { %v10541_v18 = vpop.f32.mrb[28].mxu0  ;;  %7898 = vmatprep.subr.bf16.mxu1 %v11325_v21  ;;  %v11337_v21 = vpack.c.bf16 %v11335_v44, %v11336_v45 }
 0x284   :  { %v10546_v31 = vpop.f32.mrb[29].mxu0 }
 0x285   :  { %v10548_v32 = vpop.f32.mrb[30].mxu0 }
 0x286   :  { %v9948_v19 = vpop.eup %9947  ;;  %v1915_v33 = vpack.c.bf16 %v10548_v32, %v10541_v18  ;;  %v1886_v34 = vpop.f32.mrb[31].mxu0  ;;  %7899 = vmatpush3.bf16.msra.mxu1 %v11326_v25  ;;  %v11331_v18 = vpack.c.bf16 %v10502_v60, %v10493_v58  ;;  %v9751_v58 = vld [vmem:[%s10445_s3 + $0x4c] ss:$16 sps:$4 sm:$0xff]  }
 0x287   :  { %v10557_v37 = vmul.f32 %v9948_v19, %v1176_v48  ;;  %v1914_v36 = vpack.c.bf16 %v1886_v34, %v10546_v31  ;;  %8832 = vmatprep.subr.bf16.mxu1 %v9959_v38  ;;  %v10561_v39 = vmul.f32 %v9948_v19, %v1173_v4  ;;  %v10563_v20 = vmul.f32 %v9948_v19, %v1174_v3  ;;  %v9739_v3 = vld [vmem:[%s10445_s3 + $0x44] ss:$16 sps:$4 sm:$0xff]   ;;  %v9971_v60 = vld [vmem:[%s10118_s6 + $0x58] sm:$0xff]  }
 0x288   :  { %v10565_v13 = vmul.f32 %v9948_v19, %v1175_v6  ;;  %v9961_v6 = vld [vmem:[%s10118_s6 + $0x10] sm:$0xff]   ;;  %v9753_v31 = vld [vmem:[%s10445_s3 + $0x48] ss:$16 sps:$4 sm:$0xff]   ;;  %v9754_v32 = vld [vmem:[%s10445_s3 + $0x6c] ss:$16 sps:$4 sm:$0xff]  }
 0x289   :  { %2578 = vmatmul.mubr.bf16.vlgmr.msra.gmra.mrb[60].mxu1 %v9731_v16  ;;  %v9972_v16 = vld [vmem:[%s10118_s6 + $0x60] sm:$0xff]   ;;  %v9973_v19 = vld [vmem:[%s10118_s6 + $0x68] sm:$0xff]   ;;  %v9974_v34 = vld [vmem:[%s10118_s6 + $0x70] sm:$0xff]  }
 0x28a   :  { %2585 = vmatprep.mubr.bf16.mxu1 %v9736_v28  ;;  %8833 = vmatpush3.bf16.msra.mxu1 %v9959_v38  ;;  %v9975_v25 = vld [vmem:[%s10118_s6 + $0x78] sm:$0xff]   ;;  %v10626_v28 = vld [vmem:[%s10118_s6 + $0xc0] sm:$0xff]  }
 0x28b   :  { %v8734_v23 = vpop.f32.mrb[32].mxu0  ;;  %8834 = vmatprep.subr.bf16.mxu1 %v9960_v27 }
 0x28c   :  { %v1899_v48 = vpop.f32.mrb[33].mxu0 }
 0x28d   :  { %v8735_v24 = vpop.f32.mrb[34].mxu0 }
 0x28e   :  { %v1917_v4 = vpack.c.bf16 %v8735_v24, %v8734_v23  ;;  %v1902_v1 = vpop.f32.mrb[35].mxu0  ;;  %8835 = vmatpush3.bf16.msra.mxu1 %v9960_v27 }
 0x28f   :  { %v1916_v14 = vpack.c.bf16 %v1902_v1, %v1899_v48  ;;  %8836 = vmatprep.subr.bf16.mxu1 %v9961_v6 }
 0x291   :  { %2586 = vmatmul.mubr.bf16.gmra.mrb[64].mxu1 %v9738_v49 }
 0x292   :  { %2593 = vmatprep.mubr.bf16.mxu1 %v9739_v3  ;;  %8837 = vmatpush3.bf16.msra.mxu1 %v9961_v6 }
 0x293   :  { %8838 = vmatprep.subr.bf16.mxu1 %v9962_v54 }
 0x296   :  { %8839 = vmatpush3.bf16.msra.mxu1 %v9962_v54 }
 0x297   :  { %8840 = vmatprep.subr.bf16.mxu1 %v9963_v40 }
 0x299   :  { %2594 = vmatmul.mubr.bf16.gmra.mrb[68].mxu1 %v9741_v30 }
 0x29a   :  { %2601 = vmatprep.mubr.bf16.mxu1 %v9742_v62  ;;  %8841 = vmatpush3.bf16.msra.mxu1 %v9963_v40 }
 0x29b   :  { %8842 = vmatprep.subr.bf16.mxu1 %v9964_v7 }
 0x29e   :  { %8843 = vmatpush3.bf16.msra.mxu1 %v9964_v7 }
 0x29f   :  { %8844 = vmatprep.subr.bf16.mxu1 %v9965_v29 }
 0x2a1   :  { %2602 = vmatmul.mubr.bf16.gmra.mrb[72].mxu1 %v9744_v52 }
 0x2a2   :  { %8845 = vmatpush3.bf16.msra.mxu1 %v9965_v29 }
 0x2a3   :  { %v8778_v57 = vpop.f32.mrb[36].mxu0  ;;  %8846 = vmatprep.subr.bf16.mxu1 %v9966_v42 }
 0x2a4   :  { %v2151_v46 = vpop.f32.mrb[37].mxu0 }
 0x2a5   :  { %v8779_v56 = vpop.f32.mrb[38].mxu0 }
 0x2a6   :  { %v2183_v41 = vpack.c.bf16 %v8779_v56, %v8778_v57  ;;  %v2154_v22 = vpop.f32.mrb[39].mxu0  ;;  %8847 = vmatpush3.bf16.msra.mxu1 %v9966_v42 }
 0x2a7   :  { %v2182_v63 = vpack.c.bf16 %v2154_v22, %v2151_v46  ;;  %8880 = vmatprep.subr.bf16.mxu1 %v10580_v2 }
 0x2a9   :  { %7924 = vmatprep.subr.bf16.mxu0 %v2182_v63 }
 0x2aa   :  { %7925 = vmatpush3.bf16.msra.mxu0 %v1914_v36 }
 0x2ab   :  { %v8782_v59 = vpop.f32.mrb[40].mxu0  ;;  %7926 = vmatprep.subr.bf16.mxu0 %v2183_v41 }
 0x2ac   :  { %v2167_v15 = vpop.f32.mrb[41].mxu0 }
 0x2ad   :  { %v8783_v61 = vpop.f32.mrb[42].mxu0 }
 0x2ae   :  { %v2185_v0 = vpack.c.bf16 %v8783_v61, %v8782_v59  ;;  %v2170_v51 = vpop.f32.mrb[43].mxu0  ;;  %7927 = vmatpush3.bf16.msra.mxu0 %v1915_v33  ;;  %v9756_v33 = vld [vmem:[%s10445_s3 + $0x68] ss:$16 sps:$4 sm:$0xff]  }
 0x2af   :  { %v2184_v35 = vpack.c.bf16 %v2170_v51, %v2167_v15 }
 0x2b1   :  { %7928 = vmatprep.subr.bf16.mxu0 %v2184_v35 }
 0x2b2   :  { %7929 = vmatpush3.bf16.msra.mxu0 %v1916_v14 }
 0x2b3   :  { %7930 = vmatprep.subr.bf16.mxu0 %v2185_v0 }
 0x2b6   :  { %7931 = vmatpush3.bf16.msra.mxu0 %v1917_v4 }
 0x2b7   :  { %7932 = vmatprep.subr.bf16.mxu0 %v11327_v10 }
 0x2ba   :  { %7933 = vmatpush3.bf16.msra.mxu0 %v11328_v9 }
 0x2bb   :  { %7934 = vmatprep.subr.bf16.mxu0 %v11329_v11 }
 0x2be   :  { %7935 = vmatpush3.bf16.msra.mxu0 %v11330_v12 }
 0x2bf   :  { %7936 = vmatprep.subr.bf16.mxu0 %v11331_v18 }
 0x2c2   :  { %7937 = vmatpush3.bf16.msra.mxu0 %v11332_v17 }
 0x2c3   :  { %7938 = vmatprep.subr.bf16.mxu0 %v11334_v55  ;;  %v8826_v36 = vpop.f32.mrb[44].mxu0 }
 0x2c4   :  { %v2434_v38 = vpop.f32.mrb[45].mxu0 }
 0x2c5   :  { %v8827_v23 = vpop.f32.mrb[46].mxu0 }
 0x2c6   :  { %7939 = vmatpush3.bf16.msra.mxu0 %v11337_v21  ;;  %v2437_v27 = vpop.f32.mrb[47].mxu0 }
 0x2c7   :  { %8856 = vmatprep.subr.bf16.mxu0 %v9968_v53 }
 0x2c9   :  { %2643 = vmatmul.mubr.bf16.vlgmr.msra.gmra.mrb[52].mxu0 %v9745_v43 }
 0x2ca   :  { %2650 = vmatprep.mubr.bf16.mxu0 %v9748_v47  ;;  %8857 = vmatpush3.bf16.msra.mxu0 %v9968_v53 }
 0x2cb   :  { %8858 = vmatprep.subr.bf16.mxu0 %v9969_v5  ;;  %v8830_v48 = vpop.f32.mrb[48].mxu0 }
 0x2cc   :  { %v2450_v24 = vpop.f32.mrb[49].mxu0 }
 0x2cd   :  { %v8831_v49 = vpop.f32.mrb[50].mxu0 }
 0x2ce   :  { %8859 = vmatpush3.bf16.msra.mxu0 %v9969_v5  ;;  %v2453_v4 = vpop.f32.mrb[51].mxu0 }
 0x2cf   :  { %8860 = vmatprep.subr.bf16.mxu0 %v9970_v26 }
 0x2d1   :  { %2651 = vmatmul.mubr.bf16.gmra.mrb[56].mxu0 %v9750_v8  ;;  %v7300_v8 = vld [vmem:[%s6911_s13] ss:$0 sm:$0xff] }
 0x2d2   :  { %2658 = vmatprep.mubr.bf16.mxu0 %v9751_v58  ;;  %8861 = vmatpush3.bf16.msra.mxu0 %v9970_v26 }
 0x2d3   :  { %8862 = vmatprep.subr.bf16.mxu0 %v9971_v60 }
 0x2d6   :  { %8863 = vmatpush3.bf16.msra.mxu0 %v9971_v60 }
 0x2d7   :  { %8864 = vmatprep.subr.bf16.mxu0 %v9972_v16 }
 0x2d9   :  { %2659 = vmatmul.mubr.bf16.gmra.mrb[60].mxu0 %v9753_v31 }
 0x2da   :  { %2666 = vmatprep.mubr.bf16.mxu0 %v9754_v32  ;;  %8865 = vmatpush3.bf16.msra.mxu0 %v9972_v16 }
 0x2db   :  { %8866 = vmatprep.subr.bf16.mxu0 %v9973_v19 }
 0x2de   :  { %8867 = vmatpush3.bf16.msra.mxu0 %v9973_v19 }
 0x2df   :  { %8868 = vmatprep.subr.bf16.mxu0 %v9974_v34 }
 0x2e1   :  { %2667 = vmatmul.mubr.bf16.gmra.mrb[64].mxu0 %v9756_v33 }
 0x2e2   :  { %8869 = vmatpush3.bf16.msra.mxu0 %v9974_v34 }
 0x2e3   :  { %8870 = vmatprep.subr.bf16.mxu0 %v9975_v25 }
 0x2e6   :  { %8871 = vmatpush3.bf16.msra.mxu0 %v9975_v25 }
 0x2e7   :  { %8904 = vmatprep.subr.bf16.mxu0 %v10626_v28 }
 0x35c   :  { %v7900_v1 = vpop.f32.mrb[60].mxu1 }
 0x35d   :  { %v7901_v3 = vpop.f32.mrb[61].mxu1 }
 0x35e   :  { %v7902_v14 = vadd.f32 %v7901_v3, %v7900_v1  ;;  %v7903_v6 = vpop.f32.mrb[62].mxu1 }
 0x35f   :  { %v7904_v54 = vpop.f32.mrb[63].mxu1 }
 0x360   :  { %v7905_v30 = vadd.f32 %v7904_v54, %v7903_v6  ;;  %v2580_v62 = vadd.f32 %v7902_v14, %v2434_v38 }
 0x362   :  { %v2583_v40 = vadd.f32 %v7905_v30, %v2437_v27 }
 0x364   :  { %v7906_v7 = vpop.f32.mrb[64].mxu1 }
 0x365   :  { %v7907_v52 = vpop.f32.mrb[65].mxu1 }
 0x366   :  { %v7908_v29 = vadd.f32 %v7907_v52, %v7906_v7  ;;  %v7909_v57 = vpop.f32.mrb[66].mxu1 }
 0x367   :  { %v7910_v42 = vpop.f32.mrb[67].mxu1 }
 0x368   :  { %v2588_v46 = vadd.f32 %v8826_v36, %v7908_v29  ;;  %v7911_v56 = vadd.f32 %v7910_v42, %v7909_v57 }
 0x36a   :  { %v2591_v41 = vadd.f32 %v8827_v23, %v7911_v56 }
 0x36c   :  { %v7912_v22 = vpop.f32.mrb[68].mxu1 }
 0x36d   :  { %v7913_v63 = vpop.f32.mrb[69].mxu1 }
 0x36e   :  { %v7914_v59 = vadd.f32 %v7913_v63, %v7912_v22  ;;  %v7915_v15 = vpop.f32.mrb[70].mxu1 }
 0x36f   :  { %v7916_v61 = vpop.f32.mrb[71].mxu1 }
 0x370   :  { %v7917_v0 = vadd.f32 %v7916_v61, %v7915_v15  ;;  %v2596_v51 = vadd.f32 %v7914_v59, %v2450_v24 }
 0x372   :  { %v2599_v35 = vadd.f32 %v7917_v0, %v2453_v4 }
 0x374   :  { %v7918_v10 = vpop.f32.mrb[72].mxu1 }
 0x375   :  { %v7919_v9 = vpop.f32.mrb[73].mxu1 }
 0x376   :  { %v7920_v11 = vadd.f32 %v7919_v9, %v7918_v10  ;;  %v7921_v12 = vpop.f32.mrb[74].mxu1 }
 0x377   :  { %v7922_v18 = vpop.f32.mrb[75].mxu1 }
 0x378   :  { %v2604_v17 = vadd.f32 %v8830_v48, %v7920_v11  ;;  %v7923_v50 = vadd.f32 %v7922_v18, %v7921_v12 }
 0x37a   :  { %v2607_v55 = vadd.f32 %v8831_v49, %v7923_v50 }
 0x39c   :  { %v7940_v43 = vpop.f32.mrb[52].mxu0 }
 0x39d   :  { %v7941_v44 = vpop.f32.mrb[53].mxu0 }
 0x39e   :  { %v7942_v45 = vadd.f32 %v7941_v44, %v7940_v43  ;;  %v7943_v21 = vpop.f32.mrb[54].mxu0 }
 0x39f   :  { %v7944_v47 = vpop.f32.mrb[55].mxu0 }
 0x3a0   :  { %v2645_v53 = vadd.f32 %v7942_v45, %v2580_v62  ;;  %v7945_v5 = vadd.f32 %v7944_v47, %v7943_v21 }
 0x3a2   :  { %v2648_v58 = vadd.f32 %v7945_v5, %v2583_v40  ;;  %v2682_v26 = vadd.f32 %v7300_v8, %v2645_v53 }
 0x3a4   :  { %v2683_v60 = vadd.f32 %v7300_v8, %v2648_v58  ;;  %v7946_v31 = vpop.f32.mrb[56].mxu0 }
 0x3a5   :  { %v7947_v32 = vpop.f32.mrb[57].mxu0 }
 0x3a6   :  { %v2692_v16 = vadd.f32 %v2683_v60, %v2682_v26  ;;  %v7948_v19 = vadd.f32 %v7947_v32, %v7946_v31  ;;  %v7949_v33 = vpop.f32.mrb[58].mxu0 }
 0x3a7   :  { %v7950_v34 = vpop.f32.mrb[59].mxu0 }
 0x3a8   :  { %v2653_v25 = vadd.f32 %v7948_v19, %v2588_v46  ;;  %v7951_v36 = vadd.f32 %v7950_v34, %v7949_v33 }
 0x3aa   :  { %v2684_v38 = vadd.f32 %v7300_v8, %v2653_v25  ;;  %v2656_v23 = vadd.f32 %v7951_v36, %v2591_v41 }
 0x3ac   :  { %v2693_v27 = vadd.f32 %v2692_v16, %v2684_v38  ;;  %v2685_v48 = vadd.f32 %v7300_v8, %v2656_v23  ;;  %v7952_v24 = vpop.f32.mrb[60].mxu0 }
 0x3ad   :  { %v7953_v49 = vpop.f32.mrb[61].mxu0 }
 0x3ae   :  { %v2694_v4 = vadd.f32 %v2693_v27, %v2685_v48  ;;  %v7954_v1 = vadd.f32 %v7953_v49, %v7952_v24  ;;  %v7955_v3 = vpop.f32.mrb[62].mxu0 }
 0x3af   :  { %v7956_v14 = vpop.f32.mrb[63].mxu0 }
 0x3b0   :  { %v2661_v6 = vadd.f32 %v7954_v1, %v2596_v51  ;;  %v7957_v54 = vadd.f32 %v7956_v14, %v7955_v3 }
 0x3b2   :  { %v2686_v30 = vadd.f32 %v7300_v8, %v2661_v6  ;;  %v2664_v62 = vadd.f32 %v7957_v54, %v2599_v35  ;;  %v7301_v6 = vld [vmem:[%s6912_s17] ss:$0 sm:$0xff] }
 0x3b4   :  { %v2695_v40 = vadd.f32 %v2694_v4, %v2686_v30  ;;  %v2687_v7 = vadd.f32 %v7300_v8, %v2664_v62  ;;  %v7958_v52 = vpop.f32.mrb[64].mxu0 }
 0x3b5   :  { %v7959_v29 = vpop.f32.mrb[65].mxu0 }
 0x3b6   :  { %v2696_v57 = vadd.f32 %v2695_v40, %v2687_v7  ;;  %v7960_v42 = vadd.f32 %v7959_v29, %v7958_v52  ;;  %v7961_v46 = vpop.f32.mrb[66].mxu0 }
 0x3b7   :  { %v7962_v56 = vpop.f32.mrb[67].mxu0 }
 0x3b8   :  { %v2669_v41 = vadd.f32 %v7960_v42, %v2604_v17  ;;  %v7963_v22 = vadd.f32 %v7962_v56, %v7961_v46 }
 0x3ba   :  { %v2688_v63 = vadd.f32 %v7300_v8, %v2669_v41  ;;  %v2672_v59 = vadd.f32 %v7963_v22, %v2607_v55 }
 0x3bc   :  { %v2697_v15 = vadd.f32 %v2696_v57, %v2688_v63  ;;  %v2689_v61 = vadd.f32 %v7300_v8, %v2672_v59 }
 0x3be   :  { %v2698_v0 = vadd.f32 %v2697_v15, %v2689_v61 }
 0x3c0   :  { %v2699_v10 = vrot.slane %v2698_v0, 4 }
 0x3c2   :  { %v2700_v51 = vadd.f32 %v2699_v10, %v2698_v0 }
 0x3c4   :  { %v2701_v9 = vrot.slane %v2700_v51, 2 }
 0x3c6   :  { %v2702_v11 = vadd.f32 %v2701_v9, %v2700_v51 }
 0x3c8   :  { %v2703_v35 = vrot.slane %v2702_v11, 1 }
 0x3ca   :  { %v2704_v12 = vadd.f32 %v2703_v35, %v2702_v11 }
 0x3cc   :  { %v2706_v18 = vmul.f32 0.015625, %v2704_v12 }
 0x3ce   :  { %v2707_v50 = vsub.f32 %v2682_v26, %v2706_v18  ;;  %v2708_v43 = vsub.f32 %v2683_v60, %v2706_v18  ;;  %v2709_v44 = vsub.f32 %v2684_v38, %v2706_v18  ;;  %v2710_v45 = vsub.f32 %v2685_v48, %v2706_v18 }
 0x3cf   :  { %v2711_v21 = vsub.f32 %v2686_v30, %v2706_v18  ;;  %v2712_v47 = vsub.f32 %v2687_v7, %v2706_v18  ;;  %v2713_v17 = vsub.f32 %v2688_v63, %v2706_v18  ;;  %v2714_v53 = vsub.f32 %v2689_v61, %v2706_v18  ;;  %v7302_v7 = vld [vmem:[%s6913_s21] ss:$0 sm:$0xff] }
 0x3d0   :  { %v2715_v5 = vmul.f32 %v2707_v50, %v2707_v50  ;;  %v2716_v55 = vmul.f32 %v2708_v43, %v2708_v43  ;;  %v2717_v58 = vmul.f32 %v2709_v44, %v2709_v44  ;;  %v2718_v31 = vmul.f32 %v2710_v45, %v2710_v45 }
 0x3d1   :  { %v2719_v16 = vmul.f32 %v2711_v21, %v2711_v21  ;;  %v2720_v33 = vmul.f32 %v2712_v47, %v2712_v47  ;;  %v2721_v25 = vmul.f32 %v2713_v17, %v2713_v17  ;;  %v2722_v26 = vmul.f32 %v2714_v53, %v2714_v53 }
 0x3d2   :  { %v2723_v8 = vadd.f32 %v2716_v55, %v2715_v5 }
 0x3d4   :  { %v2724_v32 = vadd.f32 %v2723_v8, %v2717_v58 }
 0x3d6   :  { %v2725_v19 = vadd.f32 %v2724_v32, %v2718_v31  ;;  %v9977_v31 = vld [vmem:[%s10118_s6 + $0x88] sm:$0xff]  }
 0x3d7   :  { %v9978_v32 = vld [vmem:[%s10118_s6 + $0xc8] sm:$0xff]  }
 0x3d8   :  { %v2726_v34 = vadd.f32 %v2725_v19, %v2719_v16  ;;  %v9979_v16 = vld [vmem:[%s10118_s6 + $0x90] sm:$0xff]  }
 0x3d9   :  { %v9980_v19 = vld [vmem:[%s10118_s6 + $0xd0] sm:$0xff]  }
 0x3da   :  { %v2727_v36 = vadd.f32 %v2726_v34, %v2720_v33  ;;  %v9983_v33 = vld [vmem:[%s10118_s6 + $0xa0] sm:$0xff]  }
 0x3db   :  { %v9984_v34 = vld [vmem:[%s10118_s6 + $0xe0] sm:$0xff]  }
 0x3dc   :  { %v2728_v60 = vadd.f32 %v2727_v36, %v2721_v25  ;;  %v9985_v25 = vld [vmem:[%s10118_s6 + $0xa8] sm:$0xff]  }
 0x3dd   :  { %v9986_v36 = vld [vmem:[%s10118_s6 + $0xe8] sm:$0xff]  }
 0x3de   :  { %v2729_v38 = vadd.f32 %v2728_v60, %v2722_v26  ;;  %v9987_v26 = vld [vmem:[%s10118_s6 + $0xb0] sm:$0xff]  }
 0x3df   :  { %v9988_v60 = vld [vmem:[%s10118_s6 + $0xf0] sm:$0xff]  }
 0x3e0   :  { %v2730_v23 = vrot.slane %v2729_v38, 4 }
 0x3e2   :  { %v2731_v27 = vadd.f32 %v2730_v23, %v2729_v38  ;;  %v9989_v38 = vld [vmem:[%s10118_s6 + $0xb8] sm:$0xff]  }
 0x3e3   :  { %v9990_v23 = vld [vmem:[%s10118_s6 + $0xf8] sm:$0xff]  }
 0x3e4   :  { %v2732_v48 = vrot.slane %v2731_v27, 2 }
 0x3e6   :  { %v2733_v24 = vadd.f32 %v2732_v48, %v2731_v27  ;;  %v9991_v27 = vld [vmem:[%s10118_s6 + $0x100] sm:$0xff]  }
 0x3e7   :  { %v9992_v48 = vld [vmem:[%s10118_s6 + $0x140] sm:$0xff]  }
 0x3e8   :  { %v2734_v49 = vrot.slane %v2733_v24, 1 }
 0x3ea   :  { %v2735_v4 = vadd.f32 %v2734_v49, %v2733_v24  ;;  %v9993_v24 = vld [vmem:[%s10118_s6 + $0x108] sm:$0xff]  }
 0x3eb   :  { %v9994_v49 = vld [vmem:[%s10118_s6 + $0x148] sm:$0xff]  }
 0x3ec   :  { %v2736_v1 = vmul.f32 0.015625, %v2735_v4  ;;  %v9995_v4 = vld [vmem:[%s10118_s6 + $0x110] sm:$0xff]  }
 0x3ee   :  { %v2737_v3 = vadd.f32 1e-05, %v2736_v1  ;;  %v9996_v1 = vld [vmem:[%s10118_s6 + $0x150] sm:$0xff]  }
 0x3f0   :  { %9949 = vrsqrt.f32 %v2737_v3  ;;  %v9997_v3 = vld [vmem:[%s10118_s6 + $0x118] sm:$0xff]  }
 0x3fa   :  { %v9950_v14 = vpop.eup %9949 }
 0x3fb   :  { %v2739_v54 = vmul.f32 %v9950_v14, %v2707_v50  ;;  %v2740_v30 = vmul.f32 %v9950_v14, %v2708_v43  ;;  %v2741_v62 = vmul.f32 %v9950_v14, %v2709_v44  ;;  %v2742_v40 = vmul.f32 %v9950_v14, %v2710_v45 }
 0x3fc   :  { %v2743_v52 = vmul.f32 %v9950_v14, %v2711_v21  ;;  %v2744_v29 = vmul.f32 %v9950_v14, %v2712_v47  ;;  %v2745_v57 = vmul.f32 %v9950_v14, %v2713_v17  ;;  %v2746_v42 = vmul.f32 %v9950_v14, %v2714_v53  ;;  %v9998_v14 = vld [vmem:[%s10118_s6 + $0x158] sm:$0xff]  }
 0x3fd   :  { %v2753_v46 = vmul.f32 %v7301_v6, %v2739_v54  ;;  %v2754_v56 = vmul.f32 %v7301_v6, %v2740_v30  ;;  %v2755_v41 = vmul.f32 %v7301_v6, %v2741_v62  ;;  %v2756_v22 = vmul.f32 %v7301_v6, %v2742_v40  ;;  %v10000_v54 = vld [vmem:[%s10118_s6 + $0x160] sm:$0xff]   ;;  %v10001_v30 = vld [vmem:[%s10118_s6 + $0x128] sm:$0xff]   ;;  %v10003_v40 = vld [vmem:[%s10118_s6 + $0x130] sm:$0xff]  }
 0x3fe   :  { %v2757_v63 = vmul.f32 %v7301_v6, %v2743_v52  ;;  %v2758_v59 = vmul.f32 %v7301_v6, %v2744_v29  ;;  %v2759_v15 = vmul.f32 %v7301_v6, %v2745_v57  ;;  %v2760_v61 = vmul.f32 %v7301_v6, %v2746_v42  ;;  %v9999_v6 = vld [vmem:[%s10118_s6 + $0x120] sm:$0xff]   ;;  %v10002_v62 = vld [vmem:[%s10118_s6 + $0x168] sm:$0xff]   ;;  %v10005_v52 = vld [vmem:[%s10118_s6 + $0x138] sm:$0xff]  }
 0x3ff   :  { %v2767_v0 = vadd.f32 %v7302_v7, %v2753_v46  ;;  %v2768_v10 = vadd.f32 %v7302_v7, %v2754_v56  ;;  %v2769_v51 = vadd.f32 %v7302_v7, %v2755_v41  ;;  %v2770_v9 = vadd.f32 %v7302_v7, %v2756_v22  ;;  %v10006_v29 = vld [vmem:[%s10118_s6 + $0x178] sm:$0xff]   ;;  %v10007_v57 = vld [vmem:[%s10118_s6 + $0x180] sm:$0xff]   ;;  %v10008_v42 = vld [vmem:[%s10118_s6 + $0x188] sm:$0xff]  }
 0x400   :  { %v2771_v11 = vadd.f32 %v7302_v7, %v2757_v63  ;;  %v2772_v35 = vadd.f32 %v7302_v7, %v2758_v59  ;;  %v2773_v12 = vadd.f32 %v7302_v7, %v2759_v15  ;;  %v2774_v18 = vadd.f32 %v7302_v7, %v2760_v61  ;;  %v10004_v7 = vld [vmem:[%s10118_s6 + $0x170] sm:$0xff]   ;;  %v10010_v56 = vld [vmem:[%s10118_s6 + $0x198] sm:$0xff]   ;;  %v10011_v41 = vld [vmem:[%s10118_s6 + $0x1a0] sm:$0xff]  }
 0x401   :  { %v2775_v50 = vmax.f32 %v2767_v0, 0.0  ;;  %v2776_v43 = vmax.f32 %v2768_v10, 0.0  ;;  %v2777_v44 = vmax.f32 %v2769_v51, 0.0  ;;  %v2778_v45 = vmax.f32 %v2770_v9, 0.0  ;;  %v10009_v46 = vld [vmem:[%s10118_s6 + $0x190] sm:$0xff]   ;;  %v10012_v22 = vld [vmem:[%s10118_s6 + $0x1a8] sm:$0xff]  }
 0x402   :  { %v2779_v21 = vmax.f32 %v2771_v11, 0.0  ;;  %v2780_v47 = vmax.f32 %v2772_v35, 0.0  ;;  %v2781_v17 = vmax.f32 %v2773_v12, 0.0  ;;  %v2782_v53 = vmax.f32 %v2774_v18, 0.0  ;;  %v10013_v63 = vld [vmem:[%s10118_s6 + $0x1b0] sm:$0xff]   ;;  %v10014_v59 = vld [vmem:[%s10118_s6 + $0x1b8] sm:$0xff]  }
 0x403   :  { %v10638_v5 = vpack.c.bf16 %v2776_v43, %v2775_v50  ;;  %v10640_v55 = vpack.c.bf16 %v2778_v45, %v2777_v44  ;;  %v11338_v15 = vmov 0   ;;  %v9759_v61 = vld [vmem:[%s10718_s26 + $0x4] ss:$16 sps:$4 sm:$0xff]   ;;  %v9764_v0 = vld [vmem:[%s10718_s26 + $0xc] ss:$16 sps:$4 sm:$0xff]  }
 0x404   :  { %v10642_v58 = vpack.c.bf16 %v2780_v47, %v2779_v21  ;;  %v10644_v8 = vpack.c.bf16 %v2782_v53, %v2781_v17 }
 0x405   :  { %8848 = vmatprep.mubr.bf16.mxu1 %v10638_v5  ;;  %8872 = vmatprep.mubr.bf16.mxu0 %v10638_v5 }
 0x406   :  { %8849 = vmatmul.mubr.bf16.vlgmr.msra.gmra.mrb[76].mxu1 %v10640_v55  ;;  %8873 = vmatmul.mubr.bf16.vlgmr.msra.gmra.mrb[68].mxu0 %v10640_v55 }
 0x407   :  { %8881 = vmatpush3.bf16.msra.mxu1 %v10580_v2  ;;  %8905 = vmatpush3.bf16.msra.mxu0 %v10626_v28  ;;  %v9981_v2 = vld [vmem:[%s10118_s6 + $0x98] sm:$0xff]  }
 0x408   :  { %8852 = vmatprep.mubr.bf16.mxu1 %v10642_v58  ;;  %8876 = vmatprep.mubr.bf16.mxu0 %v10642_v58  ;;  %v9982_v28 = vld [vmem:[%s10118_s6 + $0xd8] sm:$0xff]   ;;  %s10088_s6 = smov 19  }
 0x409   :  { %8882 = vmatprep.subr.bf16.mxu1 %v9977_v31  ;;  %8906 = vmatprep.subr.bf16.mxu0 %v9978_v32  ;;  %s10742_s29 = sld [smem:[%s11306_s0 + %s10088_s6]]  }
 0x40a   :  { %s6907_s6 = sld [smem:[%s11306_s0 + %s10094_s22]]   ;;  %s10101_s22 = smov 31  }
 0x40b   :  { %8883 = vmatpush3.bf16.msra.mxu1 %v9977_v31  ;;  %8907 = vmatpush3.bf16.msra.mxu0 %v9978_v32 }
 0x40c   :  { %8884 = vmatprep.subr.bf16.mxu1 %v9979_v16  ;;  %8908 = vmatprep.subr.bf16.mxu0 %v9980_v19 }
 0x40e   :  { %8853 = vmatmul.mubr.bf16.gmra.mrb[80].mxu1 %v10644_v8  ;;  %8877 = vmatmul.mubr.bf16.gmra.mrb[72].mxu0 %v10644_v8 }
 0x40f   :  { %8885 = vmatpush3.bf16.msra.mxu1 %v9979_v16  ;;  %8909 = vmatpush3.bf16.msra.mxu0 %v9980_v19 }
 0x410   :  { %8896 = vmatprep.mubr.bf16.mxu1 %v10638_v5  ;;  %8920 = vmatprep.mubr.bf16.mxu0 %v10638_v5 }
 0x411   :  { %8886 = vmatprep.subr.bf16.mxu1 %v9981_v2  ;;  %8910 = vmatprep.subr.bf16.mxu0 %v9982_v28 }
 0x413   :  { %8887 = vmatpush3.bf16.msra.mxu1 %v9981_v2  ;;  %8911 = vmatpush3.bf16.msra.mxu0 %v9982_v28 }
 0x414   :  { %8888 = vmatprep.subr.bf16.mxu1 %v9983_v33  ;;  %8912 = vmatprep.subr.bf16.mxu0 %v9984_v34 }
 0x417   :  { %8889 = vmatpush3.bf16.msra.mxu1 %v9983_v33  ;;  %8913 = vmatpush3.bf16.msra.mxu0 %v9984_v34 }
 0x418   :  { %8890 = vmatprep.subr.bf16.mxu1 %v9985_v25  ;;  %8914 = vmatprep.subr.bf16.mxu0 %v9986_v36 }
 0x41b   :  { %8891 = vmatpush3.bf16.msra.mxu1 %v9985_v25  ;;  %8915 = vmatpush3.bf16.msra.mxu0 %v9986_v36 }
 0x41c   :  { %8892 = vmatprep.subr.bf16.mxu1 %v9987_v26  ;;  %8916 = vmatprep.subr.bf16.mxu0 %v9988_v60 }
 0x41f   :  { %8893 = vmatpush3.bf16.msra.mxu1 %v9987_v26  ;;  %8917 = vmatpush3.bf16.msra.mxu0 %v9988_v60 }
 0x420   :  { %8894 = vmatprep.subr.bf16.mxu1 %v9989_v38  ;;  %8918 = vmatprep.subr.bf16.mxu0 %v9990_v23 }
 0x423   :  { %8895 = vmatpush3.bf16.msra.mxu1 %v9989_v38  ;;  %8919 = vmatpush3.bf16.msra.mxu0 %v9990_v23 }
 0x424   :  { %8928 = vmatprep.subr.bf16.mxu1 %v9991_v27  ;;  %8952 = vmatprep.subr.bf16.mxu0 %v9992_v48 }
 0x426   :  { %8897 = vmatmul.mubr.bf16.vlgmr.msra.gmra.mrb[84].mxu1 %v10640_v55  ;;  %8921 = vmatmul.mubr.bf16.vlgmr.msra.gmra.mrb[76].mxu0 %v10640_v55 }
 0x427   :  { %8900 = vmatprep.mubr.bf16.mxu1 %v10642_v58  ;;  %8924 = vmatprep.mubr.bf16.mxu0 %v10642_v58 }
 0x428   :  { %8929 = vmatpush3.bf16.msra.mxu1 %v9991_v27  ;;  %8953 = vmatpush3.bf16.msra.mxu0 %v9992_v48 }
 0x429   :  { %8930 = vmatprep.subr.bf16.mxu1 %v9993_v24  ;;  %8954 = vmatprep.subr.bf16.mxu0 %v9994_v49 }
 0x42c   :  { %8931 = vmatpush3.bf16.msra.mxu1 %v9993_v24  ;;  %8955 = vmatpush3.bf16.msra.mxu0 %v9994_v49 }
 0x42d   :  { %8932 = vmatprep.subr.bf16.mxu1 %v9995_v4  ;;  %8956 = vmatprep.subr.bf16.mxu0 %v9996_v1 }
 0x42e   :  { %8901 = vmatmul.mubr.bf16.gmra.mrb[88].mxu1 %v10644_v8  ;;  %8925 = vmatmul.mubr.bf16.gmra.mrb[80].mxu0 %v10644_v8 }
 0x42f   :  { %8944 = vmatprep.mubr.bf16.mxu1 %v10638_v5  ;;  %8968 = vmatprep.mubr.bf16.mxu0 %v10638_v5 }
 0x430   :  { %8933 = vmatpush3.bf16.msra.mxu1 %v9995_v4  ;;  %8957 = vmatpush3.bf16.msra.mxu0 %v9996_v1 }
 0x431   :  { %8934 = vmatprep.subr.bf16.mxu1 %v9997_v3  ;;  %8958 = vmatprep.subr.bf16.mxu0 %v9998_v14 }
 0x434   :  { %8935 = vmatpush3.bf16.msra.mxu1 %v9997_v3  ;;  %8959 = vmatpush3.bf16.msra.mxu0 %v9998_v14 }
 0x435   :  { %8936 = vmatprep.subr.bf16.mxu1 %v9999_v6  ;;  %8960 = vmatprep.subr.bf16.mxu0 %v10000_v54 }
 0x438   :  { %8937 = vmatpush3.bf16.msra.mxu1 %v9999_v6  ;;  %8961 = vmatpush3.bf16.msra.mxu0 %v10000_v54 }
 0x439   :  { %8938 = vmatprep.subr.bf16.mxu1 %v10001_v30  ;;  %8962 = vmatprep.subr.bf16.mxu0 %v10002_v62 }
 0x43c   :  { %8939 = vmatpush3.bf16.msra.mxu1 %v10001_v30  ;;  %8963 = vmatpush3.bf16.msra.mxu0 %v10002_v62 }
 0x43d   :  { %8940 = vmatprep.subr.bf16.mxu1 %v10003_v40  ;;  %8964 = vmatprep.subr.bf16.mxu0 %v10004_v7 }
 0x440   :  { %8941 = vmatpush3.bf16.msra.mxu1 %v10003_v40  ;;  %8965 = vmatpush3.bf16.msra.mxu0 %v10004_v7 }
 0x441   :  { %8942 = vmatprep.subr.bf16.mxu1 %v10005_v52  ;;  %8966 = vmatprep.subr.bf16.mxu0 %v10006_v29 }
 0x444   :  { %8943 = vmatpush3.bf16.msra.mxu1 %v10005_v52  ;;  %8967 = vmatpush3.bf16.msra.mxu0 %v10006_v29 }
 0x445   :  { %8976 = vmatprep.subr.bf16.mxu1 %v10007_v57 }
 0x447   :  { %8945 = vmatmul.mubr.bf16.vlgmr.msra.gmra.mrb[92].mxu1 %v10640_v55  ;;  %8969 = vmatmul.mubr.bf16.vlgmr.msra.gmra.mrb[84].mxu0 %v10640_v55 }
 0x448   :  { %8948 = vmatprep.mubr.bf16.mxu1 %v10642_v58  ;;  %8972 = vmatprep.mubr.bf16.mxu0 %v10642_v58 }
 0x449   :  { %8977 = vmatpush3.bf16.msra.mxu1 %v10007_v57 }
 0x44a   :  { %8978 = vmatprep.subr.bf16.mxu1 %v10008_v42 }
 0x44d   :  { %8979 = vmatpush3.bf16.msra.mxu1 %v10008_v42 }
 0x44e   :  { %8980 = vmatprep.subr.bf16.mxu1 %v10009_v46 }
 0x44f   :  { %8949 = vmatmul.mubr.bf16.gmra.mrb[96].mxu1 %v10644_v8  ;;  %8973 = vmatmul.mubr.bf16.gmra.mrb[88].mxu0 %v10644_v8 }
 0x450   :  { %8992 = vmatprep.mubr.bf16.mxu1 %v10638_v5  ;;  %3357 = vmatprep.mubr.bf16.mxu0 %v9759_v61 }
 0x451   :  { %8981 = vmatpush3.bf16.msra.mxu1 %v10009_v46 }
 0x452   :  { %8982 = vmatprep.subr.bf16.mxu1 %v10010_v56 }
 0x455   :  { %8983 = vmatpush3.bf16.msra.mxu1 %v10010_v56 }
 0x456   :  { %8984 = vmatprep.subr.bf16.mxu1 %v10011_v41 }
 0x459   :  { %8985 = vmatpush3.bf16.msra.mxu1 %v10011_v41 }
 0x45a   :  { %8986 = vmatprep.subr.bf16.mxu1 %v10012_v22 }
 0x45d   :  { %8987 = vmatpush3.bf16.msra.mxu1 %v10012_v22 }
 0x45e   :  { %8988 = vmatprep.subr.bf16.mxu1 %v10013_v63 }
 0x461   :  { %8989 = vmatpush3.bf16.msra.mxu1 %v10013_v63 }
 0x462   :  { %8990 = vmatprep.subr.bf16.mxu1 %v10014_v59 }
 0x465   :  { %8991 = vmatpush3.bf16.msra.mxu1 %v10014_v59  ;;  %v9757_v59 = vld [vmem:[%s10718_s26] ss:$16 sps:$4 sm:$0xff]  }
 0x466   :  { %3374 = vmatprep.subr.bf16.mxu1 %v11338_v15 }
 0x468   :  { %8993 = vmatmul.mubr.bf16.vlgmr.msra.gmra.mrb[100].mxu1 %v10640_v55 }
 0x469   :  { %8996 = vmatprep.mubr.bf16.mxu1 %v10642_v58 }
 0x470   :  { %8997 = vmatmul.mubr.bf16.gmra.mrb[104].mxu1 %v10644_v8 }
 0x471   :  { %3406 = vmatprep.mubr.bf16.mxu1 %v9764_v0 }
 0x4d9   :  { %v8850_v10 = vpop.f32.mrb[76].mxu1  ;;  %v8874_v51 = vpop.f32.mrb[68].mxu0 }
 0x4da   :  { %v2821_v9 = vpop.f32.mrb[77].mxu1  ;;  %v2890_v11 = vpop.f32.mrb[69].mxu0 }
 0x4db   :  { %v8851_v35 = vpop.f32.mrb[78].mxu1  ;;  %v8875_v12 = vpop.f32.mrb[70].mxu0 }
 0x4dc   :  { %v2853_v18 = vpack.c.bf16 %v8851_v35, %v8850_v10  ;;  %v2922_v50 = vpack.c.bf16 %v8875_v12, %v8874_v51  ;;  %v2824_v43 = vpop.f32.mrb[79].mxu1  ;;  %v2893_v44 = vpop.f32.mrb[71].mxu0  ;;  %v9760_v10 = vld [vmem:[%s10718_s26 + $0x24] ss:$16 sps:$4 sm:$0xff]  }
 0x4dd   :  { %v2852_v45 = vpack.c.bf16 %v2824_v43, %v2821_v9  ;;  %v2921_v21 = vpack.c.bf16 %v2893_v44, %v2890_v11 }
 0x4e1   :  { %v8854_v47 = vpop.f32.mrb[80].mxu1  ;;  %v8878_v17 = vpop.f32.mrb[72].mxu0 }
 0x4e2   :  { %v2837_v53 = vpop.f32.mrb[81].mxu1  ;;  %v2906_v31 = vpop.f32.mrb[73].mxu0 }
 0x4e3   :  { %v8855_v32 = vpop.f32.mrb[82].mxu1  ;;  %v8879_v16 = vpop.f32.mrb[74].mxu0 }
 0x4e4   :  { %v2855_v19 = vpack.c.bf16 %v8855_v32, %v8854_v47  ;;  %v2924_v2 = vpack.c.bf16 %v8879_v16, %v8878_v17  ;;  %v2840_v28 = vpop.f32.mrb[83].mxu1  ;;  %v2909_v33 = vpop.f32.mrb[75].mxu0 }
 0x4e5   :  { %v2854_v34 = vpack.c.bf16 %v2840_v28, %v2837_v53  ;;  %v2923_v25 = vpack.c.bf16 %v2909_v33, %v2906_v31 }
 0x4f9   :  { %v8898_v36 = vpop.f32.mrb[84].mxu1  ;;  %v8922_v26 = vpop.f32.mrb[76].mxu0 }
 0x4fa   :  { %v2959_v60 = vpop.f32.mrb[85].mxu1  ;;  %v3028_v38 = vpop.f32.mrb[77].mxu0 }
 0x4fb   :  { %v8899_v23 = vpop.f32.mrb[86].mxu1  ;;  %v8923_v27 = vpop.f32.mrb[78].mxu0 }
 0x4fc   :  { %v2991_v48 = vpack.c.bf16 %v8899_v23, %v8898_v36  ;;  %v3060_v24 = vpack.c.bf16 %v8923_v27, %v8922_v26  ;;  %v2962_v49 = vpop.f32.mrb[87].mxu1  ;;  %v3031_v4 = vpop.f32.mrb[79].mxu0 }
 0x4fd   :  { %v2990_v1 = vpack.c.bf16 %v2962_v49, %v2959_v60  ;;  %v3059_v3 = vpack.c.bf16 %v3031_v4, %v3028_v38  ;;  %v9762_v49 = vld [vmem:[%s10718_s26 + $0x8] ss:$16 sps:$4 sm:$0xff]   ;;  %v9766_v4 = vld [vmem:[%s10718_s26 + $0x2c] ss:$16 sps:$4 sm:$0xff]  }
 0x4ff   :  { %8048 = vmatprep.subr.bf16.mxu0 %v2990_v1  ;;  %v9768_v1 = vld [vmem:[%s10718_s26 + $0x28] ss:$16 sps:$4 sm:$0xff]  }
 0x500   :  { %8049 = vmatpush3.bf16.msra.mxu0 %v2852_v45 }
 0x501   :  { %v8902_v14 = vpop.f32.mrb[88].mxu1  ;;  %v8926_v6 = vpop.f32.mrb[80].mxu0  ;;  %8050 = vmatprep.subr.bf16.mxu0 %v2991_v48 }
 0x502   :  { %v2975_v54 = vpop.f32.mrb[89].mxu1  ;;  %v3044_v30 = vpop.f32.mrb[81].mxu0 }
 0x503   :  { %v8903_v62 = vpop.f32.mrb[90].mxu1  ;;  %v8927_v40 = vpop.f32.mrb[82].mxu0 }
 0x504   :  { %v2993_v7 = vpack.c.bf16 %v8903_v62, %v8902_v14  ;;  %v3062_v52 = vpack.c.bf16 %v8927_v40, %v8926_v6  ;;  %v2978_v29 = vpop.f32.mrb[91].mxu1  ;;  %v3047_v57 = vpop.f32.mrb[83].mxu0  ;;  %8051 = vmatpush3.bf16.msra.mxu0 %v2853_v18  ;;  %v9770_v14 = vld [vmem:[%s10742_s29 + $0x40] sm:$0xff]   ;;  %v9771_v6 = vld [vmem:[%s10742_s29 + $0x8] sm:$0xff]   ;;  %v9774_v62 = vld [vmem:[%s10742_s29 + $0x50] sm:$0xff]  }
 0x505   :  { %v2992_v42 = vpack.c.bf16 %v2978_v29, %v2975_v54  ;;  %v3061_v46 = vpack.c.bf16 %v3047_v57, %v3044_v30  ;;  %v9772_v54 = vld [vmem:[%s10742_s29 + $0x48] sm:$0xff]   ;;  %v9773_v30 = vld [vmem:[%s10742_s29 + $0x10] sm:$0xff]   ;;  %v9775_v40 = vld [vmem:[%s10742_s29 + $0x18] sm:$0xff]  }
 0x506   :  { %v9778_v29 = vld [vmem:[%s10742_s29 + $0x60] sm:$0xff]   ;;  %v9779_v57 = vld [vmem:[%s10742_s29 + $0x28] sm:$0xff]  }
 0x507   :  { %8052 = vmatprep.subr.bf16.mxu0 %v2992_v42  ;;  %v9780_v42 = vld [vmem:[%s10742_s29 + $0x68] sm:$0xff]  }
 0x508   :  { %8053 = vmatpush3.bf16.msra.mxu0 %v2854_v34 }
 0x509   :  { %8054 = vmatprep.subr.bf16.mxu0 %v2993_v7  ;;  %v9776_v7 = vld [vmem:[%s10742_s29 + $0x58] sm:$0xff]  }
 0x50c   :  { %8055 = vmatpush3.bf16.msra.mxu0 %v2855_v19 }
 0x50d   :  { %8056 = vmatprep.subr.bf16.mxu0 %v3059_v3  ;;  %v9769_v3 = vld [vmem:[%s10742_s29] sm:$0xff]  }
 0x510   :  { %8057 = vmatpush3.bf16.msra.mxu0 %v2921_v21  ;;  %v9765_v21 = vld [vmem:[%s10718_s26 + $0x20] ss:$16 sps:$4 sm:$0xff]  }
 0x511   :  { %8058 = vmatprep.subr.bf16.mxu0 %v3060_v24 }
 0x514   :  { %8059 = vmatpush3.bf16.msra.mxu0 %v2922_v50 }
 0x515   :  { %8060 = vmatprep.subr.bf16.mxu0 %v3061_v46  ;;  %v9781_v46 = vld [vmem:[%s10742_s29 + $0x30] sm:$0xff]  }
 0x518   :  { %8061 = vmatpush3.bf16.msra.mxu0 %v2923_v25 }
 0x519   :  { %8062 = vmatprep.subr.bf16.mxu0 %v3062_v52  ;;  %v9777_v52 = vld [vmem:[%s10742_s29 + $0x20] sm:$0xff]  }
 0x51a   :  { %v8946_v56 = vpop.f32.mrb[92].mxu1  ;;  %v8970_v41 = vpop.f32.mrb[84].mxu0 }
 0x51b   :  { %v3097_v22 = vpop.f32.mrb[93].mxu1  ;;  %v3166_v63 = vpop.f32.mrb[85].mxu0 }
 0x51c   :  { %v8947_v61 = vpop.f32.mrb[94].mxu1  ;;  %v8971_v0 = vpop.f32.mrb[86].mxu0  ;;  %8063 = vmatpush3.bf16.msra.mxu0 %v2924_v2 }
 0x51d   :  { %v3129_v51 = vpack.c.bf16 %v8947_v61, %v8946_v56  ;;  %v3198_v9 = vpack.c.bf16 %v8971_v0, %v8970_v41  ;;  %v3100_v11 = vpop.f32.mrb[95].mxu1  ;;  %v3169_v35 = vpop.f32.mrb[87].mxu0  ;;  %9000 = vmatprep.subr.bf16.mxu0 %v9769_v3  ;;  %v9782_v56 = vld [vmem:[%s10742_s29 + $0x70] sm:$0xff]   ;;  %v9783_v41 = vld [vmem:[%s10742_s29 + $0x38] sm:$0xff]  }
 0x51e   :  { %v3128_v12 = vpack.c.bf16 %v3100_v11, %v3097_v22  ;;  %v3197_v18 = vpack.c.bf16 %v3169_v35, %v3166_v63  ;;  %v9784_v22 = vld [vmem:[%s10742_s29 + $0x78] sm:$0xff]   ;;  %v10761_v63 = vld [vmem:[%s10742_s29 + $0x80] sm:$0xff]  }
 0x51f   :  { %3358 = vmatmul.mubr.bf16.vlgmr.msra.gmra.mrb[92].mxu0 %v9757_v59  ;;  %v10764_v59 = vld [vmem:[%s10742_s29 + $0xc0] sm:$0xff]  }
 0x520   :  { %3375 = vmatpush1.bf16.msra.mxu1 %v3128_v12  ;;  %3365 = vmatprep.mubr.bf16.mxu0 %v9760_v10 }
 0x521   :  { %3376 = vmatprep.subr.bf16.mxu1 %v11338_v15  ;;  %9001 = vmatpush3.bf16.msra.mxu0 %v9769_v3 }
 0x522   :  { %v8950_v50 = vpop.f32.mrb[96].mxu1  ;;  %v8974_v43 = vpop.f32.mrb[88].mxu0  ;;  %9002 = vmatprep.subr.bf16.mxu0 %v9771_v6 }
 0x523   :  { %v3113_v44 = vpop.f32.mrb[97].mxu1  ;;  %v3182_v45 = vpop.f32.mrb[89].mxu0 }
 0x524   :  { %v8951_v47 = vpop.f32.mrb[98].mxu1  ;;  %v8975_v17 = vpop.f32.mrb[90].mxu0  ;;  %3377 = vmatpush1.bf16.msra.mxu1 %v3129_v51 }
 0x525   :  { %v3131_v53 = vpack.c.bf16 %v8951_v47, %v8950_v50  ;;  %v3200_v31 = vpack.c.bf16 %v8975_v17, %v8974_v43  ;;  %v3116_v32 = vpop.f32.mrb[99].mxu1  ;;  %v3185_v16 = vpop.f32.mrb[91].mxu0  ;;  %3378 = vmatprep.subr.bf16.mxu1 %v11338_v15  ;;  %9003 = vmatpush3.bf16.msra.mxu0 %v9771_v6  ;;  %v7095_v47 = vld [vmem:[%s6906_s10] ss:$0 sm:$0xff] }
 0x526   :  { %v3130_v19 = vpack.c.bf16 %v3116_v32, %v3113_v44  ;;  %v3199_v2 = vpack.c.bf16 %v3185_v16, %v3182_v45  ;;  %9004 = vmatprep.subr.bf16.mxu0 %v9773_v30  ;;  %v7094_v45 = vld [vmem:[%s6905_s4] ss:$0 sm:$0xff]  ;;  %s6917_s4 = sld [smem:[%s11306_s0 + %s10104_s30]]  }
 0x527   :  { %3366 = vmatmul.mubr.bf16.gmra.mrb[96].mxu0 %v9765_v21  ;;  %v1203_v21 = vmul.f32 %v7094_v45, %v10561_v39  ;;  %v1204_v17 = vmul.f32 %v7094_v45, %v10563_v20 }
 0x528   :  { %3379 = vmatpush1.bf16.msra.mxu1 %v3130_v19 }
 0x529   :  { %3380 = vmatprep.subr.bf16.mxu1 %v11338_v15  ;;  %9005 = vmatpush3.bf16.msra.mxu0 %v9773_v30  ;;  %v1214_v16 = vadd.f32 %v7095_v47, %v1204_v17 }
 0x52a   :  { %9006 = vmatprep.subr.bf16.mxu0 %v9775_v40 }
 0x52c   :  { %3381 = vmatpush1.bf16.msra.mxu1 %v3131_v53  ;;  %v7303_v53 = vld [vmem:[%s6904_s14] ss:$0 sm:$0xff] }
 0x52d   :  { %3382 = vmatprep.subr.bf16.mxu1 %v11338_v15  ;;  %9007 = vmatpush3.bf16.msra.mxu0 %v9775_v40 }
 0x52e   :  { %9008 = vmatprep.subr.bf16.mxu0 %v9777_v52 }
 0x530   :  { %3383 = vmatpush1.bf16.msra.mxu1 %v3197_v18 }
 0x531   :  { %3384 = vmatprep.subr.bf16.mxu1 %v11338_v15  ;;  %9009 = vmatpush3.bf16.msra.mxu0 %v9777_v52 }
 0x532   :  { %9010 = vmatprep.subr.bf16.mxu0 %v9779_v57 }
 0x534   :  { %3385 = vmatpush1.bf16.msra.mxu1 %v3198_v9 }
 0x535   :  { %3386 = vmatprep.subr.bf16.mxu1 %v11338_v15  ;;  %9011 = vmatpush3.bf16.msra.mxu0 %v9779_v57 }
 0x536   :  { %9012 = vmatprep.subr.bf16.mxu0 %v9781_v46 }
 0x538   :  { %3387 = vmatpush1.bf16.msra.mxu1 %v3199_v2  ;;  %v1205_v2 = vmul.f32 %v7094_v45, %v10565_v13 }
 0x539   :  { %3388 = vmatprep.subr.bf16.mxu1 %v11338_v15  ;;  %9013 = vmatpush3.bf16.msra.mxu0 %v9781_v46 }
 0x53a   :  { %9014 = vmatprep.subr.bf16.mxu0 %v9783_v41 }
 0x53b   :  { %v8994_v28 = vpop.f32.mrb[100].mxu1 }
 0x53c   :  { %v3235_v33 = vpop.f32.mrb[101].mxu1  ;;  %3389 = vmatpush1.bf16.msra.mxu1 %v3200_v31  ;;  %v1213_v31 = vadd.f32 %v7095_v47, %v1203_v21 }
 0x53d   :  { %v8995_v34 = vpop.f32.mrb[102].mxu1  ;;  %3390 = vmatprep.subr.bf16.mxu1 %v11338_v15  ;;  %9015 = vmatpush3.bf16.msra.mxu0 %v9783_v41 }
 0x53e   :  { %v3267_v25 = vpack.c.bf16 %v8995_v34, %v8994_v28  ;;  %v3238_v36 = vpop.f32.mrb[103].mxu1  ;;  %9040 = vmatprep.subr.bf16.mxu0 %v10761_v63  ;;  %v1217_v19 = vmax.f32 %v1213_v31, 0.0  ;;  %v1206_v28 = vmul.f32 %v7094_v45, %v10557_v37 }
 0x53f   :  { %v3266_v26 = vpack.c.bf16 %v3238_v36, %v3235_v33  ;;  %v1218_v36 = vmax.f32 %v1214_v16, 0.0 }
 0x541   :  { %3391 = vmatpush1.bf16.msra.mxu1 %v3266_v26 }
 0x542   :  { %3392 = vmatprep.subr.bf16.mxu1 %v11338_v15 }
 0x543   :  { %v8998_v60 = vpop.f32.mrb[104].mxu1 }
 0x544   :  { %v3251_v38 = vpop.f32.mrb[105].mxu1 }
 0x545   :  { %v8999_v23 = vpop.f32.mrb[106].mxu1  ;;  %3393 = vmatpush1.bf16.msra.mxu1 %v3267_v25 }
 0x546   :  { %v3269_v27 = vpack.c.bf16 %v8999_v23, %v8998_v60  ;;  %v3254_v48 = vpop.f32.mrb[107].mxu1  ;;  %3394 = vmatprep.subr.bf16.mxu1 %v11338_v15  ;;  %v10015_v60 = vld [vmem:[%s10124_s9] sm:$0xff] }
 0x547   :  { %v3268_v24 = vpack.c.bf16 %v3254_v48, %v3251_v38  ;;  %v1221_v38 = vadd.f32 %v10015_v60, %v1217_v19  ;;  %v1215_v48 = vadd.f32 %v7095_v47, %v1205_v2 }
 0x549   :  { %3395 = vmatpush1.bf16.msra.mxu1 %v3268_v24  ;;  %v1216_v24 = vadd.f32 %v7095_v47, %v1206_v28 }
 0x54a   :  { %3396 = vmatprep.subr.bf16.mxu1 %v11338_v15 }
 0x54b   :  { %v1220_v40 = vmax.f32 %v1216_v24, 0.0 }
 0x54d   :  { %3397 = vmatpush1.bf16.msra.mxu1 %v3269_v27 }
 0x54e   :  { %9020 = vmatprep.subr.bf16.mxu1 %v9770_v14 }
 0x550   :  { %3407 = vmatmul.mubr.bf16.vlgmr.msra.gmra.mrb[108].mxu1 %v9762_v49 }
 0x551   :  { %3414 = vmatprep.mubr.bf16.mxu1 %v9766_v4  ;;  %9021 = vmatpush3.bf16.msra.mxu1 %v9770_v14  ;;  %v10016_v4 = vld [vmem:[%s10124_s9 + $0x8] sm:$0xff]  ;;  %v1219_v14 = vmax.f32 %v1215_v48, 0.0 }
 0x552   :  { %9022 = vmatprep.subr.bf16.mxu1 %v9772_v54  ;;  %v1222_v13 = vadd.f32 %v10016_v4, %v1218_v36 }
 0x555   :  { %9023 = vmatpush3.bf16.msra.mxu1 %v9772_v54 }
 0x556   :  { %9024 = vmatprep.subr.bf16.mxu1 %v9774_v62 }
 0x558   :  { %3415 = vmatmul.mubr.bf16.gmra.mrb[112].mxu1 %v9768_v1 }
 0x559   :  { %9025 = vmatpush3.bf16.msra.mxu1 %v9774_v62 }
 0x55a   :  { %9026 = vmatprep.subr.bf16.mxu1 %v9776_v7 }
 0x55d   :  { %9027 = vmatpush3.bf16.msra.mxu1 %v9776_v7 }
 0x55e   :  { %9028 = vmatprep.subr.bf16.mxu1 %v9778_v29 }
 0x561   :  { %9029 = vmatpush3.bf16.msra.mxu1 %v9778_v29  ;;  %v10017_v29 = vld [vmem:[%s10124_s9 + $0x10] sm:$0xff] }
 0x562   :  { %9030 = vmatprep.subr.bf16.mxu1 %v9780_v42  ;;  %v1223_v57 = vadd.f32 %v10017_v29, %v1219_v14  ;;  %v9789_v29 = vld [vmem:[%s10742_s29 + $0x90] sm:$0xff]  }
 0x565   :  { %9031 = vmatpush3.bf16.msra.mxu1 %v9780_v42 }
 0x566   :  { %9032 = vmatprep.subr.bf16.mxu1 %v9782_v56 }
 0x569   :  { %9033 = vmatpush3.bf16.msra.mxu1 %v9782_v56 }
 0x56a   :  { %9034 = vmatprep.subr.bf16.mxu1 %v9784_v22 }
 0x56d   :  { %9035 = vmatpush3.bf16.msra.mxu1 %v9784_v22  ;;  %v10018_v22 = vld [vmem:[%s10124_s9 + $0x18] sm:$0xff]  ;;  %s10093_s9 = smov 27  }
 0x56e   :  { %9060 = vmatprep.subr.bf16.mxu1 %v10764_v59  ;;  %s10793_s21 = sld [smem:[%s11306_s0 + %s10093_s9]]   ;;  %s10100_s9 = smov 30  }
 0x5f2   :  { %v8064_v61 = vpop.f32.mrb[92].mxu0 }
 0x5f3   :  { %v8065_v0 = vpop.f32.mrb[93].mxu0 }
 0x5f4   :  { %v8066_v10 = vadd.f32 %v8065_v0, %v8064_v61  ;;  %v8067_v51 = vpop.f32.mrb[94].mxu0  ;;  %v1224_v61 = vadd.f32 %v10018_v22, %v1220_v40  ;;  %v9797_v22 = vld [vmem:[%s10742_s29 + $0xb0] sm:$0xff]  }
 0x5f5   :  { %v8068_v9 = vpop.f32.mrb[95].mxu0 }
 0x5f6   :  { %v8069_v11 = vadd.f32 %v8068_v9, %v8067_v51  ;;  %v3360_v32 = vadd.f32 %v8066_v10, %v7303_v53 }
 0x5f8   :  { %v3363_v26 = vadd.f32 %v8069_v11, %v7303_v53 }
 0x5fa   :  { %v8070_v35 = vpop.f32.mrb[96].mxu0 }
 0x5fb   :  { %v8071_v12 = vpop.f32.mrb[97].mxu0 }
 0x5fc   :  { %v8072_v18 = vadd.f32 %v8071_v12, %v8070_v35  ;;  %v8073_v50 = vpop.f32.mrb[98].mxu0 }
 0x5fd   :  { %v8074_v43 = vpop.f32.mrb[99].mxu0 }
 0x5fe   :  { %v8075_v44 = vadd.f32 %v8074_v43, %v8073_v50  ;;  %v3368_v3 = vadd.f32 %v8072_v18, %v7303_v53 }
 0x600   :  { %v3371_v7 = vadd.f32 %v8075_v44, %v7303_v53 }
 0x623   :  { %v3408_v33 = vpop.f32.mrb[108].mxu1 }
 0x624   :  { %v3409_v34 = vadd.f32 %v3408_v33, %v3360_v32  ;;  %v3410_v25 = vpop.f32.mrb[109].mxu1 }
 0x625   :  { %v3411_v39 = vpop.f32.mrb[110].mxu1 }
 0x626   :  { %v3423_v23 = vmax.f32 %v3409_v34, 0.0  ;;  %v3412_v20 = vadd.f32 %v3411_v39, %v3363_v26  ;;  %v3413_v27 = vpop.f32.mrb[111].mxu1 }
 0x627   :  { %v7313_v27 = vld [vmem:[%s6908_s1] ss:$0 sm:$0xff] }
 0x628   :  { %v3427_v49 = vadd.f32 %v3423_v23, %v1221_v38  ;;  %v3424_v1 = vmax.f32 %v3412_v20, 0.0  ;;  %v7312_v23 = vld [vmem:[%s6907_s6] ss:$0 sm:$0xff]  ;;  %s6926_s6 = sld [smem:[%s11306_s0 + %s10101_s22]]  }
 0x62a   :  { %v3428_v37 = vadd.f32 %v3424_v1, %v1222_v13 }
 0x62b   :  { %v3416_v6 = vpop.f32.mrb[112].mxu1 }
 0x62c   :  { %v3433_v54 = vadd.f32 %v3428_v37, %v3427_v49  ;;  %v3417_v30 = vadd.f32 %v3416_v6, %v3368_v3  ;;  %v3418_v62 = vpop.f32.mrb[113].mxu1 }
 0x62d   :  { %v3419_v52 = vpop.f32.mrb[114].mxu1 }
 0x62e   :  { %v3425_v42 = vmax.f32 %v3417_v30, 0.0  ;;  %v3420_v46 = vadd.f32 %v3419_v52, %v3371_v7  ;;  %v3421_v56 = vpop.f32.mrb[115].mxu1  ;;  %v9787_v7 = vld [vmem:[%s10742_s29 + $0x88] sm:$0xff]  }
 0x62f   :  { %v9788_v52 = vld [vmem:[%s10742_s29 + $0xc8] sm:$0xff]   ;;  %v9793_v56 = vld [vmem:[%s10742_s29 + $0xa0] sm:$0xff]  }
 0x630   :  { %v3429_v41 = vadd.f32 %v3425_v42, %v1223_v57  ;;  %v3426_v0 = vmax.f32 %v3420_v46, 0.0  ;;  %v9790_v57 = vld [vmem:[%s10742_s29 + $0xd0] sm:$0xff]   ;;  %v9791_v42 = vld [vmem:[%s10742_s29 + $0x98] sm:$0xff]  }
 0x631   :  { %v9792_v46 = vld [vmem:[%s10742_s29 + $0xd8] sm:$0xff]  }
 0x632   :  { %v3434_v10 = vadd.f32 %v3433_v54, %v3429_v41  ;;  %v3430_v51 = vadd.f32 %v3426_v0, %v1224_v61  ;;  %v9798_v61 = vld [vmem:[%s10742_s29 + $0xf0] sm:$0xff]   ;;  %v9799_v0 = vld [vmem:[%s10742_s29 + $0xb8] sm:$0xff]  }
 0x634   :  { %v3435_v9 = vadd.f32 %v3434_v10, %v3430_v51  ;;  %v9800_v10 = vld [vmem:[%s10742_s29 + $0xf8] sm:$0xff]  }
 0x636   :  { %v3436_v11 = vrot.slane %v3435_v9, 4 }
 0x638   :  { %v3437_v35 = vadd.f32 %v3436_v11, %v3435_v9  ;;  %v9802_v9 = vld [vmem:[%s10742_s29 + $0x140] sm:$0xff]   ;;  %v9803_v11 = vld [vmem:[%s10742_s29 + $0x108] sm:$0xff]  }
 0x63a   :  { %v3438_v12 = vrot.slane %v3437_v35, 2 }
 0x63c   :  { %v3439_v18 = vadd.f32 %v3438_v12, %v3437_v35  ;;  %v9804_v35 = vld [vmem:[%s10742_s29 + $0x148] sm:$0xff]   ;;  %v9805_v12 = vld [vmem:[%s10742_s29 + $0x110] sm:$0xff]  }
 0x63e   :  { %v3440_v50 = vrot.slane %v3439_v18, 1 }
 0x640   :  { %v3441_v43 = vadd.f32 %v3440_v50, %v3439_v18  ;;  %v9806_v18 = vld [vmem:[%s10742_s29 + $0x150] sm:$0xff]   ;;  %v9807_v50 = vld [vmem:[%s10742_s29 + $0x118] sm:$0xff]  }
 0x642   :  { %v3442_v44 = vmul.f32 0.03125, %v3441_v43  ;;  %v9808_v43 = vld [vmem:[%s10742_s29 + $0x158] sm:$0xff]  }
 0x644   :  { %v3443_v45 = vsub.f32 %v3427_v49, %v3442_v44  ;;  %v3444_v21 = vsub.f32 %v3428_v37, %v3442_v44  ;;  %v3445_v47 = vsub.f32 %v3429_v41, %v3442_v44  ;;  %v3446_v17 = vsub.f32 %v3430_v51, %v3442_v44  ;;  %v9796_v41 = vld [vmem:[%s10742_s29 + $0xe8] sm:$0xff]   ;;  %v9801_v51 = vld [vmem:[%s10742_s29 + $0x100] sm:$0xff]  }
 0x645   :  { %v9809_v44 = vld [vmem:[%s10742_s29 + $0x120] sm:$0xff]  }
 0x646   :  { %v3447_v53 = vmul.f32 %v3443_v45, %v3443_v45  ;;  %v3448_v31 = vmul.f32 %v3444_v21, %v3444_v21  ;;  %v3449_v32 = vmul.f32 %v3445_v47, %v3445_v47  ;;  %v3450_v19 = vmul.f32 %v3446_v17, %v3446_v17 }
 0x648   :  { %v3451_v16 = vadd.f32 %v3448_v31, %v3447_v53  ;;  %v9814_v53 = vld [vmem:[%s10742_s29 + $0x170] sm:$0xff]   ;;  %v9815_v31 = vld [vmem:[%s10742_s29 + $0x138] sm:$0xff]  }
 0x64a   :  { %v3452_v2 = vadd.f32 %v3451_v16, %v3449_v32  ;;  %v9816_v32 = vld [vmem:[%s10742_s29 + $0x178] sm:$0xff]   ;;  %v9817_v16 = vld [vmem:[%s10742_s29 + $0x180] sm:$0xff]  }
 0x64c   :  { %v3453_v28 = vadd.f32 %v3452_v2, %v3450_v19  ;;  %v9818_v19 = vld [vmem:[%s10786_s18] sm:$0xff]   ;;  %v9819_v2 = vld [vmem:[%s10742_s29 + $0x188] sm:$0xff]  }
 0x64e   :  { %v3454_v33 = vrot.slane %v3453_v28, 4 }
 0x650   :  { %v3455_v34 = vadd.f32 %v3454_v33, %v3453_v28  ;;  %v9820_v28 = vld [vmem:[%s10786_s18 + $0x8] sm:$0xff]   ;;  %v9821_v33 = vld [vmem:[%s10742_s29 + $0x190] sm:$0xff]  }
 0x652   :  { %v3456_v25 = vrot.slane %v3455_v34, 2 }
 0x654   :  { %v3457_v36 = vadd.f32 %v3456_v25, %v3455_v34  ;;  %v9822_v34 = vld [vmem:[%s10786_s18 + $0x10] sm:$0xff]   ;;  %v9823_v25 = vld [vmem:[%s10742_s29 + $0x198] sm:$0xff]  }
 0x656   :  { %v3458_v26 = vrot.slane %v3457_v36, 1 }
 0x658   :  { %v3459_v39 = vadd.f32 %v3458_v26, %v3457_v36  ;;  %v9824_v36 = vld [vmem:[%s10786_s18 + $0x18] sm:$0xff]   ;;  %v9825_v26 = vld [vmem:[%s10742_s29 + $0x1a0] sm:$0xff]  }
 0x65a   :  { %v3460_v60 = vmul.f32 0.03125, %v3459_v39  ;;  %v9826_v39 = vld [vmem:[%s10786_s18 + $0x20] sm:$0xff]  }
 0x65c   :  { %v3461_v38 = vadd.f32 1e-05, %v3460_v60  ;;  %v9827_v60 = vld [vmem:[%s10742_s29 + $0x1a8] sm:$0xff]  }
 0x65e   :  { %9951 = vrsqrt.f32 %v3461_v38  ;;  %v9828_v38 = vld [vmem:[%s10786_s18 + $0x28] sm:$0xff]  }
 0x668   :  { %v9952_v20 = vpop.eup %9951 }
 0x669   :  { %v3463_v48 = vmul.f32 %v9952_v20, %v3443_v45  ;;  %v3464_v24 = vmul.f32 %v9952_v20, %v3444_v21  ;;  %v3465_v49 = vmul.f32 %v9952_v20, %v3445_v47  ;;  %v3466_v4 = vmul.f32 %v9952_v20, %v3446_v17  ;;  %v9810_v45 = vld [vmem:[%s10742_s29 + $0x160] sm:$0xff]   ;;  %v9811_v21 = vld [vmem:[%s10742_s29 + $0x128] sm:$0xff]   ;;  %v9813_v17 = vld [vmem:[%s10742_s29 + $0x130] sm:$0xff]  }
 0x66a   :  { %v9812_v47 = vld [vmem:[%s10742_s29 + $0x168] sm:$0xff]   ;;  %v9830_v20 = vld [vmem:[%s10786_s18 + $0x30] sm:$0xff]  }
 0x66b   :  { %v3473_v13 = vmul.f32 %v7312_v23, %v3463_v48  ;;  %v3474_v1 = vmul.f32 %v7312_v23, %v3464_v24  ;;  %v3475_v3 = vmul.f32 %v7312_v23, %v3465_v49  ;;  %v3476_v37 = vmul.f32 %v7312_v23, %v3466_v4  ;;  %v9829_v23 = vld [vmem:[%s10742_s29 + $0x1b0] sm:$0xff]   ;;  %v9832_v48 = vld [vmem:[%s10786_s18 + $0x38] sm:$0xff]   ;;  %v9833_v24 = vld [vmem:[%s10793_s21] sm:$0xff]  }
 0x66c   :  { %v9834_v49 = vld [vmem:[%s10793_s21 + $0x8] sm:$0xff]   ;;  %v9835_v4 = vld [vmem:[%s10793_s21 + $0x10] sm:$0xff]  }
 0x66d   :  { %v3483_v14 = vadd.f32 %v7313_v27, %v3473_v13  ;;  %v3484_v6 = vadd.f32 %v7313_v27, %v3474_v1  ;;  %v3485_v54 = vadd.f32 %v7313_v27, %v3475_v3  ;;  %v3486_v30 = vadd.f32 %v7313_v27, %v3476_v37  ;;  %v9831_v27 = vld [vmem:[%s10742_s29 + $0x1b8] sm:$0xff]   ;;  %v9837_v1 = vld [vmem:[%s10793_s21 + $0x20] sm:$0xff]   ;;  %v9838_v3 = vld [vmem:[%s10793_s21 + $0x28] sm:$0xff]  }
 0x66e   :  { %v9836_v13 = vld [vmem:[%s10793_s21 + $0x18] sm:$0xff]   ;;  %v9839_v37 = vld [vmem:[%s10793_s21 + $0x30] sm:$0xff]  }
 0x66f   :  { %3487 = vst [vmem:[%s10804_s7] sm:$0xff] %v3483_v14  ;;  %3488 = vst [vmem:[%s10804_s7 + $0x10] sm:$0xff] %v3484_v6  ;;  %v10810_v62 = vpack.c.bf16 %v3484_v6, %v3483_v14  ;;  %v10812_v40 = vpack.c.bf16 %v3486_v30, %v3485_v54  ;;  %v9840_v14 = vld [vmem:[%s10793_s21 + $0x38] sm:$0xff]   ;;  %v9841_v6 = vld [vmem:[%s10793_s21 + $0x80] sm:$0xff]  }
 0x670   :  { %3489 = vst [vmem:[%s10804_s7 + $0x20] sm:$0xff] %v3485_v54  ;;  %3490 = vst [vmem:[%s10804_s7 + $0x30] sm:$0xff] %v3486_v30  ;;  %v9842_v54 = vld [vmem:[%s10793_s21 + $0x88] sm:$0xff]   ;;  %v9843_v30 = vld [vmem:[%s10793_s21 + $0x90] sm:$0xff]  }
 0x671   :  { %9016 = vmatprep.mubr.bf16.mxu0 %v10810_v62  ;;  %9036 = vmatprep.mubr.bf16.mxu1 %v10810_v62 }
 0x672   :  { %9017 = vmatmul.mubr.bf16.vlgmr.msra.gmra.mrb[100].mxu0 %v10812_v40  ;;  %9037 = vmatmul.mubr.bf16.vlgmr.msra.gmra.mrb[116].mxu1 %v10812_v40 }
 0x673   :  { %9041 = vmatpush3.bf16.msra.mxu0 %v10761_v63  ;;  %9061 = vmatpush3.bf16.msra.mxu1 %v10764_v59  ;;  %v9794_v63 = vld [vmem:[%s10742_s29 + $0xe0] sm:$0xff]   ;;  %v9795_v59 = vld [vmem:[%s10742_s29 + $0xa8] sm:$0xff]  }
 0x674   :  { %9056 = vmatprep.mubr.bf16.mxu0 %v10810_v62  ;;  %9076 = vmatprep.mubr.bf16.mxu1 %v10810_v62 }
 0x675   :  { %9042 = vmatprep.subr.bf16.mxu0 %v9787_v7  ;;  %9062 = vmatprep.subr.bf16.mxu1 %v9788_v52 }
 0x677   :  { %9043 = vmatpush3.bf16.msra.mxu0 %v9787_v7  ;;  %9063 = vmatpush3.bf16.msra.mxu1 %v9788_v52  ;;  %v9846_v7 = vld [vmem:[%s10793_s21 + $0xa8] sm:$0xff]   ;;  %v9847_v52 = vld [vmem:[%s10793_s21 + $0xb0] sm:$0xff]  }
 0x678   :  { %9044 = vmatprep.subr.bf16.mxu0 %v9789_v29  ;;  %9064 = vmatprep.subr.bf16.mxu1 %v9790_v57 }
 0x67b   :  { %9045 = vmatpush3.bf16.msra.mxu0 %v9789_v29  ;;  %9065 = vmatpush3.bf16.msra.mxu1 %v9790_v57  ;;  %v9848_v29 = vld [vmem:[%s10793_s21 + $0xb8] sm:$0xff]   ;;  %v9849_v57 = vld [vmem:[%s10793_s21 + $0x100] sm:$0xff]  }
 0x67c   :  { %9046 = vmatprep.subr.bf16.mxu0 %v9791_v42  ;;  %9066 = vmatprep.subr.bf16.mxu1 %v9792_v46 }
 0x67f   :  { %9047 = vmatpush3.bf16.msra.mxu0 %v9791_v42  ;;  %9067 = vmatpush3.bf16.msra.mxu1 %v9792_v46  ;;  %v9850_v42 = vld [vmem:[%s10793_s21 + $0x108] sm:$0xff]   ;;  %v9851_v46 = vld [vmem:[%s10793_s21 + $0x110] sm:$0xff]  }
 0x680   :  { %9048 = vmatprep.subr.bf16.mxu0 %v9793_v56  ;;  %9068 = vmatprep.subr.bf16.mxu1 %v9794_v63 }
 0x683   :  { %9049 = vmatpush3.bf16.msra.mxu0 %v9793_v56  ;;  %9069 = vmatpush3.bf16.msra.mxu1 %v9794_v63  ;;  %v9852_v56 = vld [vmem:[%s10793_s21 + $0x118] sm:$0xff]   ;;  %v9853_v63 = vld [vmem:[%s10793_s21 + $0x120] sm:$0xff]  }
 0x684   :  { %9050 = vmatprep.subr.bf16.mxu0 %v9795_v59  ;;  %9070 = vmatprep.subr.bf16.mxu1 %v9796_v41 }
 0x687   :  { %9051 = vmatpush3.bf16.msra.mxu0 %v9795_v59  ;;  %9071 = vmatpush3.bf16.msra.mxu1 %v9796_v41  ;;  %v9854_v59 = vld [vmem:[%s10793_s21 + $0x128] sm:$0xff]   ;;  %v9855_v41 = vld [vmem:[%s10793_s21 + $0x130] sm:$0xff]  }
 0x688   :  { %9052 = vmatprep.subr.bf16.mxu0 %v9797_v22  ;;  %9072 = vmatprep.subr.bf16.mxu1 %v9798_v61 }
 0x68b   :  { %9053 = vmatpush3.bf16.msra.mxu0 %v9797_v22  ;;  %9073 = vmatpush3.bf16.msra.mxu1 %v9798_v61  ;;  %v9856_v22 = vld [vmem:[%s10793_s21 + $0x138] sm:$0xff]   ;;  %v9857_v61 = vld [vmem:[%s10793_s21 + $0x180] sm:$0xff]  }
 0x68c   :  { %9054 = vmatprep.subr.bf16.mxu0 %v9799_v0  ;;  %9074 = vmatprep.subr.bf16.mxu1 %v9800_v10 }
 0x68f   :  { %9055 = vmatpush3.bf16.msra.mxu0 %v9799_v0  ;;  %9075 = vmatpush3.bf16.msra.mxu1 %v9800_v10  ;;  %v9875_v0 = vld [vmem:[%s10242_s25 + $0x4] ss:$8 sps:$4 sm:$0xff]  }
 0x690   :  { %9080 = vmatprep.subr.bf16.mxu0 %v9801_v51  ;;  %9100 = vmatprep.subr.bf16.mxu1 %v9802_v9  ;;  %v9858_v10 = vld [vmem:[%s10793_s21 + $0x188] sm:$0xff]  }
 0x692   :  { %9057 = vmatmul.mubr.bf16.vlgmr.msra.gmra.mrb[104].mxu0 %v10812_v40  ;;  %9077 = vmatmul.mubr.bf16.vlgmr.msra.gmra.mrb[120].mxu1 %v10812_v40 }
 0x693   :  { %9081 = vmatpush3.bf16.msra.mxu0 %v9801_v51  ;;  %9096 = vmatprep.mubr.bf16.mxu0 %v10810_v62  ;;  %v9859_v51 = vld [vmem:[%s10793_s21 + $0x190] sm:$0xff]  }
 0x694   :  { %9101 = vmatpush3.bf16.msra.mxu1 %v9802_v9  ;;  %9116 = vmatprep.mubr.bf16.mxu1 %v10810_v62  ;;  %v9860_v9 = vld [vmem:[%s10793_s21 + $0x198] sm:$0xff]  }
 0x695   :  { %9082 = vmatprep.subr.bf16.mxu0 %v9803_v11  ;;  %9102 = vmatprep.subr.bf16.mxu1 %v9804_v35 }
 0x697   :  { %9083 = vmatpush3.bf16.msra.mxu0 %v9803_v11  ;;  %v9861_v11 = vld [vmem:[%s10793_s21 + $0x1a0] sm:$0xff]  }
 0x698   :  { %9103 = vmatpush3.bf16.msra.mxu1 %v9804_v35  ;;  %9084 = vmatprep.subr.bf16.mxu0 %v9805_v12  ;;  %v9862_v35 = vld [vmem:[%s10793_s21 + $0x1a8] sm:$0xff]  }
 0x699   :  { %9104 = vmatprep.subr.bf16.mxu1 %v9806_v18 }
 0x69b   :  { %9085 = vmatpush3.bf16.msra.mxu0 %v9805_v12 }
 0x69c   :  { %9105 = vmatpush3.bf16.msra.mxu1 %v9806_v18  ;;  %9086 = vmatprep.subr.bf16.mxu0 %v9807_v50 }
 0x69d   :  { %9106 = vmatprep.subr.bf16.mxu1 %v9808_v43 }
 0x69f   :  { %9087 = vmatpush3.bf16.msra.mxu0 %v9807_v50  ;;  %v9863_v50 = vld [vmem:[%s10793_s21 + $0x1b0] sm:$0xff]  }
 0x6a0   :  { %9107 = vmatpush3.bf16.msra.mxu1 %v9808_v43  ;;  %9088 = vmatprep.subr.bf16.mxu0 %v9809_v44 }
 0x6a1   :  { %9108 = vmatprep.subr.bf16.mxu1 %v9810_v45 }
 0x6a3   :  { %9089 = vmatpush3.bf16.msra.mxu0 %v9809_v44 }
 0x6a4   :  { %9109 = vmatpush3.bf16.msra.mxu1 %v9810_v45  ;;  %9090 = vmatprep.subr.bf16.mxu0 %v9811_v21 }
 0x6a5   :  { %9110 = vmatprep.subr.bf16.mxu1 %v9812_v47 }
 0x6a7   :  { %9091 = vmatpush3.bf16.msra.mxu0 %v9811_v21 }
 0x6a8   :  { %9111 = vmatpush3.bf16.msra.mxu1 %v9812_v47  ;;  %9092 = vmatprep.subr.bf16.mxu0 %v9813_v17 }
 0x6a9   :  { %9112 = vmatprep.subr.bf16.mxu1 %v9814_v53 }
 0x6ab   :  { %9093 = vmatpush3.bf16.msra.mxu0 %v9813_v17 }
 0x6ac   :  { %9113 = vmatpush3.bf16.msra.mxu1 %v9814_v53  ;;  %9094 = vmatprep.subr.bf16.mxu0 %v9815_v31 }
 0x6ad   :  { %9114 = vmatprep.subr.bf16.mxu1 %v9816_v32 }
 0x6af   :  { %9095 = vmatpush3.bf16.msra.mxu0 %v9815_v31 }
 0x6b0   :  { %9115 = vmatpush3.bf16.msra.mxu1 %v9816_v32  ;;  %9120 = vmatprep.subr.bf16.mxu0 %v9817_v16 }
 0x6b1   :  { %9140 = vmatprep.subr.bf16.mxu1 %v9818_v19 }
 0x6b2   :  { %9097 = vmatmul.mubr.bf16.vlgmr.msra.gmra.mrb[108].mxu0 %v10812_v40 }
 0x6b3   :  { %9117 = vmatmul.mubr.bf16.vlgmr.msra.gmra.mrb[124].mxu1 %v10812_v40  ;;  %9121 = vmatpush3.bf16.msra.mxu0 %v9817_v16 }
 0x6b4   :  { %9136 = vmatprep.mubr.bf16.mxu0 %v10810_v62  ;;  %9141 = vmatpush3.bf16.msra.mxu1 %v9818_v19  ;;  %v9864_v19 = vld [vmem:[%s10793_s21 + $0x1b8] sm:$0xff]  }
 0x6b5   :  { %9156 = vmatprep.mubr.bf16.mxu1 %v10810_v62  ;;  %9122 = vmatprep.subr.bf16.mxu0 %v9819_v2  ;;  %v9844_v62 = vld [vmem:[%s10793_s21 + $0x98] sm:$0xff]  }
 0x6b6   :  { %9142 = vmatprep.subr.bf16.mxu1 %v9820_v28 }
 0x6b7   :  { %9123 = vmatpush3.bf16.msra.mxu0 %v9819_v2  ;;  %v9865_v2 = vld [vmem:[%s10879_s12] sm:$0xff]  }
 0x6b8   :  { %9143 = vmatpush3.bf16.msra.mxu1 %v9820_v28  ;;  %9124 = vmatprep.subr.bf16.mxu0 %v9821_v33  ;;  %v9866_v28 = vld [vmem:[%s10879_s12 + $0x8] sm:$0xff]  }
 0x6b9   :  { %9144 = vmatprep.subr.bf16.mxu1 %v9822_v34 }
 0x6bb   :  { %9125 = vmatpush3.bf16.msra.mxu0 %v9821_v33  ;;  %v9867_v33 = vld [vmem:[%s10879_s12 + $0x10] sm:$0xff]  }
 0x6bc   :  { %9145 = vmatpush3.bf16.msra.mxu1 %v9822_v34  ;;  %9126 = vmatprep.subr.bf16.mxu0 %v9823_v25  ;;  %v9868_v34 = vld [vmem:[%s10879_s12 + $0x18] sm:$0xff]  }
 0x6bd   :  { %9146 = vmatprep.subr.bf16.mxu1 %v9824_v36 }
 0x6bf   :  { %9127 = vmatpush3.bf16.msra.mxu0 %v9823_v25  ;;  %v9869_v25 = vld [vmem:[%s10879_s12 + $0x20] sm:$0xff]  }
 0x6c0   :  { %9147 = vmatpush3.bf16.msra.mxu1 %v9824_v36  ;;  %9128 = vmatprep.subr.bf16.mxu0 %v9825_v26  ;;  %v9870_v36 = vld [vmem:[%s10879_s12 + $0x28] sm:$0xff]  }
 0x6c1   :  { %9148 = vmatprep.subr.bf16.mxu1 %v9826_v39 }
 0x6c3   :  { %9129 = vmatpush3.bf16.msra.mxu0 %v9825_v26 }
 0x6c4   :  { %9149 = vmatpush3.bf16.msra.mxu1 %v9826_v39  ;;  %9130 = vmatprep.subr.bf16.mxu0 %v9827_v60 }
 0x6c5   :  { %9150 = vmatprep.subr.bf16.mxu1 %v9828_v38 }
 0x6c7   :  { %9131 = vmatpush3.bf16.msra.mxu0 %v9827_v60  ;;  %v9871_v60 = vld [vmem:[%s10879_s12 + $0x30] sm:$0xff]  }
 0x6c8   :  { %9151 = vmatpush3.bf16.msra.mxu1 %v9828_v38  ;;  %9132 = vmatprep.subr.bf16.mxu0 %v9829_v23 }
 0x6c9   :  { %9152 = vmatprep.subr.bf16.mxu1 %v9830_v20 }
 0x6cb   :  { %9133 = vmatpush3.bf16.msra.mxu0 %v9829_v23 }
 0x6cc   :  { %9153 = vmatpush3.bf16.msra.mxu1 %v9830_v20  ;;  %9134 = vmatprep.subr.bf16.mxu0 %v9831_v27 }
 0x6cd   :  { %9154 = vmatprep.subr.bf16.mxu1 %v9832_v48 }
 0x6cf   :  { %9135 = vmatpush3.bf16.msra.mxu0 %v9831_v27 }
 0x6d0   :  { %9155 = vmatpush3.bf16.msra.mxu1 %v9832_v48  ;;  %4441 = vmatprep.subr.bf16.mxu0 %v11338_v15 }
 0x6d1   :  { %9160 = vmatprep.subr.bf16.mxu1 %v9833_v24 }
 0x6d2   :  { %9137 = vmatmul.mubr.bf16.vlgmr.msra.gmra.mrb[112].mxu0 %v10812_v40 }
 0x6d3   :  { %9157 = vmatmul.mubr.bf16.vlgmr.msra.gmra.mrb[128].mxu1 %v10812_v40  ;;  %v9845_v40 = vld [vmem:[%s10793_s21 + $0xa0] sm:$0xff]   ;;  %4473 = vmatprep.mubr.bf16.mxu0 %v9875_v0 }
 0x6d4   :  { %9161 = vmatpush3.bf16.msra.mxu1 %v9833_v24  ;;  %9176 = vmatprep.mubr.bf16.mxu1 %v10638_v5 }
 0x6d5   :  { %9162 = vmatprep.subr.bf16.mxu1 %v9834_v49 }
 0x6d8   :  { %9163 = vmatpush3.bf16.msra.mxu1 %v9834_v49 }
 0x6d9   :  { %9164 = vmatprep.subr.bf16.mxu1 %v9835_v4 }
 0x6dc   :  { %9165 = vmatpush3.bf16.msra.mxu1 %v9835_v4 }
 0x6dd   :  { %9166 = vmatprep.subr.bf16.mxu1 %v9836_v13 }
 0x6e0   :  { %9167 = vmatpush3.bf16.msra.mxu1 %v9836_v13 }
 0x6e1   :  { %9168 = vmatprep.subr.bf16.mxu1 %v9837_v1 }
 0x6e4   :  { %9169 = vmatpush3.bf16.msra.mxu1 %v9837_v1 }
 0x6e5   :  { %9170 = vmatprep.subr.bf16.mxu1 %v9838_v3 }
 0x6e8   :  { %9171 = vmatpush3.bf16.msra.mxu1 %v9838_v3  ;;  %v9872_v3 = vld [vmem:[%s10879_s12 + $0x38] sm:$0xff]   ;;  %s10106_s12 = smov 25  }
 0x6e9   :  { %9172 = vmatprep.subr.bf16.mxu1 %v9839_v37  ;;  %s6920_s14 = sld [smem:[%s11306_s0 + %s10106_s12]]  }
 0x6ec   :  { %9173 = vmatpush3.bf16.msra.mxu1 %v9839_v37 }
 0x6ed   :  { %9174 = vmatprep.subr.bf16.mxu1 %v9840_v14 }
 0x6f0   :  { %9175 = vmatpush3.bf16.msra.mxu1 %v9840_v14 }
 0x6f1   :  { %9208 = vmatprep.subr.bf16.mxu1 %v9841_v6 }
 0x6f3   :  { %9177 = vmatmul.mubr.bf16.vlgmr.msra.gmra.mrb[132].mxu1 %v10640_v55 }
 0x6f4   :  { %9180 = vmatprep.mubr.bf16.mxu1 %v10642_v58  ;;  %9209 = vmatpush3.bf16.msra.mxu1 %v9841_v6 }
 0x6f5   :  { %9210 = vmatprep.subr.bf16.mxu1 %v9842_v54 }
 0x6f8   :  { %9211 = vmatpush3.bf16.msra.mxu1 %v9842_v54 }
 0x6f9   :  { %9212 = vmatprep.subr.bf16.mxu1 %v9843_v30 }
 0x6fb   :  { %9181 = vmatmul.mubr.bf16.gmra.mrb[136].mxu1 %v10644_v8 }
 0x6fc   :  { %9213 = vmatpush3.bf16.msra.mxu1 %v9843_v30  ;;  %9224 = vmatprep.mubr.bf16.mxu1 %v10638_v5 }
 0x6fd   :  { %9214 = vmatprep.subr.bf16.mxu1 %v9844_v62 }
 0x700   :  { %9215 = vmatpush3.bf16.msra.mxu1 %v9844_v62 }
 0x701   :  { %9216 = vmatprep.subr.bf16.mxu1 %v9845_v40 }
 0x704   :  { %9217 = vmatpush3.bf16.msra.mxu1 %v9845_v40 }
 0x705   :  { %9218 = vmatprep.subr.bf16.mxu1 %v9846_v7 }
 0x708   :  { %9219 = vmatpush3.bf16.msra.mxu1 %v9846_v7 }
 0x709   :  { %9220 = vmatprep.subr.bf16.mxu1 %v9847_v52 }
 0x70c   :  { %9221 = vmatpush3.bf16.msra.mxu1 %v9847_v52 }
 0x70d   :  { %9222 = vmatprep.subr.bf16.mxu1 %v9848_v29 }
 0x710   :  { %9223 = vmatpush3.bf16.msra.mxu1 %v9848_v29 }
 0x711   :  { %9256 = vmatprep.subr.bf16.mxu1 %v9849_v57 }
 0x713   :  { %9225 = vmatmul.mubr.bf16.vlgmr.msra.gmra.mrb[140].mxu1 %v10640_v55 }
 0x714   :  { %9228 = vmatprep.mubr.bf16.mxu1 %v10642_v58  ;;  %9257 = vmatpush3.bf16.msra.mxu1 %v9849_v57 }
 0x715   :  { %9258 = vmatprep.subr.bf16.mxu1 %v9850_v42 }
 0x718   :  { %9259 = vmatpush3.bf16.msra.mxu1 %v9850_v42 }
 0x719   :  { %9260 = vmatprep.subr.bf16.mxu1 %v9851_v46 }
 0x71b   :  { %9229 = vmatmul.mubr.bf16.gmra.mrb[144].mxu1 %v10644_v8 }
 0x71c   :  { %9261 = vmatpush3.bf16.msra.mxu1 %v9851_v46  ;;  %9272 = vmatprep.mubr.bf16.mxu1 %v10638_v5 }
 0x71d   :  { %9262 = vmatprep.subr.bf16.mxu1 %v9852_v56 }
 0x720   :  { %9263 = vmatpush3.bf16.msra.mxu1 %v9852_v56 }
 0x721   :  { %9264 = vmatprep.subr.bf16.mxu1 %v9853_v63 }
 0x724   :  { %9265 = vmatpush3.bf16.msra.mxu1 %v9853_v63 }
 0x725   :  { %9266 = vmatprep.subr.bf16.mxu1 %v9854_v59 }
 0x728   :  { %9267 = vmatpush3.bf16.msra.mxu1 %v9854_v59 }
 0x729   :  { %9268 = vmatprep.subr.bf16.mxu1 %v9855_v41 }
 0x72c   :  { %9269 = vmatpush3.bf16.msra.mxu1 %v9855_v41 }
 0x72d   :  { %9270 = vmatprep.subr.bf16.mxu1 %v9856_v22 }
 0x730   :  { %9271 = vmatpush3.bf16.msra.mxu1 %v9856_v22 }
 0x731   :  { %9304 = vmatprep.subr.bf16.mxu1 %v9857_v61 }
 0x733   :  { %9273 = vmatmul.mubr.bf16.vlgmr.msra.gmra.mrb[148].mxu1 %v10640_v55 }
 0x734   :  { %9276 = vmatprep.mubr.bf16.mxu1 %v10642_v58  ;;  %9305 = vmatpush3.bf16.msra.mxu1 %v9857_v61 }
 0x735   :  { %9306 = vmatprep.subr.bf16.mxu1 %v9858_v10 }
 0x738   :  { %9307 = vmatpush3.bf16.msra.mxu1 %v9858_v10 }
 0x739   :  { %9308 = vmatprep.subr.bf16.mxu1 %v9859_v51 }
 0x73b   :  { %9277 = vmatmul.mubr.bf16.gmra.mrb[152].mxu1 %v10644_v8 }
 0x73c   :  { %9309 = vmatpush3.bf16.msra.mxu1 %v9859_v51  ;;  %9320 = vmatprep.mubr.bf16.mxu1 %v10638_v5 }
 0x73d   :  { %9310 = vmatprep.subr.bf16.mxu1 %v9860_v9 }
 0x740   :  { %9311 = vmatpush3.bf16.msra.mxu1 %v9860_v9  ;;  %v9876_v9 = vld [vmem:[%s10793_s21 + $0x40] sm:$0xff]  }
 0x741   :  { %9312 = vmatprep.subr.bf16.mxu1 %v9861_v11 }
 0x744   :  { %9313 = vmatpush3.bf16.msra.mxu1 %v9861_v11  ;;  %v9873_v11 = vld [vmem:[%s10242_s25] ss:$8 sps:$4 sm:$0xff]  }
 0x745   :  { %v9018_v12 = vpop.f32.mrb[100].mxu0  ;;  %v9038_v18 = vpop.f32.mrb[116].mxu1  ;;  %9314 = vmatprep.subr.bf16.mxu1 %v9862_v35 }
 0x746   :  { %v3591_v43 = vpop.f32.mrb[101].mxu0  ;;  %v3707_v44 = vpop.f32.mrb[117].mxu1 }
 0x747   :  { %v9019_v45 = vpop.f32.mrb[102].mxu0  ;;  %v9039_v21 = vpop.f32.mrb[118].mxu1 }
 0x748   :  { %9315 = vmatpush3.bf16.msra.mxu1 %v9862_v35  ;;  %v3607_v47 = vpack.c.bf16 %v9019_v45, %v9018_v12  ;;  %v3723_v17 = vpack.c.bf16 %v9039_v21, %v9038_v18  ;;  %v3594_v53 = vpop.f32.mrb[103].mxu0  ;;  %v3710_v31 = vpop.f32.mrb[119].mxu1  ;;  %v9878_v35 = vld [vmem:[%s10242_s25 + $0x14] ss:$8 sps:$4 sm:$0xff]   ;;  %v9877_v12 = vld [vmem:[%s10793_s21 + $0x48] sm:$0xff]  }
 0x749   :  { %v3606_v32 = vpack.c.bf16 %v3594_v53, %v3591_v43  ;;  %v3722_v16 = vpack.c.bf16 %v3710_v31, %v3707_v44  ;;  %9316 = vmatprep.subr.bf16.mxu1 %v9863_v50  ;;  %v9881_v18 = vld [vmem:[%s10793_s21 + $0x50] sm:$0xff]   ;;  %v9882_v43 = vld [vmem:[%s10793_s21 + $0x58] sm:$0xff]   ;;  %v9883_v44 = vld [vmem:[%s10793_s21 + $0x60] sm:$0xff]  }
 0x74a   :  { %v9884_v45 = vld [vmem:[%s10793_s21 + $0x68] sm:$0xff]   ;;  %v9885_v21 = vld [vmem:[%s10793_s21 + $0x70] sm:$0xff]   ;;  %v9886_v31 = vld [vmem:[%s10793_s21 + $0x78] sm:$0xff]  }
 0x74b   :  { %4442 = vmatpush1.bf16.msra.mxu0 %v3606_v32 }
 0x74c   :  { %9317 = vmatpush3.bf16.msra.mxu1 %v9863_v50  ;;  %4443 = vmatprep.subr.bf16.mxu0 %v11338_v15  ;;  %v9880_v50 = vld [vmem:[%s10242_s25 + $0x10] ss:$8 sps:$4 sm:$0xff]   ;;  %s10098_s25 = smov 21  }
 0x74d   :  { %9318 = vmatprep.subr.bf16.mxu1 %v9864_v19  ;;  %s6916_s15 = sld [smem:[%s11306_s0 + %s10098_s25]]  }
 0x74f   :  { %4444 = vmatpush1.bf16.msra.mxu0 %v3607_v47 }
 0x750   :  { %9319 = vmatpush3.bf16.msra.mxu1 %v9864_v19  ;;  %4445 = vmatprep.subr.bf16.mxu0 %v11338_v15 }
 0x751   :  { %9352 = vmatprep.subr.bf16.mxu1 %v9865_v2 }
 0x753   :  { %9321 = vmatmul.mubr.bf16.vlgmr.msra.gmra.mrb[156].mxu1 %v10640_v55  ;;  %4446 = vmatpush1.bf16.msra.mxu0 %v3722_v16 }
 0x754   :  { %9324 = vmatprep.mubr.bf16.mxu1 %v10642_v58  ;;  %9353 = vmatpush3.bf16.msra.mxu1 %v9865_v2  ;;  %v9887_v2 = vld [vmem:[%s10793_s21 + $0xc0] sm:$0xff]  }
 0x755   :  { %9354 = vmatprep.subr.bf16.mxu1 %v9866_v28  ;;  %4447 = vmatprep.subr.bf16.mxu0 %v11338_v15 }
 0x757   :  { %4448 = vmatpush1.bf16.msra.mxu0 %v3723_v17 }
 0x758   :  { %9355 = vmatpush3.bf16.msra.mxu1 %v9866_v28  ;;  %4449 = vmatprep.subr.bf16.mxu0 %v11338_v15 }
 0x759   :  { %9356 = vmatprep.subr.bf16.mxu1 %v9867_v33 }
 0x75b   :  { %9325 = vmatmul.mubr.bf16.gmra.mrb[160].mxu1 %v10644_v8 }
 0x75c   :  { %9357 = vmatpush3.bf16.msra.mxu1 %v9867_v33  ;;  %9368 = vmatprep.mubr.bf16.mxu1 %v10638_v5 }
 0x75d   :  { %9358 = vmatprep.subr.bf16.mxu1 %v9868_v34 }
 0x760   :  { %9359 = vmatpush3.bf16.msra.mxu1 %v9868_v34 }
 0x761   :  { %9360 = vmatprep.subr.bf16.mxu1 %v9869_v25 }
 0x764   :  { %9361 = vmatpush3.bf16.msra.mxu1 %v9869_v25  ;;  %v9888_v25 = vld [vmem:[%s10793_s21 + $0xc8] sm:$0xff]  }
 0x765   :  { %v9058_v26 = vpop.f32.mrb[104].mxu0  ;;  %v9078_v39 = vpop.f32.mrb[120].mxu1  ;;  %9362 = vmatprep.subr.bf16.mxu1 %v9870_v36 }
 0x766   :  { %v3823_v38 = vpop.f32.mrb[105].mxu0  ;;  %v3939_v23 = vpop.f32.mrb[121].mxu1 }
 0x767   :  { %v9059_v20 = vpop.f32.mrb[106].mxu0  ;;  %v9079_v27 = vpop.f32.mrb[122].mxu1 }
 0x768   :  { %v3839_v48 = vpack.c.bf16 %v9059_v20, %v9058_v26  ;;  %v3955_v24 = vpack.c.bf16 %v9079_v27, %v9078_v39  ;;  %9363 = vmatpush3.bf16.msra.mxu1 %v9870_v36  ;;  %v3826_v49 = vpop.f32.mrb[107].mxu0  ;;  %v3942_v4 = vpop.f32.mrb[123].mxu1  ;;  %v9892_v20 = vld [vmem:[%s10793_s21 + $0xe8] sm:$0xff]   ;;  %v9893_v27 = vld [vmem:[%s10793_s21 + $0xf0] sm:$0xff]  }
 0x769   :  { %v3838_v13 = vpack.c.bf16 %v3826_v49, %v3823_v38  ;;  %v3954_v1 = vpack.c.bf16 %v3942_v4, %v3939_v23  ;;  %9364 = vmatprep.subr.bf16.mxu1 %v9871_v60  ;;  %v9890_v38 = vld [vmem:[%s10793_s21 + $0xd8] sm:$0xff]   ;;  %v9891_v23 = vld [vmem:[%s10793_s21 + $0xe0] sm:$0xff]  }
 0x76a   :  { %v9894_v4 = vld [vmem:[%s10793_s21 + $0xf8] sm:$0xff]  }
 0x76b   :  { %4450 = vmatpush1.bf16.msra.mxu0 %v3838_v13 }
 0x76c   :  { %9365 = vmatpush3.bf16.msra.mxu1 %v9871_v60  ;;  %4451 = vmatprep.subr.bf16.mxu0 %v11338_v15  ;;  %v9889_v60 = vld [vmem:[%s10793_s21 + $0xd0] sm:$0xff]  }
 0x76d   :  { %9366 = vmatprep.subr.bf16.mxu1 %v9872_v3 }
 0x76f   :  { %4452 = vmatpush1.bf16.msra.mxu0 %v3839_v48 }
 0x770   :  { %9367 = vmatpush3.bf16.msra.mxu1 %v9872_v3  ;;  %4453 = vmatprep.subr.bf16.mxu0 %v11338_v15 }
 0x773   :  { %9369 = vmatmul.mubr.bf16.vlgmr.msra.gmra.mrb[164].mxu1 %v10640_v55  ;;  %4454 = vmatpush1.bf16.msra.mxu0 %v3954_v1 }
 0x774   :  { %9372 = vmatprep.mubr.bf16.mxu1 %v10642_v58  ;;  %4455 = vmatprep.subr.bf16.mxu0 %v11338_v15 }
 0x777   :  { %4456 = vmatpush1.bf16.msra.mxu0 %v3955_v24 }
 0x778   :  { %4457 = vmatprep.subr.bf16.mxu0 %v11338_v15 }
 0x77b   :  { %9373 = vmatmul.mubr.bf16.gmra.mrb[168].mxu1 %v10644_v8 }
 0x785   :  { %v9098_v37 = vpop.f32.mrb[108].mxu0 }
 0x786   :  { %v9118_v14 = vpop.f32.mrb[124].mxu1  ;;  %v4055_v6 = vpop.f32.mrb[109].mxu0 }
 0x787   :  { %v4171_v54 = vpop.f32.mrb[125].mxu1  ;;  %v9099_v30 = vpop.f32.mrb[110].mxu0 }
 0x788   :  { %v4071_v62 = vpack.c.bf16 %v9099_v30, %v9098_v37  ;;  %v9119_v40 = vpop.f32.mrb[126].mxu1  ;;  %v4058_v7 = vpop.f32.mrb[111].mxu0  ;;  %v9895_v37 = vld [vmem:[%s10793_s21 + $0x140] sm:$0xff]   ;;  %v9896_v30 = vld [vmem:[%s10793_s21 + $0x148] sm:$0xff]  }
 0x789   :  { %v4187_v52 = vpack.c.bf16 %v9119_v40, %v9118_v14  ;;  %v4070_v29 = vpack.c.bf16 %v4058_v7, %v4055_v6  ;;  %v4174_v57 = vpop.f32.mrb[127].mxu1 }
 0x78a   :  { %v4186_v42 = vpack.c.bf16 %v4174_v57, %v4171_v54  ;;  %v9899_v57 = vld [vmem:[%s10793_s21 + $0x160] sm:$0xff]  }
 0x78b   :  { %4458 = vmatpush1.bf16.msra.mxu0 %v4070_v29  ;;  %v9898_v29 = vld [vmem:[%s10793_s21 + $0x158] sm:$0xff]  }
 0x78c   :  { %4459 = vmatprep.subr.bf16.mxu0 %v11338_v15 }
 0x78f   :  { %4460 = vmatpush1.bf16.msra.mxu0 %v4071_v62 }
 0x790   :  { %4461 = vmatprep.subr.bf16.mxu0 %v11338_v15 }
 0x793   :  { %4462 = vmatpush1.bf16.msra.mxu0 %v4186_v42  ;;  %v9900_v42 = vld [vmem:[%s10793_s21 + $0x168] sm:$0xff]  }
 0x794   :  { %4463 = vmatprep.subr.bf16.mxu0 %v11338_v15 }
 0x797   :  { %4464 = vmatpush1.bf16.msra.mxu0 %v4187_v52  ;;  %v9897_v52 = vld [vmem:[%s10793_s21 + $0x150] sm:$0xff]  }
 0x798   :  { %4465 = vmatprep.subr.bf16.mxu0 %v11338_v15 }
 0x7a5   :  { %v9138_v46 = vpop.f32.mrb[112].mxu0 }
 0x7a6   :  { %v10957_v56 = vpop.f32.mrb[128].mxu1  ;;  %v4287_v63 = vpop.f32.mrb[113].mxu0 }
 0x7a7   :  { %v10959_v59 = vpop.f32.mrb[129].mxu1  ;;  %v9139_v41 = vpop.f32.mrb[114].mxu0 }
 0x7a8   :  { %v4303_v22 = vpack.c.bf16 %v9139_v41, %v9138_v46  ;;  %v10961_v61 = vpop.f32.mrb[130].mxu1  ;;  %v4290_v0 = vpop.f32.mrb[115].mxu0  ;;  %v9901_v46 = vld [vmem:[%s10793_s21 + $0x170] sm:$0xff]  }
 0x7a9   :  { %v4302_v10 = vpack.c.bf16 %v4290_v0, %v4287_v63  ;;  %v10963_v51 = vpop.f32.mrb[131].mxu1  ;;  %v9902_v0 = vld [vmem:[%s10793_s21 + $0x178] sm:$0xff]  }
 0x7ab   :  { %4466 = vmatpush1.bf16.msra.mxu0 %v4302_v10 }
 0x7ac   :  { %4467 = vmatprep.subr.bf16.mxu0 %v11338_v15 }
 0x7af   :  { %4468 = vmatpush1.bf16.msra.mxu0 %v4303_v22 }
 0x7b0   :  { %9184 = vmatprep.subr.bf16.mxu0 %v9876_v9 }
 0x7b2   :  { %4474 = vmatmul.mubr.bf16.vlgmr.msra.gmra.mrb[116].mxu0 %v9873_v11 }
 0x7b3   :  { %9185 = vmatpush3.bf16.msra.mxu0 %v9876_v9  ;;  %4481 = vmatprep.mubr.bf16.mxu0 %v9878_v35  ;;  %v9903_v35 = vld [vmem:[%s10793_s21 + $0x1c0] sm:$0xff]  }
 0x7b4   :  { %9186 = vmatprep.subr.bf16.mxu0 %v9877_v12 }
 0x7b7   :  { %9187 = vmatpush3.bf16.msra.mxu0 %v9877_v12 }
 0x7b8   :  { %9188 = vmatprep.subr.bf16.mxu0 %v9881_v18 }
 0x7ba   :  { %4482 = vmatmul.mubr.bf16.gmra.mrb[120].mxu0 %v9880_v50 }
 0x7bb   :  { %9189 = vmatpush3.bf16.msra.mxu0 %v9881_v18  ;;  %9200 = vmatprep.mubr.bf16.mxu0 %v10638_v5 }
 0x7bc   :  { %9190 = vmatprep.subr.bf16.mxu0 %v9882_v43 }
 0x7bf   :  { %9191 = vmatpush3.bf16.msra.mxu0 %v9882_v43  ;;  %v9904_v43 = vld [vmem:[%s10793_s21 + $0x1c8] sm:$0xff]  }
 0x7c0   :  { %9192 = vmatprep.subr.bf16.mxu0 %v9883_v44 }
 0x7c3   :  { %9193 = vmatpush3.bf16.msra.mxu0 %v9883_v44 }
 0x7c4   :  { %9194 = vmatprep.subr.bf16.mxu0 %v9884_v45 }
 0x7c6   :  { %v10977_v47 = vpop.f32.mrb[132].mxu1 }
 0x7c7   :  { %v10979_v17 = vpop.f32.mrb[133].mxu1  ;;  %9195 = vmatpush3.bf16.msra.mxu0 %v9884_v45 }
 0x7c8   :  { %v10981_v53 = vpop.f32.mrb[134].mxu1  ;;  %9196 = vmatprep.subr.bf16.mxu0 %v9885_v21 }
 0x7c9   :  { %v4691_v32 = vpack.c.bf16 %v10981_v53, %v10977_v47  ;;  %v10986_v16 = vpop.f32.mrb[135].mxu1 }
 0x7ca   :  { %v4690_v19 = vpack.c.bf16 %v10986_v16, %v10979_v17 }
 0x7cb   :  { %9197 = vmatpush3.bf16.msra.mxu0 %v9885_v21 }
 0x7cc   :  { %9198 = vmatprep.subr.bf16.mxu0 %v9886_v31 }
 0x7ce   :  { %v10991_v28 = vpop.f32.mrb[136].mxu1 }
 0x7cf   :  { %v10993_v33 = vpop.f32.mrb[137].mxu1  ;;  %9199 = vmatpush3.bf16.msra.mxu0 %v9886_v31  ;;  %v9905_v31 = vld [vmem:[%s10793_s21 + $0x1d0] sm:$0xff]  }
 0x7d0   :  { %v10995_v34 = vpop.f32.mrb[138].mxu1  ;;  %9232 = vmatprep.subr.bf16.mxu0 %v9887_v2 }
 0x7d1   :  { %v4693_v36 = vpack.c.bf16 %v10995_v34, %v10991_v28  ;;  %v11000_v26 = vpop.f32.mrb[139].mxu1 }
 0x7d2   :  { %v4692_v39 = vpack.c.bf16 %v11000_v26, %v10993_v33  ;;  %9201 = vmatmul.mubr.bf16.vlgmr.msra.gmra.mrb[124].mxu0 %v10640_v55 }
 0x7d3   :  { %9204 = vmatprep.mubr.bf16.mxu0 %v10642_v58  ;;  %9233 = vmatpush3.bf16.msra.mxu0 %v9887_v2  ;;  %v9906_v2 = vld [vmem:[%s10793_s21 + $0x1d8] sm:$0xff]  }
 0x7d4   :  { %9234 = vmatprep.subr.bf16.mxu0 %v9888_v25 }
 0x7d7   :  { %9235 = vmatpush3.bf16.msra.mxu0 %v9888_v25  ;;  %v9907_v25 = vld [vmem:[%s10793_s21 + $0x1e0] sm:$0xff]  }
 0x7d8   :  { %9236 = vmatprep.subr.bf16.mxu0 %v9889_v60 }
 0x7da   :  { %9205 = vmatmul.mubr.bf16.gmra.mrb[128].mxu0 %v10644_v8 }
 0x7db   :  { %9237 = vmatpush3.bf16.msra.mxu0 %v9889_v60  ;;  %9248 = vmatprep.mubr.bf16.mxu0 %v10638_v5  ;;  %v9908_v60 = vld [vmem:[%s10793_s21 + $0x1e8] sm:$0xff]  }
 0x7dc   :  { %9238 = vmatprep.subr.bf16.mxu0 %v9890_v38 }
 0x7df   :  { %9239 = vmatpush3.bf16.msra.mxu0 %v9890_v38  ;;  %v9909_v38 = vld [vmem:[%s10793_s21 + $0x1f0] sm:$0xff]  }
 0x7e0   :  { %9240 = vmatprep.subr.bf16.mxu0 %v9891_v23 }
 0x7e3   :  { %9241 = vmatpush3.bf16.msra.mxu0 %v9891_v23 }
 0x7e4   :  { %9242 = vmatprep.subr.bf16.mxu0 %v9892_v20 }
 0x7e6   :  { %v11013_v48 = vpop.f32.mrb[140].mxu1 }
 0x7e7   :  { %v11015_v24 = vpop.f32.mrb[141].mxu1  ;;  %9243 = vmatpush3.bf16.msra.mxu0 %v9892_v20 }
 0x7e8   :  { %v11017_v49 = vpop.f32.mrb[142].mxu1  ;;  %9244 = vmatprep.subr.bf16.mxu0 %v9893_v27 }
 0x7e9   :  { %v4959_v13 = vpack.c.bf16 %v11017_v49, %v11013_v48  ;;  %v11022_v1 = vpop.f32.mrb[143].mxu1 }
 0x7ea   :  { %v4958_v3 = vpack.c.bf16 %v11022_v1, %v11015_v24 }
 0x7eb   :  { %9245 = vmatpush3.bf16.msra.mxu0 %v9893_v27 }
 0x7ec   :  { %9246 = vmatprep.subr.bf16.mxu0 %v9894_v4 }
 0x7ee   :  { %v11027_v14 = vpop.f32.mrb[144].mxu1 }
 0x7ef   :  { %v11029_v6 = vpop.f32.mrb[145].mxu1  ;;  %9247 = vmatpush3.bf16.msra.mxu0 %v9894_v4  ;;  %v9910_v4 = vld [vmem:[%s10793_s21 + $0x1f8] sm:$0xff]   ;;  %s6925_s21 = sld [smem:[%s11306_s0 + %s10100_s9]]  }
 0x7f0   :  { %v11031_v54 = vpop.f32.mrb[146].mxu1  ;;  %9280 = vmatprep.subr.bf16.mxu0 %v9895_v37 }
 0x7f1   :  { %v4961_v62 = vpack.c.bf16 %v11031_v54, %v11027_v14  ;;  %v11036_v40 = vpop.f32.mrb[147].mxu1 }
 0x7f2   :  { %v4960_v7 = vpack.c.bf16 %v11036_v40, %v11029_v6  ;;  %9249 = vmatmul.mubr.bf16.vlgmr.msra.gmra.mrb[132].mxu0 %v10640_v55 }
 0x7f3   :  { %9252 = vmatprep.mubr.bf16.mxu0 %v10642_v58  ;;  %9281 = vmatpush3.bf16.msra.mxu0 %v9895_v37 }
 0x7f4   :  { %9282 = vmatprep.subr.bf16.mxu0 %v9896_v30 }
 0x7f7   :  { %9283 = vmatpush3.bf16.msra.mxu0 %v9896_v30 }
 0x7f8   :  { %9284 = vmatprep.subr.bf16.mxu0 %v9897_v52 }
 0x7fa   :  { %9253 = vmatmul.mubr.bf16.gmra.mrb[136].mxu0 %v10644_v8 }
 0x7fb   :  { %9285 = vmatpush3.bf16.msra.mxu0 %v9897_v52  ;;  %9296 = vmatprep.mubr.bf16.mxu0 %v10638_v5 }
 0x7fc   :  { %9286 = vmatprep.subr.bf16.mxu0 %v9898_v29 }
 0x7ff   :  { %9287 = vmatpush3.bf16.msra.mxu0 %v9898_v29 }
 0x800   :  { %9288 = vmatprep.subr.bf16.mxu0 %v9899_v57 }
 0x803   :  { %9289 = vmatpush3.bf16.msra.mxu0 %v9899_v57 }
 0x804   :  { %9290 = vmatprep.subr.bf16.mxu0 %v9900_v42 }
 0x806   :  { %v9274_v63 = vpop.f32.mrb[148].mxu1 }
 0x807   :  { %v5195_v41 = vpop.f32.mrb[149].mxu1  ;;  %9291 = vmatpush3.bf16.msra.mxu0 %v9900_v42 }
 0x808   :  { %v9275_v22 = vpop.f32.mrb[150].mxu1  ;;  %9292 = vmatprep.subr.bf16.mxu0 %v9901_v46 }
 0x809   :  { %v5227_v10 = vpack.c.bf16 %v9275_v22, %v9274_v63  ;;  %v5198_v9 = vpop.f32.mrb[151].mxu1 }
 0x80a   :  { %v5226_v11 = vpack.c.bf16 %v5198_v9, %v5195_v41 }
 0x80b   :  { %9293 = vmatpush3.bf16.msra.mxu0 %v9901_v46 }
 0x80c   :  { %9294 = vmatprep.subr.bf16.mxu0 %v9902_v0 }
 0x80e   :  { %v9278_v12 = vpop.f32.mrb[152].mxu1 }
 0x80f   :  { %v5211_v18 = vpop.f32.mrb[153].mxu1  ;;  %9295 = vmatpush3.bf16.msra.mxu0 %v9902_v0 }
 0x810   :  { %v9279_v50 = vpop.f32.mrb[154].mxu1  ;;  %9328 = vmatprep.subr.bf16.mxu0 %v9903_v35 }
 0x811   :  { %v5229_v44 = vpack.c.bf16 %v9279_v50, %v9278_v12  ;;  %v5214_v45 = vpop.f32.mrb[155].mxu1 }
 0x812   :  { %v5228_v21 = vpack.c.bf16 %v5214_v45, %v5211_v18  ;;  %9297 = vmatmul.mubr.bf16.vlgmr.msra.gmra.mrb[140].mxu0 %v10640_v55 }
 0x813   :  { %9300 = vmatprep.mubr.bf16.mxu0 %v10642_v58  ;;  %9329 = vmatpush3.bf16.msra.mxu0 %v9903_v35 }
 0x814   :  { %9330 = vmatprep.subr.bf16.mxu0 %v9904_v43 }
 0x817   :  { %9331 = vmatpush3.bf16.msra.mxu0 %v9904_v43 }
 0x818   :  { %9332 = vmatprep.subr.bf16.mxu0 %v9905_v31 }
 0x81a   :  { %9301 = vmatmul.mubr.bf16.gmra.mrb[144].mxu0 %v10644_v8 }
 0x81b   :  { %9333 = vmatpush3.bf16.msra.mxu0 %v9905_v31  ;;  %9344 = vmatprep.mubr.bf16.mxu0 %v10638_v5 }
 0x81c   :  { %9334 = vmatprep.subr.bf16.mxu0 %v9906_v2 }
 0x81f   :  { %9335 = vmatpush3.bf16.msra.mxu0 %v9906_v2 }
 0x820   :  { %9336 = vmatprep.subr.bf16.mxu0 %v9907_v25 }
 0x823   :  { %9337 = vmatpush3.bf16.msra.mxu0 %v9907_v25 }
 0x824   :  { %9338 = vmatprep.subr.bf16.mxu0 %v9908_v60 }
 0x826   :  { %v9322_v23 = vpop.f32.mrb[156].mxu1 }
 0x827   :  { %v5463_v20 = vpop.f32.mrb[157].mxu1  ;;  %9339 = vmatpush3.bf16.msra.mxu0 %v9908_v60 }
 0x828   :  { %v9323_v27 = vpop.f32.mrb[158].mxu1  ;;  %9340 = vmatprep.subr.bf16.mxu0 %v9909_v38 }
 0x829   :  { %v5495_v37 = vpack.c.bf16 %v9323_v27, %v9322_v23  ;;  %v5466_v30 = vpop.f32.mrb[159].mxu1 }
 0x82a   :  { %v5494_v52 = vpack.c.bf16 %v5466_v30, %v5463_v20 }
 0x82b   :  { %9341 = vmatpush3.bf16.msra.mxu0 %v9909_v38 }
 0x82c   :  { %8304 = vmatprep.subr.bf16.mxu1 %v5494_v52  ;;  %9342 = vmatprep.subr.bf16.mxu0 %v9910_v4 }
 0x82d   :  { %8305 = vmatpush3.bf16.msra.mxu1 %v5226_v11 }
 0x82e   :  { %v9326_v5 = vpop.f32.mrb[160].mxu1  ;;  %8306 = vmatprep.subr.bf16.mxu1 %v5495_v37 }
 0x82f   :  { %v5479_v29 = vpop.f32.mrb[161].mxu1  ;;  %9343 = vmatpush3.bf16.msra.mxu0 %v9910_v4 }
 0x830   :  { %v9327_v57 = vpop.f32.mrb[162].mxu1  ;;  %8264 = vmatprep.subr.bf16.mxu0 %v4958_v3 }
 0x831   :  { %v5497_v42 = vpack.c.bf16 %v9327_v57, %v9326_v5  ;;  %v5482_v46 = vpop.f32.mrb[163].mxu1  ;;  %8307 = vmatpush3.bf16.msra.mxu1 %v5227_v10 }
 0x832   :  { %v5496_v63 = vpack.c.bf16 %v5482_v46, %v5479_v29  ;;  %9345 = vmatmul.mubr.bf16.vlgmr.msra.gmra.mrb[148].mxu0 %v10640_v55 }
 0x833   :  { %9348 = vmatprep.mubr.bf16.mxu0 %v10642_v58  ;;  %8265 = vmatpush3.bf16.msra.mxu0 %v4690_v19  ;;  %v9913_v19 = vld [vmem:[%s10445_s3 + $0x4] ss:$16 sps:$4 sm:$0xff]  }
 0x834   :  { %8308 = vmatprep.subr.bf16.mxu1 %v5496_v63  ;;  %8266 = vmatprep.subr.bf16.mxu0 %v4959_v13 }
 0x835   :  { %8309 = vmatpush3.bf16.msra.mxu1 %v5228_v21 }
 0x836   :  { %8310 = vmatprep.subr.bf16.mxu1 %v5497_v42 }
 0x837   :  { %8267 = vmatpush3.bf16.msra.mxu0 %v4691_v32 }
 0x838   :  { %8268 = vmatprep.subr.bf16.mxu0 %v4960_v7 }
 0x839   :  { %8311 = vmatpush3.bf16.msra.mxu1 %v5229_v44 }
 0x83a   :  { %9349 = vmatmul.mubr.bf16.gmra.mrb[152].mxu0 %v10644_v8 }
 0x83b   :  { %8269 = vmatpush3.bf16.msra.mxu0 %v4692_v39  ;;  %5889 = vmatprep.mubr.bf16.mxu0 %v9913_v19 }
 0x83c   :  { %8270 = vmatprep.subr.bf16.mxu0 %v4961_v62 }
 0x83f   :  { %8271 = vmatpush3.bf16.msra.mxu0 %v4693_v36  ;;  %v7478_v36 = vld [vmem:[%s6916_s15] ss:$0 sm:$0xff]  ;;  %s10107_s15 = smov 26  }
 0x840   :  { %s6921_s17 = sld [smem:[%s11306_s0 + %s10107_s15]]  }
 0x846   :  { %v11089_v55 = vpop.f32.mrb[164].mxu1 }
 0x847   :  { %v11091_v58 = vpop.f32.mrb[165].mxu1 }
 0x848   :  { %v11093_v47 = vpop.f32.mrb[166].mxu1 }
 0x849   :  { %v11095_v17 = vpop.f32.mrb[167].mxu1 }
 0x84e   :  { %v11097_v8 = vpop.f32.mrb[168].mxu1 }
 0x84f   :  { %v11099_v53 = vpop.f32.mrb[169].mxu1 }
 0x850   :  { %v11101_v32 = vpop.f32.mrb[170].mxu1 }
 0x851   :  { %v11103_v16 = vpop.f32.mrb[171].mxu1 }
 0x885   :  { %v4475_v28 = vpop.f32.mrb[116].mxu0 }
 0x886   :  { %v4476_v33 = vadd.f32 %v4475_v28, %v10959_v59  ;;  %v4477_v34 = vpop.f32.mrb[117].mxu0 }
 0x887   :  { %v4478_v26 = vpop.f32.mrb[118].mxu0 }
 0x888   :  { %v4479_v39 = vadd.f32 %v4478_v26, %v10963_v51  ;;  %v4480_v48 = vpop.f32.mrb[119].mxu0  ;;  %v4497_v24 = vadd.f32 %v7478_v36, %v4476_v33  ;;  %v9925_v51 = vld [vmem:[%s10445_s3 + $0xc] ss:$16 sps:$4 sm:$0xff]  }
 0x889   :  { %5954 = vmatprep.mubr.bf16.mxu1 %v9925_v51  ;;  %v9914_v51 = vld [vmem:[%s10445_s3 + $0x24] ss:$16 sps:$4 sm:$0xff]  }
 0x88a   :  { %v4498_v49 = vadd.f32 %v7478_v36, %v4479_v39 }
 0x88c   :  { %v4503_v13 = vadd.f32 %v4498_v49, %v4497_v24 }
 0x88d   :  { %v4483_v1 = vpop.f32.mrb[120].mxu0 }
 0x88e   :  { %v4484_v3 = vadd.f32 %v10957_v56, %v4483_v1  ;;  %v4485_v14 = vpop.f32.mrb[121].mxu0 }
 0x88f   :  { %v4486_v6 = vpop.f32.mrb[122].mxu0 }
 0x890   :  { %v4499_v54 = vadd.f32 %v7478_v36, %v4484_v3  ;;  %v4487_v62 = vadd.f32 %v10961_v61, %v4486_v6  ;;  %v4488_v40 = vpop.f32.mrb[123].mxu0 }
 0x892   :  { %v4504_v59 = vadd.f32 %v4503_v13, %v4499_v54  ;;  %v4500_v7 = vadd.f32 %v7478_v36, %v4487_v62 }
 0x894   :  { %v4505_v41 = vadd.f32 %v4504_v59, %v4500_v7 }
 0x896   :  { %v4506_v22 = vrot.slane %v4505_v41, 4 }
 0x898   :  { %v4507_v0 = vadd.f32 %v4506_v22, %v4505_v41 }
 0x89a   :  { %v4508_v10 = vrot.slane %v4507_v0, 2 }
 0x89c   :  { %v4509_v9 = vadd.f32 %v4508_v10, %v4507_v0  ;;  %v9911_v0 = vld [vmem:[%s10445_s3] ss:$16 sps:$4 sm:$0xff]  }
 0x89d   :  { %v10019_v10 = vld [vmem:[%s10742_s29] sm:$0xff]  }
 0x89e   :  { %v4510_v11 = vrot.slane %v4509_v9, 1 }
 0x8a0   :  { %v4511_v35 = vadd.f32 %v4510_v11, %v4509_v9  ;;  %v10020_v9 = vld [vmem:[%s10742_s29 + $0x8] sm:$0xff]   ;;  %v9916_v11 = vld [vmem:[%s10445_s3 + $0x20] ss:$16 sps:$4 sm:$0xff]  }
 0x8a2   :  { %v4512_v12 = vmul.f32 0.03125, %v4511_v35  ;;  %v9917_v35 = vld [vmem:[%s10445_s3 + $0x44] ss:$16 sps:$4 sm:$0xff]  }
 0x8a4   :  { %v4513_v18 = vsub.f32 %v4497_v24, %v4512_v12  ;;  %v4514_v56 = vsub.f32 %v4498_v49, %v4512_v12  ;;  %v4515_v50 = vsub.f32 %v4499_v54, %v4512_v12  ;;  %v4516_v43 = vsub.f32 %v4500_v7, %v4512_v12  ;;  %v10021_v12 = vld [vmem:[%s10742_s29 + $0x10] sm:$0xff]  }
 0x8a5   :  { %v9202_v44 = vpop.f32.mrb[124].mxu0 }
 0x8a6   :  { %v4517_v45 = vmul.f32 %v4513_v18, %v4513_v18  ;;  %v4518_v61 = vmul.f32 %v4514_v56, %v4514_v56  ;;  %v4793_v21 = vpop.f32.mrb[125].mxu0  ;;  %v4519_v2 = vmul.f32 %v4515_v50, %v4515_v50  ;;  %v4520_v20 = vmul.f32 %v4516_v43, %v4516_v43 }
 0x8a7   :  { %v9203_v31 = vpop.f32.mrb[126].mxu0 }
 0x8a8   :  { %v4521_v25 = vadd.f32 %v4518_v61, %v4517_v45  ;;  %v4825_v60 = vpack.c.bf16 %v9203_v31, %v9202_v44  ;;  %v4796_v38 = vpop.f32.mrb[127].mxu0  ;;  %v9919_v44 = vld [vmem:[%s10445_s3 + $0x40] ss:$16 sps:$4 sm:$0xff]  }
 0x8a9   :  { %v4824_v23 = vpack.c.bf16 %v4796_v38, %v4793_v21  ;;  %v9920_v21 = vld [vmem:[%s10445_s3 + $0x64] ss:$16 sps:$4 sm:$0xff]  }
 0x8aa   :  { %v4522_v27 = vadd.f32 %v4521_v25, %v4519_v2  ;;  %v10023_v2 = vld [vmem:[%s10742_s29 + $0x20] sm:$0xff]  }
 0x8ac   :  { %v4523_v4 = vadd.f32 %v4522_v27, %v4520_v20  ;;  %v9922_v20 = vld [vmem:[%s10445_s3 + $0x60] ss:$16 sps:$4 sm:$0xff]  }
 0x8ad   :  { %v9206_v37 = vpop.f32.mrb[128].mxu0 }
 0x8ae   :  { %v4524_v30 = vrot.slane %v4523_v4, 4  ;;  %v4809_v52 = vpop.f32.mrb[129].mxu0 }
 0x8af   :  { %v9207_v5 = vpop.f32.mrb[130].mxu0 }
 0x8b0   :  { %v4525_v29 = vadd.f32 %v4524_v30, %v4523_v4  ;;  %v4827_v57 = vpack.c.bf16 %v9207_v5, %v9206_v37  ;;  %v4812_v42 = vpop.f32.mrb[131].mxu0  ;;  %v10025_v30 = vld [vmem:[%s10742_s29 + $0x30] sm:$0xff]   ;;  %v11138_v5 = vld [vmem:[%s10742_s29 + $0x80] sm:$0xff]  }
 0x8b1   :  { %v4826_v46 = vpack.c.bf16 %v4812_v42, %v4809_v52  ;;  %v10026_v52 = vld [vmem:[%s10742_s29 + $0x38] sm:$0xff]  }
 0x8b2   :  { %v4526_v63 = vrot.slane %v4525_v29, 2 }
 0x8b4   :  { %v4527_v19 = vadd.f32 %v4526_v63, %v4525_v29 }
 0x8b6   :  { %v4528_v28 = vrot.slane %v4527_v19, 1 }
 0x8b8   :  { %v4529_v33 = vadd.f32 %v4528_v28, %v4527_v19 }
 0x8ba   :  { %v4530_v34 = vmul.f32 0.03125, %v4529_v33 }
 0x8bc   :  { %v4531_v36 = vadd.f32 1e-05, %v4530_v34 }
 0x8be   :  { %9953 = vrsqrt.f32 %v4531_v36 }
 0x8c5   :  { %v9250_v26 = vpop.f32.mrb[132].mxu0 }
 0x8c6   :  { %v5061_v39 = vpop.f32.mrb[133].mxu0 }
 0x8c7   :  { %v9251_v48 = vpop.f32.mrb[134].mxu0 }
 0x8c8   :  { %v9954_v24 = vpop.eup %9953  ;;  %v5093_v49 = vpack.c.bf16 %v9251_v48, %v9250_v26  ;;  %v5064_v13 = vpop.f32.mrb[135].mxu0  ;;  %v9923_v48 = vld [vmem:[%s10445_s3 + $0x8] ss:$16 sps:$4 sm:$0xff]  }
 0x8c9   :  { %v11114_v1 = vmul.f32 %v9954_v24, %v4516_v43  ;;  %v5092_v3 = vpack.c.bf16 %v5064_v13, %v5061_v39  ;;  %v11116_v14 = vmul.f32 %v9954_v24, %v4513_v18  ;;  %v11118_v6 = vmul.f32 %v9954_v24, %v4514_v56  ;;  %v10022_v56 = vld [vmem:[%s10742_s29 + $0x18] sm:$0xff]   ;;  %v10029_v13 = vld [vmem:[%s10742_s29 + $0x48] sm:$0xff]  }
 0x8ca   :  { %v11120_v54 = vmul.f32 %v9954_v24, %v4515_v50  ;;  %v9926_v24 = vld [vmem:[%s10445_s3 + $0x2c] ss:$16 sps:$4 sm:$0xff]  }
 0x8cb   :  { %8272 = vmatprep.subr.bf16.mxu0 %v5092_v3  ;;  %v9928_v3 = vld [vmem:[%s10445_s3 + $0x28] ss:$16 sps:$4 sm:$0xff]  }
 0x8cc   :  { %8273 = vmatpush3.bf16.msra.mxu0 %v4824_v23 }
 0x8cd   :  { %v9254_v62 = vpop.f32.mrb[136].mxu0  ;;  %8274 = vmatprep.subr.bf16.mxu0 %v5093_v49  ;;  %v10028_v49 = vld [vmem:[%s10742_s29 + $0x40] sm:$0xff]  }
 0x8ce   :  { %v5077_v40 = vpop.f32.mrb[137].mxu0 }
 0x8cf   :  { %v9255_v59 = vpop.f32.mrb[138].mxu0 }
 0x8d0   :  { %v5095_v7 = vpack.c.bf16 %v9255_v59, %v9254_v62  ;;  %v5080_v41 = vpop.f32.mrb[139].mxu0  ;;  %8275 = vmatpush3.bf16.msra.mxu0 %v4825_v60  ;;  %v10024_v60 = vld [vmem:[%s10742_s29 + $0x28] sm:$0xff]   ;;  %v10031_v59 = vld [vmem:[%s10742_s29 + $0x58] sm:$0xff]  }
 0x8d1   :  { %v5094_v22 = vpack.c.bf16 %v5080_v41, %v5077_v40  ;;  %v9929_v62 = vld [vmem:[%s10445_s3 + $0x4c] ss:$16 sps:$4 sm:$0xff]   ;;  %v10030_v40 = vld [vmem:[%s10742_s29 + $0x50] sm:$0xff]  }
 0x8d2   :  { %v9932_v41 = vld [vmem:[%s10445_s3 + $0x6c] ss:$16 sps:$4 sm:$0xff]  }
 0x8d3   :  { %8276 = vmatprep.subr.bf16.mxu0 %v5094_v22  ;;  %v10032_v22 = vld [vmem:[%s10742_s29 + $0x60] sm:$0xff]  }
 0x8d4   :  { %8277 = vmatpush3.bf16.msra.mxu0 %v4826_v46 }
 0x8d5   :  { %8278 = vmatprep.subr.bf16.mxu0 %v5095_v7  ;;  %v9931_v7 = vld [vmem:[%s10445_s3 + $0x48] ss:$16 sps:$4 sm:$0xff]  }
 0x8d8   :  { %8279 = vmatpush3.bf16.msra.mxu0 %v4827_v57 }
 0x8d9   :  { %9376 = vmatprep.subr.bf16.mxu0 %v10019_v10 }
 0x8db   :  { %5890 = vmatmul.mubr.bf16.vlgmr.msra.gmra.mrb[156].mxu0 %v9911_v0  ;;  %v10033_v0 = vld [vmem:[%s10742_s29 + $0x68] sm:$0xff]  }
 0x8dc   :  { %5897 = vmatprep.mubr.bf16.mxu0 %v9914_v51  ;;  %9377 = vmatpush3.bf16.msra.mxu0 %v10019_v10  ;;  %v9934_v51 = vld [vmem:[%s10445_s3 + $0x68] ss:$16 sps:$4 sm:$0xff]   ;;  %v10034_v10 = vld [vmem:[%s10742_s29 + $0x70] sm:$0xff]   ;;  %s10099_s3 = smov 29  }
 0x8dd   :  { %9378 = vmatprep.subr.bf16.mxu0 %v10020_v9  ;;  %s6924_s18 = sld [smem:[%s11306_s0 + %s10099_s3]]  }
 0x8e0   :  { %9379 = vmatpush3.bf16.msra.mxu0 %v10020_v9  ;;  %v10035_v9 = vld [vmem:[%s10742_s29 + $0x78] sm:$0xff]  }
 0x8e1   :  { %9380 = vmatprep.subr.bf16.mxu0 %v10021_v12 }
 0x8e3   :  { %5898 = vmatmul.mubr.bf16.gmra.mrb[160].mxu0 %v9916_v11  ;;  %v11157_v11 = vld [vmem:[%s10742_s29 + $0xc0] sm:$0xff]  }
 0x8e4   :  { %5905 = vmatprep.mubr.bf16.mxu0 %v9917_v35  ;;  %9381 = vmatpush3.bf16.msra.mxu0 %v10021_v12 }
 0x8e5   :  { %v9298_v18 = vpop.f32.mrb[140].mxu0  ;;  %9382 = vmatprep.subr.bf16.mxu0 %v10022_v56 }
 0x8e6   :  { %v5329_v50 = vpop.f32.mrb[141].mxu0 }
 0x8e7   :  { %v9299_v43 = vpop.f32.mrb[142].mxu0 }
 0x8e8   :  { %v5361_v45 = vpack.c.bf16 %v9299_v43, %v9298_v18  ;;  %v5332_v61 = vpop.f32.mrb[143].mxu0  ;;  %9383 = vmatpush3.bf16.msra.mxu0 %v10022_v56 }
 0x8e9   :  { %v5360_v31 = vpack.c.bf16 %v5332_v61, %v5329_v50  ;;  %9384 = vmatprep.subr.bf16.mxu0 %v10023_v2 }
 0x8eb   :  { %5906 = vmatmul.mubr.bf16.gmra.mrb[164].mxu0 %v9919_v44 }
 0x8ec   :  { %5913 = vmatprep.mubr.bf16.mxu0 %v9920_v21  ;;  %9385 = vmatpush3.bf16.msra.mxu0 %v10023_v2 }
 0x8ed   :  { %v9302_v25 = vpop.f32.mrb[144].mxu0  ;;  %9386 = vmatprep.subr.bf16.mxu0 %v10024_v60 }
 0x8ee   :  { %v5345_v38 = vpop.f32.mrb[145].mxu0 }
 0x8ef   :  { %v9303_v23 = vpop.f32.mrb[146].mxu0 }
 0x8f0   :  { %v5363_v27 = vpack.c.bf16 %v9303_v23, %v9302_v25  ;;  %v5348_v4 = vpop.f32.mrb[147].mxu0  ;;  %9387 = vmatpush3.bf16.msra.mxu0 %v10024_v60 }
 0x8f1   :  { %v5362_v37 = vpack.c.bf16 %v5348_v4, %v5345_v38  ;;  %9388 = vmatprep.subr.bf16.mxu0 %v10025_v30 }
 0x8f3   :  { %5914 = vmatmul.mubr.bf16.gmra.mrb[168].mxu0 %v9922_v20 }
 0x8f4   :  { %9389 = vmatpush3.bf16.msra.mxu0 %v10025_v30 }
 0x8f5   :  { %9390 = vmatprep.subr.bf16.mxu0 %v10026_v52 }
 0x8f8   :  { %9391 = vmatpush3.bf16.msra.mxu0 %v10026_v52 }
 0x8f9   :  { %9424 = vmatprep.subr.bf16.mxu0 %v11138_v5 }
 0x905   :  { %v9346_v29 = vpop.f32.mrb[148].mxu0 }
 0x906   :  { %v5597_v57 = vpop.f32.mrb[149].mxu0 }
 0x907   :  { %v9347_v42 = vpop.f32.mrb[150].mxu0 }
 0x908   :  { %v5629_v46 = vpack.c.bf16 %v9347_v42, %v9346_v29  ;;  %v5600_v63 = vpop.f32.mrb[151].mxu0 }
 0x909   :  { %v5628_v19 = vpack.c.bf16 %v5600_v63, %v5597_v57 }
 0x90b   :  { %8312 = vmatprep.subr.bf16.mxu1 %v5628_v19 }
 0x90c   :  { %8313 = vmatpush3.bf16.msra.mxu1 %v5360_v31 }
 0x90d   :  { %v9350_v28 = vpop.f32.mrb[152].mxu0  ;;  %8314 = vmatprep.subr.bf16.mxu1 %v5629_v46 }
 0x90e   :  { %v5613_v33 = vpop.f32.mrb[153].mxu0 }
 0x90f   :  { %v9351_v34 = vpop.f32.mrb[154].mxu0 }
 0x910   :  { %v5631_v36 = vpack.c.bf16 %v9351_v34, %v9350_v28  ;;  %v5616_v26 = vpop.f32.mrb[155].mxu0  ;;  %8315 = vmatpush3.bf16.msra.mxu1 %v5361_v45 }
 0x911   :  { %v5630_v39 = vpack.c.bf16 %v5616_v26, %v5613_v33 }
 0x913   :  { %8316 = vmatprep.subr.bf16.mxu1 %v5630_v39  ;;  %v7681_v39 = vld [vmem:[%s6924_s18] ss:$0 sm:$0xff]  ;;  %s10108_s18 = smov 5  }
 0x914   :  { %8317 = vmatpush3.bf16.msra.mxu1 %v5362_v37  ;;  %s6900_s20 = sld [smem:[%s11306_s0 + %s10108_s18]]  }
 0x915   :  { %8318 = vmatprep.subr.bf16.mxu1 %v5631_v36 }
 0x918   :  { %8319 = vmatpush3.bf16.msra.mxu1 %v5363_v27 }
 0x919   :  { %9400 = vmatprep.subr.bf16.mxu1 %v10028_v49 }
 0x91b   :  { %5955 = vmatmul.mubr.bf16.vlgmr.msra.gmra.mrb[172].mxu1 %v9923_v48 }
 0x91c   :  { %5962 = vmatprep.mubr.bf16.mxu1 %v9926_v24  ;;  %9401 = vmatpush3.bf16.msra.mxu1 %v10028_v49 }
 0x91d   :  { %9402 = vmatprep.subr.bf16.mxu1 %v10029_v13 }
 0x920   :  { %9403 = vmatpush3.bf16.msra.mxu1 %v10029_v13 }
 0x921   :  { %9404 = vmatprep.subr.bf16.mxu1 %v10030_v40 }
 0x923   :  { %5963 = vmatmul.mubr.bf16.gmra.mrb[176].mxu1 %v9928_v3 }
 0x924   :  { %5970 = vmatprep.mubr.bf16.mxu1 %v9929_v62  ;;  %9405 = vmatpush3.bf16.msra.mxu1 %v10030_v40 }
 0x925   :  { %9406 = vmatprep.subr.bf16.mxu1 %v10031_v59 }
 0x928   :  { %9407 = vmatpush3.bf16.msra.mxu1 %v10031_v59 }
 0x929   :  { %9408 = vmatprep.subr.bf16.mxu1 %v10032_v22 }
 0x92b   :  { %5971 = vmatmul.mubr.bf16.gmra.mrb[180].mxu1 %v9931_v7 }
 0x92c   :  { %5978 = vmatprep.mubr.bf16.mxu1 %v9932_v41  ;;  %9409 = vmatpush3.bf16.msra.mxu1 %v10032_v22 }
 0x92d   :  { %9410 = vmatprep.subr.bf16.mxu1 %v10033_v0 }
 0x930   :  { %9411 = vmatpush3.bf16.msra.mxu1 %v10033_v0 }
 0x931   :  { %9412 = vmatprep.subr.bf16.mxu1 %v10034_v10 }
 0x933   :  { %5979 = vmatmul.mubr.bf16.gmra.mrb[184].mxu1 %v9934_v51 }
 0x934   :  { %9413 = vmatpush3.bf16.msra.mxu1 %v10034_v10 }
 0x935   :  { %9414 = vmatprep.subr.bf16.mxu1 %v10035_v9 }
 0x938   :  { %9415 = vmatpush3.bf16.msra.mxu1 %v10035_v9 }
 0x939   :  { %9448 = vmatprep.subr.bf16.mxu1 %v11157_v11 }
 0x9ae   :  { %v8280_v35 = vpop.f32.mrb[156].mxu0 }
 0x9af   :  { %v8281_v12 = vpop.f32.mrb[157].mxu0 }
 0x9b0   :  { %v8282_v18 = vadd.f32 %v8281_v12, %v8280_v35  ;;  %v8283_v56 = vpop.f32.mrb[158].mxu0 }
 0x9b1   :  { %v8284_v50 = vpop.f32.mrb[159].mxu0 }
 0x9b2   :  { %v5892_v43 = vadd.f32 %v8282_v18, %v11091_v58  ;;  %v8285_v44 = vadd.f32 %v8284_v50, %v8283_v56 }
 0x9b4   :  { %v5895_v45 = vadd.f32 %v8285_v44, %v11095_v17 }
 0x9b6   :  { %v8286_v61 = vpop.f32.mrb[160].mxu0 }
 0x9b7   :  { %v8287_v21 = vpop.f32.mrb[161].mxu0 }
 0x9b8   :  { %v8288_v31 = vadd.f32 %v8287_v21, %v8286_v61  ;;  %v8289_v2 = vpop.f32.mrb[162].mxu0 }
 0x9b9   :  { %v8290_v25 = vpop.f32.mrb[163].mxu0 }
 0x9ba   :  { %v5900_v60 = vadd.f32 %v11089_v55, %v8288_v31  ;;  %v8291_v38 = vadd.f32 %v8290_v25, %v8289_v2 }
 0x9bc   :  { %v5903_v23 = vadd.f32 %v11093_v47, %v8291_v38 }
 0x9be   :  { %v8292_v20 = vpop.f32.mrb[164].mxu0 }
 0x9bf   :  { %v8293_v27 = vpop.f32.mrb[165].mxu0 }
 0x9c0   :  { %v8294_v4 = vadd.f32 %v8293_v27, %v8292_v20  ;;  %v8295_v37 = vpop.f32.mrb[166].mxu0 }
 0x9c1   :  { %v8296_v30 = vpop.f32.mrb[167].mxu0 }
 0x9c2   :  { %v5908_v58 = vadd.f32 %v8294_v4, %v11099_v53  ;;  %v8297_v52 = vadd.f32 %v8296_v30, %v8295_v37 }
 0x9c4   :  { %v5911_v17 = vadd.f32 %v8297_v52, %v11103_v16 }
 0x9c6   :  { %v8298_v29 = vpop.f32.mrb[168].mxu0 }
 0x9c7   :  { %v8299_v57 = vpop.f32.mrb[169].mxu0 }
 0x9c8   :  { %v8300_v42 = vadd.f32 %v8299_v57, %v8298_v29  ;;  %v8301_v46 = vpop.f32.mrb[170].mxu0 }
 0x9c9   :  { %v8302_v63 = vpop.f32.mrb[171].mxu0 }
 0x9ca   :  { %v5916_v55 = vadd.f32 %v11097_v8, %v8300_v42  ;;  %v8303_v19 = vadd.f32 %v8302_v63, %v8301_v46 }
 0x9cc   :  { %v5919_v47 = vadd.f32 %v11101_v32, %v8303_v19 }
 0x9ee   :  { %v8320_v28 = vpop.f32.mrb[172].mxu1 }
 0x9ef   :  { %v8321_v53 = vpop.f32.mrb[173].mxu1 }
 0x9f0   :  { %v8322_v33 = vadd.f32 %v8321_v53, %v8320_v28  ;;  %v8323_v34 = vpop.f32.mrb[174].mxu1 }
 0x9f1   :  { %v8324_v16 = vpop.f32.mrb[175].mxu1 }
 0x9f2   :  { %v5957_v36 = vadd.f32 %v8322_v33, %v5892_v43  ;;  %v8325_v26 = vadd.f32 %v8324_v16, %v8323_v34 }
 0x9f4   :  { %v5960_v48 = vadd.f32 %v8325_v26, %v5895_v45  ;;  %v5994_v24 = vadd.f32 %v7681_v39, %v5957_v36 }
 0x9f6   :  { %v5995_v49 = vadd.f32 %v7681_v39, %v5960_v48  ;;  %v8326_v8 = vpop.f32.mrb[176].mxu1 }
 0x9f7   :  { %v8327_v13 = vpop.f32.mrb[177].mxu1 }
 0x9f8   :  { %v6004_v3 = vadd.f32 %v5995_v49, %v5994_v24  ;;  %v8328_v32 = vadd.f32 %v8327_v13, %v8326_v8  ;;  %v8329_v62 = vpop.f32.mrb[178].mxu1 }
 0x9f9   :  { %v8330_v40 = vpop.f32.mrb[179].mxu1 }
 0x9fa   :  { %v5965_v59 = vadd.f32 %v8328_v32, %v5900_v60  ;;  %v8331_v7 = vadd.f32 %v8330_v40, %v8329_v62 }
 0x9fc   :  { %v5996_v41 = vadd.f32 %v7681_v39, %v5965_v59  ;;  %v5968_v22 = vadd.f32 %v8331_v7, %v5903_v23 }
 0x9fe   :  { %v6005_v0 = vadd.f32 %v6004_v3, %v5996_v41  ;;  %v5997_v51 = vadd.f32 %v7681_v39, %v5968_v22  ;;  %v8332_v10 = vpop.f32.mrb[180].mxu1 }
 0x9ff   :  { %v8333_v9 = vpop.f32.mrb[181].mxu1 }
 0xa00   :  { %v6006_v35 = vadd.f32 %v6005_v0, %v5997_v51  ;;  %v8334_v12 = vadd.f32 %v8333_v9, %v8332_v10  ;;  %v8335_v18 = vpop.f32.mrb[182].mxu1 }
 0xa01   :  { %v8336_v56 = vpop.f32.mrb[183].mxu1 }
 0xa02   :  { %v5973_v50 = vadd.f32 %v8334_v12, %v5908_v58  ;;  %v8337_v43 = vadd.f32 %v8336_v56, %v8335_v18 }
 0xa04   :  { %v5998_v44 = vadd.f32 %v7681_v39, %v5973_v50  ;;  %v5976_v45 = vadd.f32 %v8337_v43, %v5911_v17  ;;  %v7682_v43 = vld [vmem:[%s6925_s21] ss:$0 sm:$0xff]  ;;  %s10109_s21 = smov 33  }
 0xa05   :  { %s6928_s24 = sld [smem:[%s11306_s0 + %s10109_s21]]  }
 0xa06   :  { %v6007_v61 = vadd.f32 %v6006_v35, %v5998_v44  ;;  %v5999_v21 = vadd.f32 %v7681_v39, %v5976_v45  ;;  %v8338_v31 = vpop.f32.mrb[184].mxu1 }
 0xa07   :  { %v8339_v2 = vpop.f32.mrb[185].mxu1 }
 0xa08   :  { %v6008_v25 = vadd.f32 %v6007_v61, %v5999_v21  ;;  %v8340_v60 = vadd.f32 %v8339_v2, %v8338_v31  ;;  %v8341_v38 = vpop.f32.mrb[186].mxu1  ;;  %v7683_v31 = vld [vmem:[%s6926_s6] ss:$0 sm:$0xff] }
 0xa09   :  { %v8342_v23 = vpop.f32.mrb[187].mxu1 }
 0xa0a   :  { %v5981_v20 = vadd.f32 %v8340_v60, %v5916_v55  ;;  %v8343_v27 = vadd.f32 %v8342_v23, %v8341_v38 }
 0xa0c   :  { %v6000_v4 = vadd.f32 %v7681_v39, %v5981_v20  ;;  %v5984_v37 = vadd.f32 %v8343_v27, %v5919_v47 }
 0xa0e   :  { %v6009_v30 = vadd.f32 %v6008_v25, %v6000_v4  ;;  %v6001_v52 = vadd.f32 %v7681_v39, %v5984_v37 }
 0xa10   :  { %v6010_v29 = vadd.f32 %v6009_v30, %v6001_v52 }
 0xa12   :  { %v6011_v57 = vrot.slane %v6010_v29, 4 }
 0xa14   :  { %v6012_v58 = vadd.f32 %v6011_v57, %v6010_v29 }
 0xa16   :  { %v6013_v42 = vrot.slane %v6012_v58, 2 }
 0xa18   :  { %v6014_v46 = vadd.f32 %v6013_v42, %v6012_v58 }
 0xa1a   :  { %v6015_v17 = vrot.slane %v6014_v46, 1 }
 0xa1c   :  { %v6016_v63 = vadd.f32 %v6015_v17, %v6014_v46 }
 0xa1e   :  { %v6017_v19 = vmul.f32 0.015625, %v6016_v63 }
 0xa20   :  { %v6018_v28 = vsub.f32 %v5994_v24, %v6017_v19  ;;  %v6019_v53 = vsub.f32 %v5995_v49, %v6017_v19  ;;  %v6020_v33 = vsub.f32 %v5996_v41, %v6017_v19  ;;  %v6021_v34 = vsub.f32 %v5997_v51, %v6017_v19 }
 0xa21   :  { %v6022_v16 = vsub.f32 %v5998_v44, %v6017_v19  ;;  %v6023_v36 = vsub.f32 %v5999_v21, %v6017_v19  ;;  %v6024_v55 = vsub.f32 %v6000_v4, %v6017_v19  ;;  %v6025_v26 = vsub.f32 %v6001_v52, %v6017_v19 }
 0xa22   :  { %v6026_v48 = vmul.f32 %v6018_v28, %v6018_v28  ;;  %v6027_v47 = vmul.f32 %v6019_v53, %v6019_v53  ;;  %v6028_v8 = vmul.f32 %v6020_v33, %v6020_v33  ;;  %v6029_v13 = vmul.f32 %v6021_v34, %v6021_v34 }
 0xa23   :  { %v6030_v32 = vmul.f32 %v6022_v16, %v6022_v16  ;;  %v6031_v40 = vmul.f32 %v6023_v36, %v6023_v36  ;;  %v6032_v7 = vmul.f32 %v6024_v55, %v6024_v55  ;;  %v6033_v24 = vmul.f32 %v6025_v26, %v6025_v26 }
 0xa24   :  { %v6034_v39 = vadd.f32 %v6027_v47, %v6026_v48 }
 0xa26   :  { %v6035_v3 = vadd.f32 %v6034_v39, %v6028_v8 }
 0xa28   :  { %v6036_v62 = vadd.f32 %v6035_v3, %v6029_v13  ;;  %v10037_v3 = vld [vmem:[%s10742_s29 + $0x88] sm:$0xff]  }
 0xa2a   :  { %v6037_v59 = vadd.f32 %v6036_v62, %v6030_v32  ;;  %v10038_v32 = vld [vmem:[%s10742_s29 + $0xc8] sm:$0xff]   ;;  %v10039_v62 = vld [vmem:[%s10742_s29 + $0x90] sm:$0xff]  }
 0xa2c   :  { %v6038_v22 = vadd.f32 %v6037_v59, %v6031_v40  ;;  %v10040_v40 = vld [vmem:[%s10742_s29 + $0xd0] sm:$0xff]   ;;  %v10043_v59 = vld [vmem:[%s10742_s29 + $0xa0] sm:$0xff]  }
 0xa2e   :  { %v6039_v49 = vadd.f32 %v6038_v22, %v6032_v7  ;;  %v10044_v7 = vld [vmem:[%s10742_s29 + $0xe0] sm:$0xff]   ;;  %v10045_v22 = vld [vmem:[%s10742_s29 + $0xa8] sm:$0xff]  }
 0xa30   :  { %v6040_v41 = vadd.f32 %v6039_v49, %v6033_v24  ;;  %v10046_v24 = vld [vmem:[%s10742_s29 + $0xe8] sm:$0xff]   ;;  %v10047_v49 = vld [vmem:[%s10742_s29 + $0xb0] sm:$0xff]  }
 0xa32   :  { %v6041_v0 = vrot.slane %v6040_v41, 4 }
 0xa34   :  { %v6042_v51 = vadd.f32 %v6041_v0, %v6040_v41  ;;  %v10048_v41 = vld [vmem:[%s10742_s29 + $0xf0] sm:$0xff]   ;;  %v10049_v0 = vld [vmem:[%s10742_s29 + $0xb8] sm:$0xff]  }
 0xa36   :  { %v6043_v10 = vrot.slane %v6042_v51, 2 }
 0xa38   :  { %v6044_v9 = vadd.f32 %v6043_v10, %v6042_v51  ;;  %v10050_v51 = vld [vmem:[%s10742_s29 + $0xf8] sm:$0xff]   ;;  %v10051_v10 = vld [vmem:[%s10742_s29 + $0x100] sm:$0xff]  }
 0xa3a   :  { %v6045_v35 = vrot.slane %v6044_v9, 1 }
 0xa3c   :  { %v6046_v12 = vadd.f32 %v6045_v35, %v6044_v9  ;;  %v10052_v9 = vld [vmem:[%s10742_s29 + $0x140] sm:$0xff]   ;;  %v10053_v35 = vld [vmem:[%s10742_s29 + $0x108] sm:$0xff]  }
 0xa3e   :  { %v6047_v18 = vmul.f32 0.015625, %v6046_v12  ;;  %v10054_v12 = vld [vmem:[%s10742_s29 + $0x148] sm:$0xff]  }
 0xa40   :  { %v6048_v56 = vadd.f32 1e-05, %v6047_v18  ;;  %v10055_v18 = vld [vmem:[%s10742_s29 + $0x110] sm:$0xff]  }
 0xa42   :  { %9955 = vrsqrt.f32 %v6048_v56  ;;  %v10056_v56 = vld [vmem:[%s10742_s29 + $0x150] sm:$0xff]  }
 0xa4c   :  { %v9956_v50 = vpop.eup %9955 }
 0xa4d   :  { %v6050_v44 = vmul.f32 %v9956_v50, %v6018_v28  ;;  %v6051_v45 = vmul.f32 %v9956_v50, %v6019_v53  ;;  %v6052_v61 = vmul.f32 %v9956_v50, %v6020_v33  ;;  %v6053_v21 = vmul.f32 %v9956_v50, %v6021_v34 }
 0xa4e   :  { %v6054_v2 = vmul.f32 %v9956_v50, %v6022_v16  ;;  %v6055_v25 = vmul.f32 %v9956_v50, %v6023_v36  ;;  %v6056_v60 = vmul.f32 %v9956_v50, %v6024_v55  ;;  %v6057_v38 = vmul.f32 %v9956_v50, %v6025_v26  ;;  %v10057_v50 = vld [vmem:[%s10742_s29 + $0x118] sm:$0xff]  }
 0xa4f   :  { %v6067_v23 = vmul.f32 %v7682_v43, %v6053_v21  ;;  %v6064_v20 = vmul.f32 %v7682_v43, %v6050_v44  ;;  %v6065_v27 = vmul.f32 %v7682_v43, %v6051_v45  ;;  %v6066_v4 = vmul.f32 %v7682_v43, %v6052_v61  ;;  %v10059_v44 = vld [vmem:[%s10742_s29 + $0x120] sm:$0xff]   ;;  %v10061_v61 = vld [vmem:[%s10742_s29 + $0x128] sm:$0xff]  }
 0xa50   :  { %v6068_v37 = vmul.f32 %v7682_v43, %v6054_v2  ;;  %v6069_v30 = vmul.f32 %v7682_v43, %v6055_v25  ;;  %v6070_v52 = vmul.f32 %v7682_v43, %v6056_v60  ;;  %v6071_v29 = vmul.f32 %v7682_v43, %v6057_v38  ;;  %v10058_v43 = vld [vmem:[%s10742_s29 + $0x158] sm:$0xff]   ;;  %v10060_v45 = vld [vmem:[%s10742_s29 + $0x160] sm:$0xff]   ;;  %v10062_v21 = vld [vmem:[%s10742_s29 + $0x168] sm:$0xff]  }
 0xa51   :  { %v6078_v57 = vadd.f32 %v7683_v31, %v6064_v20  ;;  %v6079_v58 = vadd.f32 %v7683_v31, %v6065_v27  ;;  %v6080_v42 = vadd.f32 %v7683_v31, %v6066_v4  ;;  %v6081_v46 = vadd.f32 %v7683_v31, %v6067_v23  ;;  %v10064_v2 = vld [vmem:[%s10742_s29 + $0x170] sm:$0xff]   ;;  %v10065_v25 = vld [vmem:[%s10742_s29 + $0x138] sm:$0xff]   ;;  %v10067_v38 = vld [vmem:[%s10742_s29 + $0x180] sm:$0xff]  }
 0xa52   :  { %v6083_v17 = vadd.f32 %v7683_v31, %v6069_v30  ;;  %v6084_v63 = vadd.f32 %v7683_v31, %v6070_v52  ;;  %v6085_v19 = vadd.f32 %v7683_v31, %v6071_v29  ;;  %v6082_v28 = vadd.f32 %v7683_v31, %v6068_v37  ;;  %v10063_v31 = vld [vmem:[%s10742_s29 + $0x130] sm:$0xff]   ;;  %v10066_v60 = vld [vmem:[%s10742_s29 + $0x178] sm:$0xff]   ;;  %v10068_v23 = vld [vmem:[%s10742_s29 + $0x188] sm:$0xff]  }
 0xa53   :  { %v6086_v53 = vmax.f32 %v6078_v57, 0.0  ;;  %v6087_v33 = vmax.f32 %v6079_v58, 0.0  ;;  %v6088_v34 = vmax.f32 %v6080_v42, 0.0  ;;  %v6089_v16 = vmax.f32 %v6081_v46, 0.0  ;;  %v10069_v20 = vld [vmem:[%s10742_s29 + $0x190] sm:$0xff]   ;;  %v10070_v27 = vld [vmem:[%s10742_s29 + $0x198] sm:$0xff]  }
 0xa54   :  { %v6091_v36 = vmax.f32 %v6083_v17, 0.0  ;;  %v6092_v55 = vmax.f32 %v6084_v63, 0.0  ;;  %v6093_v26 = vmax.f32 %v6085_v19, 0.0  ;;  %v6090_v48 = vmax.f32 %v6082_v28, 0.0  ;;  %v10071_v4 = vld [vmem:[%s10742_s29 + $0x1a0] sm:$0xff]   ;;  %v10072_v37 = vld [vmem:[%s10742_s29 + $0x1a8] sm:$0xff]  }
 0xa55   :  { %v11177_v47 = vpack.c.bf16 %v6087_v33, %v6086_v53  ;;  %v11179_v8 = vpack.c.bf16 %v6089_v16, %v6088_v34  ;;  %v10073_v30 = vld [vmem:[%s10742_s29 + $0x1b0] sm:$0xff]   ;;  %v10074_v52 = vld [vmem:[%s10742_s29 + $0x1b8] sm:$0xff]  }
 0xa56   :  { %v11181_v39 = vpack.c.bf16 %v6093_v26, %v6092_v55  ;;  %v11183_v13 = vpack.c.bf16 %v6091_v36, %v6090_v48  ;;  %v9937_v29 = vld [vmem:[%s10718_s26 + $0x4] ss:$16 sps:$4 sm:$0xff]   ;;  %v9942_v57 = vld [vmem:[%s10718_s26 + $0xc] ss:$16 sps:$4 sm:$0xff]  }
 0xa57   :  { %9392 = vmatprep.mubr.bf16.mxu0 %v11177_v47  ;;  %9416 = vmatprep.mubr.bf16.mxu1 %v11177_v47 }
 0xa58   :  { %9393 = vmatmul.mubr.bf16.vlgmr.msra.gmra.mrb[172].mxu0 %v11179_v8  ;;  %9417 = vmatmul.mubr.bf16.vlgmr.msra.gmra.mrb[188].mxu1 %v11179_v8 }
 0xa59   :  { %9425 = vmatpush3.bf16.msra.mxu0 %v11138_v5  ;;  %9449 = vmatpush3.bf16.msra.mxu1 %v11157_v11  ;;  %v10041_v5 = vld [vmem:[%s10742_s29 + $0x98] sm:$0xff]  }
 0xa5a   :  { %9396 = vmatprep.mubr.bf16.mxu0 %v11183_v13  ;;  %9420 = vmatprep.mubr.bf16.mxu1 %v11183_v13  ;;  %v10042_v11 = vld [vmem:[%s10742_s29 + $0xd8] sm:$0xff]   ;;  %s10103_s29 = smov 23  }
 0xa5b   :  { %9426 = vmatprep.subr.bf16.mxu0 %v10037_v3  ;;  %9450 = vmatprep.subr.bf16.mxu1 %v10038_v32 }
 0xa5d   :  { %9427 = vmatpush3.bf16.msra.mxu0 %v10037_v3  ;;  %9451 = vmatpush3.bf16.msra.mxu1 %v10038_v32 }
 0xa5e   :  { %9428 = vmatprep.subr.bf16.mxu0 %v10039_v62  ;;  %9452 = vmatprep.subr.bf16.mxu1 %v10040_v40 }
 0xa60   :  { %9397 = vmatmul.mubr.bf16.gmra.mrb[176].mxu0 %v11181_v39  ;;  %9421 = vmatmul.mubr.bf16.gmra.mrb[192].mxu1 %v11181_v39 }
 0xa61   :  { %9429 = vmatpush3.bf16.msra.mxu0 %v10039_v62  ;;  %9453 = vmatpush3.bf16.msra.mxu1 %v10040_v40 }
 0xa62   :  { %9440 = vmatprep.mubr.bf16.mxu0 %v11177_v47  ;;  %9464 = vmatprep.mubr.bf16.mxu1 %v11177_v47 }
 0xa63   :  { %9430 = vmatprep.subr.bf16.mxu0 %v10041_v5  ;;  %9454 = vmatprep.subr.bf16.mxu1 %v10042_v11 }
 0xa65   :  { %9431 = vmatpush3.bf16.msra.mxu0 %v10041_v5  ;;  %9455 = vmatpush3.bf16.msra.mxu1 %v10042_v11 }
 0xa66   :  { %9432 = vmatprep.subr.bf16.mxu0 %v10043_v59  ;;  %9456 = vmatprep.subr.bf16.mxu1 %v10044_v7 }
 0xa69   :  { %9433 = vmatpush3.bf16.msra.mxu0 %v10043_v59  ;;  %9457 = vmatpush3.bf16.msra.mxu1 %v10044_v7 }
 0xa6a   :  { %9434 = vmatprep.subr.bf16.mxu0 %v10045_v22  ;;  %9458 = vmatprep.subr.bf16.mxu1 %v10046_v24 }
 0xa6d   :  { %9435 = vmatpush3.bf16.msra.mxu0 %v10045_v22  ;;  %9459 = vmatpush3.bf16.msra.mxu1 %v10046_v24 }
 0xa6e   :  { %9436 = vmatprep.subr.bf16.mxu0 %v10047_v49  ;;  %9460 = vmatprep.subr.bf16.mxu1 %v10048_v41 }
 0xa71   :  { %9437 = vmatpush3.bf16.msra.mxu0 %v10047_v49  ;;  %9461 = vmatpush3.bf16.msra.mxu1 %v10048_v41 }
 0xa72   :  { %9438 = vmatprep.subr.bf16.mxu0 %v10049_v0  ;;  %9462 = vmatprep.subr.bf16.mxu1 %v10050_v51 }
 0xa75   :  { %9439 = vmatpush3.bf16.msra.mxu0 %v10049_v0  ;;  %9463 = vmatpush3.bf16.msra.mxu1 %v10050_v51 }
 0xa76   :  { %9472 = vmatprep.subr.bf16.mxu0 %v10051_v10  ;;  %9496 = vmatprep.subr.bf16.mxu1 %v10052_v9 }
 0xa78   :  { %9441 = vmatmul.mubr.bf16.vlgmr.msra.gmra.mrb[180].mxu0 %v11179_v8  ;;  %9465 = vmatmul.mubr.bf16.vlgmr.msra.gmra.mrb[196].mxu1 %v11179_v8 }
 0xa79   :  { %9444 = vmatprep.mubr.bf16.mxu0 %v11183_v13  ;;  %9468 = vmatprep.mubr.bf16.mxu1 %v11183_v13 }
 0xa7a   :  { %9473 = vmatpush3.bf16.msra.mxu0 %v10051_v10  ;;  %9497 = vmatpush3.bf16.msra.mxu1 %v10052_v9 }
 0xa7b   :  { %9474 = vmatprep.subr.bf16.mxu0 %v10053_v35  ;;  %9498 = vmatprep.subr.bf16.mxu1 %v10054_v12 }
 0xa7e   :  { %9475 = vmatpush3.bf16.msra.mxu0 %v10053_v35  ;;  %9499 = vmatpush3.bf16.msra.mxu1 %v10054_v12 }
 0xa7f   :  { %9476 = vmatprep.subr.bf16.mxu0 %v10055_v18  ;;  %9500 = vmatprep.subr.bf16.mxu1 %v10056_v56 }
 0xa80   :  { %9445 = vmatmul.mubr.bf16.gmra.mrb[184].mxu0 %v11181_v39  ;;  %9469 = vmatmul.mubr.bf16.gmra.mrb[200].mxu1 %v11181_v39 }
 0xa81   :  { %9488 = vmatprep.mubr.bf16.mxu0 %v11177_v47  ;;  %9512 = vmatprep.mubr.bf16.mxu1 %v11177_v47 }
 0xa82   :  { %9477 = vmatpush3.bf16.msra.mxu0 %v10055_v18  ;;  %9501 = vmatpush3.bf16.msra.mxu1 %v10056_v56 }
 0xa83   :  { %9478 = vmatprep.subr.bf16.mxu0 %v10057_v50  ;;  %9502 = vmatprep.subr.bf16.mxu1 %v10058_v43 }
 0xa86   :  { %9479 = vmatpush3.bf16.msra.mxu0 %v10057_v50  ;;  %9503 = vmatpush3.bf16.msra.mxu1 %v10058_v43 }
 0xa87   :  { %9480 = vmatprep.subr.bf16.mxu0 %v10059_v44  ;;  %9504 = vmatprep.subr.bf16.mxu1 %v10060_v45 }
 0xa8a   :  { %9481 = vmatpush3.bf16.msra.mxu0 %v10059_v44  ;;  %9505 = vmatpush3.bf16.msra.mxu1 %v10060_v45 }
 0xa8b   :  { %9482 = vmatprep.subr.bf16.mxu0 %v10061_v61  ;;  %9506 = vmatprep.subr.bf16.mxu1 %v10062_v21 }
 0xa8e   :  { %9483 = vmatpush3.bf16.msra.mxu0 %v10061_v61  ;;  %9507 = vmatpush3.bf16.msra.mxu1 %v10062_v21 }
 0xa8f   :  { %9484 = vmatprep.subr.bf16.mxu0 %v10063_v31  ;;  %9508 = vmatprep.subr.bf16.mxu1 %v10064_v2 }
 0xa92   :  { %9485 = vmatpush3.bf16.msra.mxu0 %v10063_v31  ;;  %9509 = vmatpush3.bf16.msra.mxu1 %v10064_v2 }
 0xa93   :  { %9486 = vmatprep.subr.bf16.mxu0 %v10065_v25  ;;  %9510 = vmatprep.subr.bf16.mxu1 %v10066_v60 }
 0xa96   :  { %9487 = vmatpush3.bf16.msra.mxu0 %v10065_v25  ;;  %9511 = vmatpush3.bf16.msra.mxu1 %v10066_v60 }
 0xa97   :  { %9520 = vmatprep.subr.bf16.mxu0 %v10067_v38 }
 0xa99   :  { %9489 = vmatmul.mubr.bf16.vlgmr.msra.gmra.mrb[188].mxu0 %v11179_v8  ;;  %9513 = vmatmul.mubr.bf16.vlgmr.msra.gmra.mrb[204].mxu1 %v11179_v8 }
 0xa9a   :  { %9492 = vmatprep.mubr.bf16.mxu0 %v11183_v13  ;;  %9516 = vmatprep.mubr.bf16.mxu1 %v11183_v13 }
 0xa9b   :  { %9521 = vmatpush3.bf16.msra.mxu0 %v10067_v38 }
 0xa9c   :  { %9522 = vmatprep.subr.bf16.mxu0 %v10068_v23 }
 0xa9f   :  { %9523 = vmatpush3.bf16.msra.mxu0 %v10068_v23 }
 0xaa0   :  { %9524 = vmatprep.subr.bf16.mxu0 %v10069_v20 }
 0xaa1   :  { %9493 = vmatmul.mubr.bf16.gmra.mrb[192].mxu0 %v11181_v39  ;;  %9517 = vmatmul.mubr.bf16.gmra.mrb[208].mxu1 %v11181_v39 }
 0xaa2   :  { %9536 = vmatprep.mubr.bf16.mxu0 %v11177_v47  ;;  %6668 = vmatprep.mubr.bf16.mxu1 %v9937_v29 }
 0xaa3   :  { %9525 = vmatpush3.bf16.msra.mxu0 %v10069_v20 }
 0xaa4   :  { %9526 = vmatprep.subr.bf16.mxu0 %v10070_v27 }
 0xaa7   :  { %9527 = vmatpush3.bf16.msra.mxu0 %v10070_v27  ;;  %v9935_v27 = vld [vmem:[%s10718_s26] ss:$16 sps:$4 sm:$0xff]  }
 0xaa8   :  { %9528 = vmatprep.subr.bf16.mxu0 %v10071_v4 }
 0xaab   :  { %9529 = vmatpush3.bf16.msra.mxu0 %v10071_v4 }
 0xaac   :  { %9530 = vmatprep.subr.bf16.mxu0 %v10072_v37 }
 0xaaf   :  { %9531 = vmatpush3.bf16.msra.mxu0 %v10072_v37 }
 0xab0   :  { %9532 = vmatprep.subr.bf16.mxu0 %v10073_v30 }
 0xab3   :  { %9533 = vmatpush3.bf16.msra.mxu0 %v10073_v30  ;;  %v9938_v30 = vld [vmem:[%s10718_s26 + $0x24] ss:$16 sps:$4 sm:$0xff]  }
 0xab4   :  { %9534 = vmatprep.subr.bf16.mxu0 %v10074_v52 }
 0xab7   :  { %9535 = vmatpush3.bf16.msra.mxu0 %v10074_v52 }
 0xab8   :  { %6685 = vmatprep.subr.bf16.mxu0 %v11338_v15 }
 0xaba   :  { %9537 = vmatmul.mubr.bf16.vlgmr.msra.gmra.mrb[196].mxu0 %v11179_v8 }
 0xabb   :  { %9540 = vmatprep.mubr.bf16.mxu0 %v11183_v13 }
 0xac2   :  { %9541 = vmatmul.mubr.bf16.gmra.mrb[200].mxu0 %v11181_v39 }
 0xac3   :  { %6717 = vmatprep.mubr.bf16.mxu0 %v9942_v57 }
 0xb2b   :  { %v9394_v58 = vpop.f32.mrb[172].mxu0  ;;  %v9418_v42 = vpop.f32.mrb[188].mxu1 }
 0xb2c   :  { %v6132_v46 = vpop.f32.mrb[173].mxu0  ;;  %v6201_v17 = vpop.f32.mrb[189].mxu1 }
 0xb2d   :  { %v9395_v63 = vpop.f32.mrb[174].mxu0  ;;  %v9419_v19 = vpop.f32.mrb[190].mxu1 }
 0xb2e   :  { %v6164_v28 = vpack.c.bf16 %v9395_v63, %v9394_v58  ;;  %v6233_v53 = vpack.c.bf16 %v9419_v19, %v9418_v42  ;;  %v6135_v33 = vpop.f32.mrb[175].mxu0  ;;  %v6204_v34 = vpop.f32.mrb[191].mxu1 }
 0xb2f   :  { %v6163_v16 = vpack.c.bf16 %v6135_v33, %v6132_v46  ;;  %v6232_v36 = vpack.c.bf16 %v6204_v34, %v6201_v17 }
 0xb33   :  { %v9398_v55 = vpop.f32.mrb[176].mxu0  ;;  %v9422_v26 = vpop.f32.mrb[192].mxu1 }
 0xb34   :  { %v6148_v48 = vpop.f32.mrb[177].mxu0  ;;  %v6217_v47 = vpop.f32.mrb[193].mxu1 }
 0xb35   :  { %v9399_v8 = vpop.f32.mrb[178].mxu0  ;;  %v9423_v39 = vpop.f32.mrb[194].mxu1 }
 0xb36   :  { %v6166_v13 = vpack.c.bf16 %v9399_v8, %v9398_v55  ;;  %v6235_v3 = vpack.c.bf16 %v9423_v39, %v9422_v26  ;;  %v6151_v32 = vpop.f32.mrb[179].mxu0  ;;  %v6220_v62 = vpop.f32.mrb[195].mxu1 }
 0xb37   :  { %v6165_v40 = vpack.c.bf16 %v6151_v32, %v6148_v48  ;;  %v6234_v5 = vpack.c.bf16 %v6220_v62, %v6217_v47 }
 0xb4b   :  { %v9442_v11 = vpop.f32.mrb[180].mxu0  ;;  %v9466_v59 = vpop.f32.mrb[196].mxu1 }
 0xb4c   :  { %v6270_v7 = vpop.f32.mrb[181].mxu0  ;;  %v6339_v22 = vpop.f32.mrb[197].mxu1 }
 0xb4d   :  { %v9443_v24 = vpop.f32.mrb[182].mxu0  ;;  %v9467_v49 = vpop.f32.mrb[198].mxu1 }
 0xb4e   :  { %v6302_v41 = vpack.c.bf16 %v9443_v24, %v9442_v11  ;;  %v6371_v0 = vpack.c.bf16 %v9467_v49, %v9466_v59  ;;  %v6273_v51 = vpop.f32.mrb[183].mxu0  ;;  %v6342_v10 = vpop.f32.mrb[199].mxu1  ;;  %v9940_v24 = vld [vmem:[%s10718_s26 + $0x8] ss:$16 sps:$4 sm:$0xff]   ;;  %v9944_v49 = vld [vmem:[%s10718_s26 + $0x2c] ss:$16 sps:$4 sm:$0xff]  }
 0xb4f   :  { %v6301_v9 = vpack.c.bf16 %v6273_v51, %v6270_v7  ;;  %v6370_v35 = vpack.c.bf16 %v6342_v10, %v6339_v22 }
 0xb51   :  { %8428 = vmatprep.subr.bf16.mxu1 %v6301_v9 }
 0xb52   :  { %8429 = vmatpush3.bf16.msra.mxu1 %v6163_v16 }
 0xb53   :  { %v9446_v12 = vpop.f32.mrb[184].mxu0  ;;  %v9470_v18 = vpop.f32.mrb[200].mxu1  ;;  %8430 = vmatprep.subr.bf16.mxu1 %v6302_v41  ;;  %v9946_v41 = vld [vmem:[%s10718_s26 + $0x28] ss:$16 sps:$4 sm:$0xff]  }
 0xb54   :  { %v6286_v56 = vpop.f32.mrb[185].mxu0  ;;  %v6355_v50 = vpop.f32.mrb[201].mxu1 }
 0xb55   :  { %v9447_v43 = vpop.f32.mrb[186].mxu0  ;;  %v9471_v44 = vpop.f32.mrb[202].mxu1 }
 0xb56   :  { %v6304_v45 = vpack.c.bf16 %v9447_v43, %v9446_v12  ;;  %v6373_v61 = vpack.c.bf16 %v9471_v44, %v9470_v18  ;;  %v6289_v21 = vpop.f32.mrb[187].mxu0  ;;  %v6358_v31 = vpop.f32.mrb[203].mxu1  ;;  %8431 = vmatpush3.bf16.msra.mxu1 %v6164_v28  ;;  %v10102_v18 = vmov 0.0  }
 0xb57   :  { %v6303_v2 = vpack.c.bf16 %v6289_v21, %v6286_v56  ;;  %v6372_v25 = vpack.c.bf16 %v6358_v31, %v6355_v50  ;;  %v7684_v21 = vld [vmem:[%s6917_s4] ss:$0 sm:$0xff] }
 0xb59   :  { %8432 = vmatprep.subr.bf16.mxu1 %v6303_v2  ;;  %v7480_v2 = vld [vmem:[%s6919_s11] ss:$0 sm:$0xff] }
 0xb5a   :  { %8433 = vmatpush3.bf16.msra.mxu1 %v6165_v40 }
 0xb5b   :  { %8434 = vmatprep.subr.bf16.mxu1 %v6304_v45 }
 0xb5e   :  { %8435 = vmatpush3.bf16.msra.mxu1 %v6166_v13 }
 0xb5f   :  { %8436 = vmatprep.subr.bf16.mxu1 %v6370_v35 }
 0xb62   :  { %8437 = vmatpush3.bf16.msra.mxu1 %v6232_v36 }
 0xb63   :  { %8438 = vmatprep.subr.bf16.mxu1 %v6371_v0 }
 0xb66   :  { %8439 = vmatpush3.bf16.msra.mxu1 %v6233_v53  ;;  %v9943_v53 = vld [vmem:[%s10718_s26 + $0x20] ss:$16 sps:$4 sm:$0xff]   ;;  %s6918_s26 = sld [smem:[%s11306_s0 + %s10103_s29]]  }
 0xb67   :  { %8440 = vmatprep.subr.bf16.mxu1 %v6372_v25 }
 0xb6a   :  { %8441 = vmatpush3.bf16.msra.mxu1 %v6234_v5 }
 0xb6b   :  { %8442 = vmatprep.subr.bf16.mxu1 %v6373_v61 }
 0xb6c   :  { %v9490_v60 = vpop.f32.mrb[188].mxu0  ;;  %v9514_v38 = vpop.f32.mrb[204].mxu1  ;;  %v7479_v61 = vld [vmem:[%s6918_s26] ss:$0 sm:$0xff] }
 0xb6d   :  { %v6408_v23 = vpop.f32.mrb[189].mxu0  ;;  %v6477_v20 = vpop.f32.mrb[205].mxu1  ;;  %v4543_v31 = vmul.f32 %v7479_v61, %v11116_v14 }
 0xb6e   :  { %v9491_v4 = vpop.f32.mrb[190].mxu0  ;;  %v9515_v37 = vpop.f32.mrb[206].mxu1  ;;  %8443 = vmatpush3.bf16.msra.mxu1 %v6235_v3 }
 0xb6f   :  { %v6440_v52 = vpack.c.bf16 %v9491_v4, %v9490_v60  ;;  %v6509_v29 = vpack.c.bf16 %v9515_v37, %v9514_v38  ;;  %v6411_v57 = vpop.f32.mrb[191].mxu0  ;;  %v6480_v58 = vpop.f32.mrb[207].mxu1  ;;  %v4544_v60 = vmul.f32 %v7479_v61, %v11118_v6  ;;  %v4553_v38 = vadd.f32 %v7480_v2, %v4543_v31 }
 0xb70   :  { %v6439_v42 = vpack.c.bf16 %v6411_v57, %v6408_v23  ;;  %v6508_v46 = vpack.c.bf16 %v6480_v58, %v6477_v20 }
 0xb71   :  { %6669 = vmatmul.mubr.bf16.vlgmr.msra.gmra.mrb[212].mxu1 %v9935_v27  ;;  %v4554_v4 = vadd.f32 %v7480_v2, %v4544_v60  ;;  %v7693_v60 = vld [vmem:[%s6920_s14] ss:$0 sm:$0xff] }
 0xb72   :  { %6686 = vmatpush1.bf16.msra.mxu0 %v6439_v42  ;;  %6676 = vmatprep.mubr.bf16.mxu1 %v9938_v30  ;;  %v4545_v42 = vmul.f32 %v7479_v61, %v11120_v54 }
 0xb73   :  { %6687 = vmatprep.subr.bf16.mxu0 %v11338_v15 }
 0xb74   :  { %v9494_v17 = vpop.f32.mrb[192].mxu0  ;;  %v9518_v63 = vpop.f32.mrb[208].mxu1 }
 0xb75   :  { %v6424_v19 = vpop.f32.mrb[193].mxu0  ;;  %v6493_v28 = vpop.f32.mrb[209].mxu1 }
 0xb76   :  { %v9495_v33 = vpop.f32.mrb[194].mxu0  ;;  %v9519_v34 = vpop.f32.mrb[210].mxu1  ;;  %6688 = vmatpush1.bf16.msra.mxu0 %v6440_v52  ;;  %v4557_v52 = vmax.f32 %v4553_v38, 0.0 }
 0xb77   :  { %v6442_v16 = vpack.c.bf16 %v9495_v33, %v9494_v17  ;;  %v6511_v36 = vpack.c.bf16 %v9519_v34, %v9518_v63  ;;  %v6427_v55 = vpop.f32.mrb[195].mxu0  ;;  %v6496_v26 = vpop.f32.mrb[211].mxu1  ;;  %6689 = vmatprep.subr.bf16.mxu0 %v11338_v15  ;;  %v4558_v17 = vmax.f32 %v4554_v4, 0.0  ;;  %v7694_v4 = vld [vmem:[%s6921_s17] ss:$0 sm:$0xff] }
 0xb78   :  { %v6441_v48 = vpack.c.bf16 %v6427_v55, %v6424_v19  ;;  %v6510_v47 = vpack.c.bf16 %v6496_v26, %v6493_v28  ;;  %v4555_v28 = vadd.f32 %v7480_v2, %v4545_v42 }
 0xb79   :  { %6677 = vmatmul.mubr.bf16.gmra.mrb[216].mxu1 %v9943_v53 }
 0xb7a   :  { %6690 = vmatpush1.bf16.msra.mxu0 %v6441_v48  ;;  %v4559_v48 = vmax.f32 %v4555_v28, 0.0  ;;  %v6807_v28 = vld [vmem:[%s10804_s7 + $0x20] sm:$0xff] }
 0xb7b   :  { %6691 = vmatprep.subr.bf16.mxu0 %v11338_v15 }
 0xb7e   :  { %6692 = vmatpush1.bf16.msra.mxu0 %v6442_v16 }
 0xb7f   :  { %6693 = vmatprep.subr.bf16.mxu0 %v11338_v15 }
 0xb82   :  { %6694 = vmatpush1.bf16.msra.mxu0 %v6508_v46  ;;  %v4546_v46 = vmul.f32 %v7479_v61, %v11114_v1 }
 0xb83   :  { %6695 = vmatprep.subr.bf16.mxu0 %v11338_v15 }
 0xb86   :  { %6696 = vmatpush1.bf16.msra.mxu0 %v6509_v29 }
 0xb87   :  { %6697 = vmatprep.subr.bf16.mxu0 %v11338_v15 }
 0xb8a   :  { %6698 = vmatpush1.bf16.msra.mxu0 %v6510_v47 }
 0xb8b   :  { %6699 = vmatprep.subr.bf16.mxu0 %v11338_v15 }
 0xb8d   :  { %v9538_v8 = vpop.f32.mrb[196].mxu0 }
 0xb8e   :  { %v6546_v39 = vpop.f32.mrb[197].mxu0  ;;  %6700 = vmatpush1.bf16.msra.mxu0 %v6511_v36  ;;  %v4556_v36 = vadd.f32 %v7480_v2, %v4546_v46 }
 0xb8f   :  { %v9539_v13 = vpop.f32.mrb[198].mxu0  ;;  %6701 = vmatprep.subr.bf16.mxu0 %v11338_v15 }
 0xb90   :  { %v6578_v3 = vpack.c.bf16 %v9539_v13, %v9538_v8  ;;  %v6549_v32 = vpop.f32.mrb[199].mxu0  ;;  %v4560_v13 = vmax.f32 %v4556_v36, 0.0 }
 0xb91   :  { %v6577_v62 = vpack.c.bf16 %v6549_v32, %v6546_v39 }
 0xb93   :  { %6702 = vmatpush1.bf16.msra.mxu0 %v6577_v62 }
 0xb94   :  { %6703 = vmatprep.subr.bf16.mxu0 %v11338_v15 }
 0xb95   :  { %v9542_v40 = vpop.f32.mrb[200].mxu0 }
 0xb96   :  { %v6562_v5 = vpop.f32.mrb[201].mxu0 }
 0xb97   :  { %v9543_v11 = vpop.f32.mrb[202].mxu0  ;;  %6704 = vmatpush1.bf16.msra.mxu0 %v6578_v3 }
 0xb98   :  { %v6580_v59 = vpack.c.bf16 %v9543_v11, %v9542_v40  ;;  %v6565_v7 = vpop.f32.mrb[203].mxu0  ;;  %6705 = vmatprep.subr.bf16.mxu0 %v11338_v15 }
 0xb99   :  { %v6579_v22 = vpack.c.bf16 %v6565_v7, %v6562_v5 }
 0xb9b   :  { %6706 = vmatpush1.bf16.msra.mxu0 %v6579_v22 }
 0xb9c   :  { %6707 = vmatprep.subr.bf16.mxu0 %v11338_v15 }
 0xb9f   :  { %6708 = vmatpush1.bf16.msra.mxu0 %v6580_v59 }
 0xba2   :  { %6718 = vmatmul.mubr.bf16.vlgmr.msra.gmra.mrb[204].mxu0 %v9940_v24 }
 0xba3   :  { %6725 = vmatprep.mubr.bf16.mxu0 %v9944_v49 }
 0xbaa   :  { %6726 = vmatmul.mubr.bf16.gmra.mrb[208].mxu0 %v9946_v41 }
 0xbab   :  { %6879 = vmatprep.mubr.f32.mxu0 %v10102_v18 }
 0xc44   :  { %v8444_v0 = vpop.f32.mrb[212].mxu1 }
 0xc45   :  { %v8445_v51 = vpop.f32.mrb[213].mxu1 }
 0xc46   :  { %v8446_v10 = vadd.f32 %v8445_v51, %v8444_v0  ;;  %v8447_v9 = vpop.f32.mrb[214].mxu1 }
 0xc47   :  { %v8448_v35 = vpop.f32.mrb[215].mxu1 }
 0xc48   :  { %v8449_v12 = vadd.f32 %v8448_v35, %v8447_v9  ;;  %v6671_v25 = vadd.f32 %v8446_v10, %v7684_v21 }
 0xc4a   :  { %v6674_v37 = vadd.f32 %v8449_v12, %v7684_v21 }
 0xc4c   :  { %v8450_v56 = vpop.f32.mrb[216].mxu1 }
 0xc4d   :  { %v8451_v50 = vpop.f32.mrb[217].mxu1 }
 0xc4e   :  { %v8452_v43 = vadd.f32 %v8451_v50, %v8450_v56  ;;  %v8453_v44 = vpop.f32.mrb[218].mxu1 }
 0xc4f   :  { %v8454_v15 = vpop.f32.mrb[219].mxu1 }
 0xc50   :  { %v8455_v45 = vadd.f32 %v8454_v15, %v8453_v44  ;;  %v6679_v19 = vadd.f32 %v8452_v43, %v7684_v21 }
 0xc52   :  { %v6682_v55 = vadd.f32 %v8455_v45, %v7684_v21 }
 0xc75   :  { %v6719_v23 = vpop.f32.mrb[204].mxu0 }
 0xc76   :  { %v6720_v20 = vadd.f32 %v6719_v23, %v6671_v25  ;;  %v6721_v27 = vpop.f32.mrb[205].mxu0 }
 0xc77   :  { %v6722_v30 = vpop.f32.mrb[206].mxu0 }
 0xc78   :  { %v6734_v29 = vmax.f32 %v6720_v20, 0.0  ;;  %v6723_v57 = vadd.f32 %v6722_v30, %v6674_v37  ;;  %v6724_v58 = vpop.f32.mrb[207].mxu0 }
 0xc7a   :  { %v6738_v14 = vadd.f32 %v6734_v29, %v4557_v52  ;;  %v6735_v63 = vmax.f32 %v6723_v57, 0.0 }
 0xc7c   :  { %v6739_v6 = vadd.f32 %v6735_v63, %v4558_v17  ;;  %v6805_v17 = vld [vmem:[%s10804_s7 + $0x10] sm:$0xff] }
 0xc7d   :  { %v6727_v53 = vpop.f32.mrb[208].mxu0 }
 0xc7e   :  { %v6744_v33 = vadd.f32 %v6739_v6, %v6738_v14  ;;  %v6728_v34 = vadd.f32 %v6727_v53, %v6679_v19  ;;  %v6729_v16 = vpop.f32.mrb[209].mxu0  ;;  %v6809_v53 = vld [vmem:[%s10804_s7 + $0x30] sm:$0xff] }
 0xc7f   :  { %v6730_v26 = vpop.f32.mrb[210].mxu0 }
 0xc80   :  { %v6736_v47 = vmax.f32 %v6728_v34, 0.0  ;;  %v6731_v8 = vadd.f32 %v6730_v26, %v6682_v55  ;;  %v6732_v39 = vpop.f32.mrb[211].mxu0  ;;  %v6802_v34 = vld [vmem:[%s6900_s20] sm:$0xff] }
 0xc82   :  { %v6740_v54 = vadd.f32 %v6736_v47, %v4559_v48  ;;  %v6737_v1 = vmax.f32 %v6731_v8, 0.0 }
 0xc84   :  { %v6745_v3 = vadd.f32 %v6744_v33, %v6740_v54  ;;  %v6741_v32 = vadd.f32 %v6737_v1, %v4560_v13  ;;  %v9550_v33 = vpack.c.bf16 %v6809_v53, %v6807_v28 }
 0xc86   :  { %v6746_v62 = vadd.f32 %v6745_v3, %v6741_v32 }
 0xc88   :  { %v6747_v40 = vrot.slane %v6746_v62, 4 }
 0xc8a   :  { %v6748_v5 = vadd.f32 %v6747_v40, %v6746_v62 }
 0xc8c   :  { %v6749_v11 = vrot.slane %v6748_v5, 2 }
 0xc8e   :  { %v6750_v59 = vadd.f32 %v6749_v11, %v6748_v5 }
 0xc90   :  { %v6751_v7 = vrot.slane %v6750_v59, 1 }
 0xc92   :  { %v6752_v22 = vadd.f32 %v6751_v7, %v6750_v59 }
 0xc94   :  { %v6753_v24 = vmul.f32 0.03125, %v6752_v22 }
 0xc96   :  { %v6754_v49 = vsub.f32 %v6738_v14, %v6753_v24  ;;  %v6755_v41 = vsub.f32 %v6739_v6, %v6753_v24  ;;  %v6756_v0 = vsub.f32 %v6740_v54, %v6753_v24  ;;  %v6757_v51 = vsub.f32 %v6741_v32, %v6753_v24  ;;  %v6803_v14 = vld [vmem:[%s10804_s7] sm:$0xff] }
 0xc97   :  { %v9546_v6 = vpack.c.bf16 %v6805_v17, %v6803_v14 }
 0xc98   :  { %v6758_v10 = vmul.f32 %v6754_v49, %v6754_v49  ;;  %v6759_v9 = vmul.f32 %v6755_v41, %v6755_v41  ;;  %v6760_v35 = vmul.f32 %v6756_v0, %v6756_v0  ;;  %v6761_v18 = vmul.f32 %v6757_v51, %v6757_v51 }
 0xc9a   :  { %v6762_v12 = vadd.f32 %v6759_v9, %v6758_v10 }
 0xc9c   :  { %v6763_v56 = vadd.f32 %v6762_v12, %v6760_v35 }
 0xc9e   :  { %v6764_v50 = vadd.f32 %v6763_v56, %v6761_v18 }
 0xca0   :  { %v6765_v43 = vrot.slane %v6764_v50, 4 }
 0xca2   :  { %v6766_v44 = vadd.f32 %v6765_v43, %v6764_v50 }
 0xca4   :  { %v6767_v15 = vrot.slane %v6766_v44, 2 }
 0xca6   :  { %v6768_v45 = vadd.f32 %v6767_v15, %v6766_v44 }
 0xca8   :  { %v6769_v61 = vrot.slane %v6768_v45, 1 }
 0xcaa   :  { %v6770_v21 = vadd.f32 %v6769_v61, %v6768_v45 }
 0xcac   :  { %v6771_v31 = vmul.f32 0.03125, %v6770_v21 }
 0xcae   :  { %v6772_v2 = vadd.f32 1e-05, %v6771_v31 }
 0xcb0   :  { %9957 = vrsqrt.f32 %v6772_v2 }
 0xcba   :  { %v9958_v25 = vpop.eup %9957 }
 0xcbb   :  { %v6774_v38 = vmul.f32 %v9958_v25, %v6754_v49  ;;  %v6775_v23 = vmul.f32 %v9958_v25, %v6755_v41  ;;  %v6776_v20 = vmul.f32 %v9958_v25, %v6756_v0  ;;  %v6777_v27 = vmul.f32 %v9958_v25, %v6757_v51 }
 0xcbd   :  { %v6784_v37 = vmul.f32 %v7693_v60, %v6774_v38  ;;  %v6785_v30 = vmul.f32 %v7693_v60, %v6775_v23  ;;  %v6786_v52 = vmul.f32 %v7693_v60, %v6776_v20  ;;  %v6787_v29 = vmul.f32 %v7693_v60, %v6777_v27 }
 0xcbf   :  { %v6794_v57 = vadd.f32 %v7694_v4, %v6784_v37  ;;  %v6795_v58 = vadd.f32 %v7694_v4, %v6785_v30  ;;  %v6796_v42 = vadd.f32 %v7694_v4, %v6786_v52  ;;  %v6797_v46 = vadd.f32 %v7694_v4, %v6787_v29 }
 0xcc1   :  { %6798 = vst [vmem:[%s10804_s7 + $0x8] sm:$0xff] %v6794_v57  ;;  %6799 = vst [vmem:[%s10804_s7 + $0x18] sm:$0xff] %v6795_v58  ;;  %v9544_v63 = vpack.c.bf16 %v6795_v58, %v6794_v57  ;;  %v9548_v19 = vpack.c.bf16 %v6797_v46, %v6796_v42 }
 0xcc2   :  { %6800 = vst [vmem:[%s10804_s7 + $0x28] sm:$0xff] %v6796_v42  ;;  %6801 = vst [vmem:[%s10804_s7 + $0x38] sm:$0xff] %v6797_v46 }
 0xcc3   :  { %9545 = vmatprep.subr.bf16.mxu0 %v9544_v63 }
 0xcc4   :  { %9547 = vmatpush1.bf16.msra.mxu0 %v9546_v6 }
 0xcc5   :  { %9549 = vmatprep.subr.bf16.mxu0 %v9548_v19 }
 0xcc8   :  { %9551 = vmatpush1.bf16.msra.mxu0 %v9550_v33 }
 0xccb   :  { %7695 = vmatmul.mubr.msk.f32.vlgmr.msra.gmra.mrb[212].mxu0 %vm6811_vm0, %v6802_v34 }
 0xd9e   :  { %v6881_v16 = vpop.f32.mrb[212].mxu0 }
 0xd9f   :  { %6886 = vst [vmem:[%s6928_s24] sm:$0xff] %v6881_v16  ;;  %v6883_v36 = vpop.f32.mrb[213].mxu0 }
 0xda0   :  { %6887 = vst [vmem:[%s6928_s24 + $0x8] sm:$0xff] %v6883_v36 }

</bundles_post_ra>
